<compile_context>
chip_gen: v6e
topology: v6e:2x2x1
jax: 0.10.0
libtpu: 0.0.40
codegen_flags: <defaults>
</compile_context>

<pallas_src>
import functools

import jax
import jax.numpy as jnp
from jax.experimental import pallas as pl
from jax.experimental.pallas import tpu as pltpu


def _round_up(x, m):
    return ((x + m - 1) // m) * m


def _gen_tuning():
    """Per-generation (row-chunk byte budget, scoped VMEM limit)."""
    kind = ""
    try:
        kind = jax.devices()[0].device_kind.lower()
    except Exception:
        pass
    if "v5" in kind or "v6" in kind:            # 128 MiB VMEM parts: bigger chunks
        return 6 * 1024 * 1024, 64 * 1024 * 1024
    return 3 * 1024 * 1024, 32 * 1024 * 1024    # v7x (64 MiB) / unknown: stay safe


def _pick_tile_h(H, Wp, cin, cout_p, kp, budget_bytes):
    """Largest even row-chunk whose per-chunk working set fits the budget.

    cdiv chunking + an in-kernel validity mask, so H need not be divisible."""
    per_row = Wp * (cout_p * 4 + kp * 2 + cin * 2 + 4)   # act f32 + rhs/x bf16 + mask
    t = max(2, budget_bytes // max(per_row, 1))
    t = min(t, _round_up(H, 2))
    return max(2, 2 * (t // 2))                          # even (halo BlockSpec)


# ----------------------------------------------------------------------------
# Fused kernel: 3x3 conv (pad=1) + bias + ReLU + global average pool + linear
# head + softmax + per-sample cross-entropy.
# grid = (batch [parallel], row chunks [arbitrary])
# ----------------------------------------------------------------------------
def conv_pool_head_kernel(lab_ref, xmain_ref, xhalo_ref, wm_ref, bias_ref,
                          cw_ref, cb_ref, prob_ref, nll_ref, pool_ref,
                          *, H, W, Wp, Cin, KP, tile_h, inv_hw):
    bi = pl.program_id(0)
    c = pl.program_id(1)
    last = pl.num_programs(1) - 1
    Lc = tile_h * Wp

    @pl.when(c == 0)
    def _():
        pool_ref[...] = jnp.zeros_like(pool_ref)

    # Row chunk + 2-row bottom halo + one zero row, concatenated along the
    # lane axis (Wp % 128 == 0, so the concat is vreg-aligned).
    xc = jnp.concatenate(
        [xmain_ref[0], xhalo_ref[0], jnp.zeros((Cin, Wp), jnp.bfloat16)],
        axis=-1)                                          # (Cin, (tile_h+3)*Wp)

    # im2col in vregs: 9*Cin statically shifted lane views of the chunk,
    # stacked on sublanes and zero-padded to K = KP.  One K=KP MXU dot per
    # chunk instead of 9 accumulating K=Cin dots.
    taps = []
    for ci in range(Cin):
        for dh in range(3):
            for dw in range(3):
                s = dh * Wp + dw
                taps.append(xc[ci:ci + 1, s:s + Lc])      # (1, Lc) static slice
    if KP > 9 * Cin:
        taps.append(jnp.zeros((KP - 9 * Cin, Lc), jnp.bfloat16))
    rhs = jnp.concatenate(taps, axis=0)                   # (KP, Lc) bf16

    acc = jnp.dot(wm_ref[...], rhs, preferred_element_type=jnp.float32)
    act = jnp.maximum(acc + bias_ref[...], 0.0)           # (Cout_p, Lc) f32

    # Validity mask: drop lane padding (w >= W) and rows past H (partial last
    # chunk).  The reshape is vreg-aligned because Wp is a multiple of 128.
    row_i = jax.lax.broadcasted_iota(jnp.int32, (tile_h, Wp), 0)
    col_i = jax.lax.broadcasted_iota(jnp.int32, (tile_h, Wp), 1)
    ok = ((c * tile_h + row_i) < H) & (col_i < W)
    act = act * ok.astype(jnp.float32).reshape(1, Lc)

    pool_ref[...] += jnp.sum(act, axis=-1, keepdims=True)   # (Cout_p, 1)

    # Epilogue: classifier head, softmax prob of class 1, per-sample NLL.
    @pl.when(c == last)
    def _():
        pooled = pool_ref[...] * inv_hw                      # (Cout_p, 1)
        logits = (jnp.sum(pooled * cw_ref[...], axis=0, keepdims=True)
                  + cb_ref[...])                             # (1, 2)
        l0 = logits[:, 0:1]
        l1 = logits[:, 1:2]
        m = jnp.maximum(l0, l1)
        e0 = jnp.exp(l0 - m)
        e1 = jnp.exp(l1 - m)
        denom = e0 + e1
        lab = lab_ref[bi]                                    # SMEM scalar
        # NOTE: labels are assumed to be in {0, 1} (binary deepfake task).
        sel = jnp.where(lab == 1, l1, l0)
        prob_ref[...] = (e1 / denom).reshape(1, 1, 1)
        nll_ref[...] = (m + jnp.log(denom) - sel).reshape(1, 1, 1)


# ----------------------------------------------------------------------------
# Wrapper: Deepfake2ForensicWrapper.forward(image, label)
# ----------------------------------------------------------------------------
def deepfake_forward(image_nchw, label, params):
    """image_nchw: (B, Cin, H, W) f32, label: (B,) int -> dict."""
    B, Cin, H, W = image_nchw.shape
    label = label.astype(jnp.int32)                     # data_dict['label'].long()
    Cout = params["conv_w"].shape[-1]
    Cout_p = _round_up(max(Cout, 8), 8)
    KP = _round_up(9 * Cin, 16)
    Wp = _round_up(W + 2, 128)                          # lane-aligned padded row

    budget, vmem_limit = _gen_tuning()
    tile_h = _pick_tile_h(H, Wp, Cin, Cout_p, KP, budget)
    n_chunks = -(-H // tile_h)
    Rp = n_chunks * tile_h + 2                          # rows incl. halo padding

    # Single fused pad(+bf16 cast)+reshape: NCHW consumed directly, no
    # NCHW->NHWC transpose, zero halo baked in, rows lane-aligned to Wp.
    xflat = (jnp.pad(image_nchw,
                     ((0, 0), (0, 0), (1, Rp - H - 1), (1, Wp - W - 1)))
             .astype(jnp.bfloat16)
             .reshape(B, Cin, Rp * Wp))

    # Conv kernel as a (Cout_p, KP) matrix, K ordered (ci, dh, dw).
    wm = jnp.transpose(params["conv_w"], (2, 0, 1, 3)).reshape(9 * Cin, Cout)
    wmat = (jnp.zeros((Cout_p, KP), jnp.float32)
            .at[:Cout, :9 * Cin].set(wm.T)
            .astype(jnp.bfloat16))
    bias = jnp.zeros((Cout_p, 1), jnp.float32).at[:Cout, 0].set(params["conv_b"])
    clsw = jnp.zeros((Cout_p, 2), jnp.float32).at[:Cout, :].set(params["cls_w"])
    clsb = params["cls_b"].reshape(1, 2).astype(jnp.float32)

    cost = pl.CostEstimate(
        flops=2 * B * H * W * 9 * Cin * Cout,           # real Cout
        transcendentals=3 * B,
        bytes_accessed=(xflat.size * 2 + wmat.size * 2
                        + (bias.size + clsw.size + clsb.size) * 4
                        + 3 * B * 4),
    )

    grid_spec = pltpu.PrefetchScalarGridSpec(
        num_scalar_prefetch=1,                          # labels live in SMEM
        grid=(B, n_chunks),
        in_specs=[
            # tile_h-row chunk of one image (flattened, lane-aligned rows)
            pl.BlockSpec((1, Cin, tile_h * Wp), lambda b, c, lab: (b, 0, c)),
            # 2-row bottom halo of the same array (tile_h is even)
            pl.BlockSpec((1, Cin, 2 * Wp),
                         lambda b, c, lab: (b, 0, (c + 1) * (tile_h // 2))),
            pl.BlockSpec((Cout_p, KP), lambda b, c, lab: (0, 0)),
            pl.BlockSpec((Cout_p, 1), lambda b, c, lab: (0, 0)),
            pl.BlockSpec((Cout_p, 2), lambda b, c, lab: (0, 0)),
            pl.BlockSpec((1, 2), lambda b, c, lab: (0, 0)),
        ],
        out_specs=[
            pl.BlockSpec((1, 1, 1), lambda b, c, lab: (b, 0, 0)),
            pl.BlockSpec((1, 1, 1), lambda b, c, lab: (b, 0, 0)),
        ],
        scratch_shapes=[pltpu.VMEM((Cout_p, 1), jnp.float32)],   # pooled acc
    )

    prob, nll = pl.pallas_call(
        functools.partial(conv_pool_head_kernel, H=H, W=W, Wp=Wp, Cin=Cin,
                          KP=KP, tile_h=tile_h, inv_hw=1.0 / float(H * W)),
        out_shape=(jax.ShapeDtypeStruct((B, 1, 1), jnp.float32),   # P(class 1)
                   jax.ShapeDtypeStruct((B, 1, 1), jnp.float32)),  # per-sample CE
        grid_spec=grid_spec,
        compiler_params=pltpu.CompilerParams(
            dimension_semantics=("parallel", "arbitrary"),
            vmem_limit_bytes=vmem_limit),
        cost_estimate=cost,
    )(label, xflat, xflat, wmat, bias, clsw, clsb)

    overall = jnp.mean(nll[:, 0, 0])                    # trivial cross-batch mean
    losses = {"overall": overall, "cls": overall}
    return {
        "backward_loss": overall,
        "pred_label": prob[:, 0, 0],                    # (B,)
        "visual_loss": losses,
    }


# ----------------------------------------------------------------------------
# Pure-JAX reference (f32) for a loose numerical sanity check
# ----------------------------------------------------------------------------
def reference_forward(image_nchw, label, params):
    x = jnp.transpose(image_nchw, (0, 2, 3, 1)).astype(jnp.float32)
    y = jax.lax.conv_general_dilated(
        x, params["conv_w"], window_strides=(1, 1), padding="SAME",
        dimension_numbers=("NHWC", "HWIO", "NHWC"))
    y = jax.nn.relu(y + params["conv_b"])
    pooled = y.mean(axis=(1, 2))
    logits = pooled @ params["cls_w"] + params["cls_b"]
    prob = jax.nn.softmax(logits, axis=-1)[:, 1]
    logp = jax.nn.log_softmax(logits, axis=-1)
    lab = label.astype(jnp.int32)
    nll = -jnp.take_along_axis(logp, lab[:, None], axis=-1)[:, 0]
    return prob, nll.mean()


# ----------------------------------------------------------------------------
# Deterministic synthetic parameters (no checkpoint loading)
# ----------------------------------------------------------------------------
def init_params(cin=3, cout=16, key=jax.random.PRNGKey(0)):
    k1, k2, k3, k4 = jax.random.split(key, 4)
    return {
        "conv_w": 0.1 * jax.random.normal(k1, (3, 3, cin, cout), jnp.float32),
        "conv_b": 0.1 * jax.random.normal(k2, (cout,), jnp.float32),
        "cls_w": 0.1 * jax.random.normal(k3, (cout, 2), jnp.float32),
        "cls_b": 0.1 * jax.random.normal(k4, (2,), jnp.float32),
    }


if __name__ == "__main__":
    key = jax.random.PRNGKey(0)
    kimg, klab, kpar = jax.random.split(key, 3)

    B, Cin, H, W = 2, 3, 16, 16
    image = jax.random.normal(kimg, (B, Cin, H, W), jnp.float32)   # NCHW like PyTorch
    label = jax.random.randint(klab, (B,), 0, 2, jnp.int32)
    params = init_params(cin=Cin, cout=16, key=kpar)

    fwd = jax.jit(deepfake_forward)
    out = fwd(image, label, params)
    jax.block_until_ready(out["backward_loss"])
    jax.block_until_ready(out["pred_label"])

    # sanity: finite loss, valid probabilities, matches f32 reference (bf16 tol)
    assert bool(jnp.isfinite(out["backward_loss"]))
    assert bool(jnp.all((out["pred_label"] >= 0.0) & (out["pred_label"] <= 1.0)))
    ref_prob, ref_loss = reference_forward(image, label, params)
    assert bool(jnp.allclose(out["pred_label"], ref_prob, atol=5e-2, rtol=5e-2))
    assert bool(jnp.allclose(out["backward_loss"], ref_loss, atol=5e-2, rtol=5e-2))

    print("KERNEL_OK")
</pallas_src>

<mosaic_0001>
module attributes {stable_mosaic.version = 11 : i64} {
  func.func @conv_pool_head_kernel(%arg0: i32, %arg1: i32, %arg2: memref<2xi32, #tpu.memory_space<smem>>, %arg3: memref<1x3x2048xbf16, #tpu.memory_space<vmem>>, %arg4: memref<1x3x256xbf16, #tpu.memory_space<vmem>>, %arg5: memref<16x32xbf16, #tpu.memory_space<vmem>>, %arg6: memref<16x1xf32, #tpu.memory_space<vmem>>, %arg7: memref<16x2xf32, #tpu.memory_space<vmem>>, %arg8: memref<1x2xf32, #tpu.memory_space<vmem>>, %arg9: memref<1x1x1xf32, #tpu.memory_space<vmem>>, %arg10: memref<1x1x1xf32, #tpu.memory_space<vmem>>, %arg11: memref<16x1xf32, #tpu.memory_space<vmem>>) attributes {dimension_semantics = [#tpu.dimension_semantics<parallel>, #tpu.dimension_semantics<arbitrary>], iteration_bounds = array<i64: 2, 1>, scalar_prefetch = 1 : i64, scratch_operands = 1 : i64, tpu.core_type = #tpu.core_type<tc>, window_params = [{transform_indices = @transform_0, window_bounds = array<i64: 1, 3, 2048>}, {transform_indices = @transform_1, window_bounds = array<i64: 1, 3, 256>}, {pipeline_mode = #tpu.pipeline_mode<synchronous>, transform_indices = @transform_2, window_bounds = array<i64: 16, 32>}, {pipeline_mode = #tpu.pipeline_mode<synchronous>, transform_indices = @transform_3, window_bounds = array<i64: 16, 1>}, {pipeline_mode = #tpu.pipeline_mode<synchronous>, transform_indices = @transform_4, window_bounds = array<i64: 16, 2>}, {pipeline_mode = #tpu.pipeline_mode<synchronous>, transform_indices = @transform_5, window_bounds = array<i64: 1, 2>}, {transform_indices = @transform_6, window_bounds = array<i64: 1, 1, 1>}, {transform_indices = @transform_7, window_bounds = array<i64: 1, 1, 1>}]} {
    %c0_i32 = arith.constant 0 : i32
    %0 = arith.cmpi eq, %arg1, %c0_i32 : i32
    %1 = arith.extui %0 : i1 to i32
    %c0_i32_0 = arith.constant 0 : i32
    %2 = arith.cmpi ne, %1, %c0_i32_0 : i32
    scf.if %2 {
      %cst_22 = arith.constant 0.000000e+00 : f32
      %70 = vector.broadcast %cst_22 : f32 to vector<16x1xf32>
      %c0_23 = arith.constant 0 : index
      %c0_24 = arith.constant 0 : index
      %71 = vector.load %arg11[%c0_23, %c0_24] : memref<16x1xf32, #tpu.memory_space<vmem>>, vector<16x1xf32>
      tpu.vector_store %arg11[%c0_23, %c0_24], %70 {strides = array<i32>} : memref<16x1xf32, #tpu.memory_space<vmem>>, vector<16x1xf32>,
    } else {
    }
    %c0 = arith.constant 0 : index
    %c0_1 = arith.constant 0 : index
    %c0_2 = arith.constant 0 : index
    %3 = vector.load %arg3[%c0, %c0_1, %c0_2] : memref<1x3x2048xbf16, #tpu.memory_space<vmem>>, vector<1x3x2048xbf16>
    %4 = vector.shape_cast %3 : vector<1x3x2048xbf16> to vector<3x2048xbf16>
    %c0_3 = arith.constant 0 : index
    %c0_4 = arith.constant 0 : index
    %c0_5 = arith.constant 0 : index
    %5 = vector.load %arg4[%c0_3, %c0_4, %c0_5] : memref<1x3x256xbf16, #tpu.memory_space<vmem>>, vector<1x3x256xbf16>
    %6 = vector.shape_cast %5 : vector<1x3x256xbf16> to vector<3x256xbf16>
    %cst = arith.constant 0.000000e+00 : bf16
    %7 = vector.broadcast %cst : bf16 to vector<3x128xbf16>
    %8 = tpu.concatenate %4, %6, %7 in 1 : vector<3x2048xbf16>, vector<3x256xbf16>, vector<3x128xbf16> -> vector<3x2432xbf16>
    %9 = vector.extract_strided_slice %8 {offsets = [0, 0], sizes = [1, 2048], strides = [1, 1]} : vector<3x2432xbf16> to vector<1x2048xbf16>
    %10 = vector.extract_strided_slice %8 {offsets = [0, 1], sizes = [1, 2048], strides = [1, 1]} : vector<3x2432xbf16> to vector<1x2048xbf16>
    %11 = vector.extract_strided_slice %8 {offsets = [0, 2], sizes = [1, 2048], strides = [1, 1]} : vector<3x2432xbf16> to vector<1x2048xbf16>
    %12 = vector.extract_strided_slice %8 {offsets = [0, 128], sizes = [1, 2048], strides = [1, 1]} : vector<3x2432xbf16> to vector<1x2048xbf16>
    %13 = vector.extract_strided_slice %8 {offsets = [0, 129], sizes = [1, 2048], strides = [1, 1]} : vector<3x2432xbf16> to vector<1x2048xbf16>
    %14 = vector.extract_strided_slice %8 {offsets = [0, 130], sizes = [1, 2048], strides = [1, 1]} : vector<3x2432xbf16> to vector<1x2048xbf16>
    %15 = vector.extract_strided_slice %8 {offsets = [0, 256], sizes = [1, 2048], strides = [1, 1]} : vector<3x2432xbf16> to vector<1x2048xbf16>
    %16 = vector.extract_strided_slice %8 {offsets = [0, 257], sizes = [1, 2048], strides = [1, 1]} : vector<3x2432xbf16> to vector<1x2048xbf16>
    %17 = vector.extract_strided_slice %8 {offsets = [0, 258], sizes = [1, 2048], strides = [1, 1]} : vector<3x2432xbf16> to vector<1x2048xbf16>
    %18 = vector.extract_strided_slice %8 {offsets = [1, 0], sizes = [1, 2048], strides = [1, 1]} : vector<3x2432xbf16> to vector<1x2048xbf16>
    %19 = vector.extract_strided_slice %8 {offsets = [1, 1], sizes = [1, 2048], strides = [1, 1]} : vector<3x2432xbf16> to vector<1x2048xbf16>
    %20 = vector.extract_strided_slice %8 {offsets = [1, 2], sizes = [1, 2048], strides = [1, 1]} : vector<3x2432xbf16> to vector<1x2048xbf16>
    %21 = vector.extract_strided_slice %8 {offsets = [1, 128], sizes = [1, 2048], strides = [1, 1]} : vector<3x2432xbf16> to vector<1x2048xbf16>
    %22 = vector.extract_strided_slice %8 {offsets = [1, 129], sizes = [1, 2048], strides = [1, 1]} : vector<3x2432xbf16> to vector<1x2048xbf16>
    %23 = vector.extract_strided_slice %8 {offsets = [1, 130], sizes = [1, 2048], strides = [1, 1]} : vector<3x2432xbf16> to vector<1x2048xbf16>
    %24 = vector.extract_strided_slice %8 {offsets = [1, 256], sizes = [1, 2048], strides = [1, 1]} : vector<3x2432xbf16> to vector<1x2048xbf16>
    %25 = vector.extract_strided_slice %8 {offsets = [1, 257], sizes = [1, 2048], strides = [1, 1]} : vector<3x2432xbf16> to vector<1x2048xbf16>
    %26 = vector.extract_strided_slice %8 {offsets = [1, 258], sizes = [1, 2048], strides = [1, 1]} : vector<3x2432xbf16> to vector<1x2048xbf16>
    %27 = vector.extract_strided_slice %8 {offsets = [2, 0], sizes = [1, 2048], strides = [1, 1]} : vector<3x2432xbf16> to vector<1x2048xbf16>
    %28 = vector.extract_strided_slice %8 {offsets = [2, 1], sizes = [1, 2048], strides = [1, 1]} : vector<3x2432xbf16> to vector<1x2048xbf16>
    %29 = vector.extract_strided_slice %8 {offsets = [2, 2], sizes = [1, 2048], strides = [1, 1]} : vector<3x2432xbf16> to vector<1x2048xbf16>
    %30 = vector.extract_strided_slice %8 {offsets = [2, 128], sizes = [1, 2048], strides = [1, 1]} : vector<3x2432xbf16> to vector<1x2048xbf16>
    %31 = vector.extract_strided_slice %8 {offsets = [2, 129], sizes = [1, 2048], strides = [1, 1]} : vector<3x2432xbf16> to vector<1x2048xbf16>
    %32 = vector.extract_strided_slice %8 {offsets = [2, 130], sizes = [1, 2048], strides = [1, 1]} : vector<3x2432xbf16> to vector<1x2048xbf16>
    %33 = vector.extract_strided_slice %8 {offsets = [2, 256], sizes = [1, 2048], strides = [1, 1]} : vector<3x2432xbf16> to vector<1x2048xbf16>
    %34 = vector.extract_strided_slice %8 {offsets = [2, 257], sizes = [1, 2048], strides = [1, 1]} : vector<3x2432xbf16> to vector<1x2048xbf16>
    %35 = vector.extract_strided_slice %8 {offsets = [2, 258], sizes = [1, 2048], strides = [1, 1]} : vector<3x2432xbf16> to vector<1x2048xbf16>
    %cst_6 = arith.constant 0.000000e+00 : bf16
    %36 = vector.broadcast %cst_6 : bf16 to vector<5x2048xbf16>
    %37 = tpu.concatenate %9, %10, %11, %12, %13, %14, %15, %16, %17, %18, %19, %20, %21, %22, %23, %24 in 0 : vector<1x2048xbf16>, vector<1x2048xbf16>, vector<1x2048xbf16>, vector<1x2048xbf16>, vector<1x2048xbf16>, vector<1x2048xbf16>, vector<1x2048xbf16>, vector<1x2048xbf16>, vector<1x2048xbf16>, vector<1x2048xbf16>, vector<1x2048xbf16>, vector<1x2048xbf16>, vector<1x2048xbf16>, vector<1x2048xbf16>, vector<1x2048xbf16>, vector<1x2048xbf16> -> vector<16x2048xbf16>
    %38 = tpu.concatenate %25, %26, %27, %28, %29, %30, %31, %32, %33, %34, %35, %36 in 0 : vector<1x2048xbf16>, vector<1x2048xbf16>, vector<1x2048xbf16>, vector<1x2048xbf16>, vector<1x2048xbf16>, vector<1x2048xbf16>, vector<1x2048xbf16>, vector<1x2048xbf16>, vector<1x2048xbf16>, vector<1x2048xbf16>, vector<1x2048xbf16>, vector<5x2048xbf16> -> vector<16x2048xbf16>
    %39 = tpu.concatenate %37, %38 in 0 : vector<16x2048xbf16>, vector<16x2048xbf16> -> vector<32x2048xbf16>
    %c0_7 = arith.constant 0 : index
    %c0_8 = arith.constant 0 : index
    %40 = vector.load %arg5[%c0_7, %c0_8] : memref<16x32xbf16, #tpu.memory_space<vmem>>, vector<16x32xbf16>
    %cst_9 = arith.constant dense<0.000000e+00> : vector<16x2048xf32>
    %41 = tpu.matmul %40, %39, %cst_9 {dimension_numbers = #tpu.dot_dimension_numbers<[1], [0], [0], [1], [0, 0, 1, 1], [], []>} : vector<16x32xbf16>, vector<32x2048xbf16>, vector<16x2048xf32> -> vector<16x2048xf32>
    %c0_10 = arith.constant 0 : index
    %c0_11 = arith.constant 0 : index
    %42 = vector.load %arg6[%c0_10, %c0_11] : memref<16x1xf32, #tpu.memory_space<vmem>>, vector<16x1xf32>
    %43 = vector.broadcast %42 : vector<16x1xf32> to vector<16x2048xf32>
    %44 = arith.addf %41, %43 : vector<16x2048xf32>
    %cst_12 = arith.constant 0.000000e+00 : f32
    %45 = vector.broadcast %cst_12 : f32 to vector<16x2048xf32>
    %46 = arith.maximumf %44, %45 : vector<16x2048xf32>
    %47 = tpu.iota {dimensions = array<i32: 0>} : vector<16x128xi32>
    %48 = tpu.iota {dimensions = array<i32: 1>} : vector<16x128xi32>
    %c16_i32 = arith.constant 16 : i32
    %49 = arith.muli %arg1, %c16_i32 : i32
    %50 = vector.broadcast %49 : i32 to vector<16x128xi32>
    %51 = arith.addi %50, %47 : vector<16x128xi32>
    %c16_i32_13 = arith.constant 16 : i32
    %52 = vector.broadcast %c16_i32_13 : i32 to vector<16x128xi32>
    %53 = arith.cmpi slt, %51, %52 : vector<16x128xi32>
    %c16_i32_14 = arith.constant 16 : i32
    %54 = vector.broadcast %c16_i32_14 : i32 to vector<16x128xi32>
    %55 = arith.cmpi slt, %48, %54 : vector<16x128xi32>
    %56 = arith.andi %53, %55 : vector<16x128xi1>
    %57 = arith.extui %56 : vector<16x128xi1> to vector<16x128xi32>
    %58 = arith.sitofp %57 : vector<16x128xi32> to vector<16x128xf32>
    %59 = vector.shape_cast %58 : vector<16x128xf32> to vector<1x2048xf32>
    %60 = vector.broadcast %59 : vector<1x2048xf32> to vector<16x2048xf32>
    %61 = arith.mulf %46, %60 : vector<16x2048xf32>
    %c0_15 = arith.constant 0 : index
    %c0_16 = arith.constant 0 : index
    %62 = vector.load %arg11[%c0_15, %c0_16] : memref<16x1xf32, #tpu.memory_space<vmem>>, vector<16x1xf32>
    %cst_17 = arith.constant dense<0.000000e+00> : vector<16xf32>
    %63 = vector.multi_reduction <add>, %61, %cst_17 [1] : vector<16x2048xf32> to vector<16xf32>
    %64 = vector.shape_cast %63 : vector<16xf32> to vector<16x1xf32>
    %65 = arith.addf %62, %64 : vector<16x1xf32>
    %c0_18 = arith.constant 0 : index
    %c0_19 = arith.constant 0 : index
    %66 = vector.load %arg11[%c0_18, %c0_19] : memref<16x1xf32, #tpu.memory_space<vmem>>, vector<16x1xf32>
    tpu.vector_store %arg11[%c0_18, %c0_19], %65 {strides = array<i32>} : memref<16x1xf32, #tpu.memory_space<vmem>>, vector<16x1xf32>,
    %c0_i32_20 = arith.constant 0 : i32
    %67 = arith.cmpi eq, %arg1, %c0_i32_20 : i32
    %68 = arith.extui %67 : i1 to i32
    %c0_i32_21 = arith.constant 0 : i32
    %69 = arith.cmpi ne, %68, %c0_i32_21 : i32
    scf.if %69 {
      %c0_22 = arith.constant 0 : index
      %c0_23 = arith.constant 0 : index
      %70 = vector.load %arg11[%c0_22, %c0_23] : memref<16x1xf32, #tpu.memory_space<vmem>>, vector<16x1xf32>
      %cst_24 = arith.constant 3.906250e-03 : f32
      %71 = vector.broadcast %cst_24 : f32 to vector<16x1xf32>
      %72 = arith.mulf %70, %71 : vector<16x1xf32>
      %c0_25 = arith.constant 0 : index
      %c0_26 = arith.constant 0 : index
      %73 = vector.load %arg7[%c0_25, %c0_26] : memref<16x2xf32, #tpu.memory_space<vmem>>, vector<16x2xf32>
      %74 = vector.broadcast %72 : vector<16x1xf32> to vector<16x2xf32>
      %75 = arith.mulf %74, %73 : vector<16x2xf32>
      %cst_27 = arith.constant dense<0.000000e+00> : vector<2xf32>
      %76 = vector.multi_reduction <add>, %75, %cst_27 [0] : vector<16x2xf32> to vector<2xf32>
      %77 = vector.shape_cast %76 : vector<2xf32> to vector<1x2xf32>
      %c0_28 = arith.constant 0 : index
      %c0_29 = arith.constant 0 : index
      %78 = vector.load %arg8[%c0_28, %c0_29] : memref<1x2xf32, #tpu.memory_space<vmem>>, vector<1x2xf32>
      %79 = arith.addf %77, %78 : vector<1x2xf32>
      %80 = vector.extract_strided_slice %79 {offsets = [0, 0], sizes = [1, 1], strides = [1, 1]} : vector<1x2xf32> to vector<1x1xf32>
      %81 = vector.extract_strided_slice %79 {offsets = [0, 1], sizes = [1, 1], strides = [1, 1]} : vector<1x2xf32> to vector<1x1xf32>
      %82 = arith.maximumf %80, %81 : vector<1x1xf32>
      %83 = arith.subf %80, %82 : vector<1x1xf32>
      %84 = math.exp %83 : vector<1x1xf32>
      %85 = arith.subf %81, %82 : vector<1x1xf32>
      %86 = math.exp %85 : vector<1x1xf32>
      %87 = arith.addf %84, %86 : vector<1x1xf32>
      %88 = arith.index_cast %arg0 : i32 to index
      %89 = memref.load %arg2[%88] : memref<2xi32, #tpu.memory_space<smem>>
      %c1_i32 = arith.constant 1 : i32
      %90 = arith.cmpi eq, %89, %c1_i32 : i32
      %91 = arith.select %90, %81, %80 : vector<1x1xf32>
      %92 = arith.divf %86, %87 : vector<1x1xf32>
      %93 = vector.shape_cast %92 : vector<1x1xf32> to vector<1x1x1xf32>
      %c0_30 = arith.constant 0 : index
      %c0_31 = arith.constant 0 : index
      %c0_32 = arith.constant 0 : index
      %94 = vector.load %arg9[%c0_30, %c0_31, %c0_32] : memref<1x1x1xf32, #tpu.memory_space<vmem>>, vector<1x1x1xf32>
      tpu.vector_store %arg9[%c0_30, %c0_31, %c0_32], %93 {strides = array<i32>} : memref<1x1x1xf32, #tpu.memory_space<vmem>>, vector<1x1x1xf32>,
      %95 = math.log %87 : vector<1x1xf32>
      %96 = arith.addf %82, %95 : vector<1x1xf32>
      %97 = arith.subf %96, %91 : vector<1x1xf32>
      %98 = vector.shape_cast %97 : vector<1x1xf32> to vector<1x1x1xf32>
      %c0_33 = arith.constant 0 : index
      %c0_34 = arith.constant 0 : index
      %c0_35 = arith.constant 0 : index
      %99 = vector.load %arg10[%c0_33, %c0_34, %c0_35] : memref<1x1x1xf32, #tpu.memory_space<vmem>>, vector<1x1x1xf32>
      tpu.vector_store %arg10[%c0_33, %c0_34, %c0_35], %98 {strides = array<i32>} : memref<1x1x1xf32, #tpu.memory_space<vmem>>, vector<1x1x1xf32>,
    } else {
    }
    return
  }
  func.func @transform_0(%arg0: i32, %arg1: i32, %arg2: memref<2xi32, #tpu.memory_space<smem>>) -> (i32, i32, i32) {
    %c0_i32 = arith.constant 0 : i32
    %c0_i32_0 = arith.constant 0 : i32
    return %arg0, %c0_i32, %arg1 : i32, i32, i32
  }
  func.func @transform_1(%arg0: i32, %arg1: i32, %arg2: memref<2xi32, #tpu.memory_space<smem>>) -> (i32, i32, i32) {
    %c1_i32 = arith.constant 1 : i32
    %0 = arith.addi %arg1, %c1_i32 : i32
    %c8_i32 = arith.constant 8 : i32
    %1 = arith.muli %0, %c8_i32 : i32
    %c0_i32 = arith.constant 0 : i32
    %c0_i32_0 = arith.constant 0 : i32
    return %arg0, %c0_i32, %1 : i32, i32, i32
  }
  func.func @transform_2(%arg0: i32, %arg1: i32, %arg2: memref<2xi32, #tpu.memory_space<smem>>) -> (i32, i32) {
    %c0_i32 = arith.constant 0 : i32
    %c0_i32_0 = arith.constant 0 : i32
    %c0_i32_1 = arith.constant 0 : i32
    return %c0_i32, %c0_i32_0 : i32, i32
  }
  func.func @transform_3(%arg0: i32, %arg1: i32, %arg2: memref<2xi32, #tpu.memory_space<smem>>) -> (i32, i32) {
    %c0_i32 = arith.constant 0 : i32
    %c0_i32_0 = arith.constant 0 : i32
    %c0_i32_1 = arith.constant 0 : i32
    return %c0_i32, %c0_i32_0 : i32, i32
  }
  func.func @transform_4(%arg0: i32, %arg1: i32, %arg2: memref<2xi32, #tpu.memory_space<smem>>) -> (i32, i32) {
    %c0_i32 = arith.constant 0 : i32
    %c0_i32_0 = arith.constant 0 : i32
    %c0_i32_1 = arith.constant 0 : i32
    return %c0_i32, %c0_i32_0 : i32, i32
  }
  func.func @transform_5(%arg0: i32, %arg1: i32, %arg2: memref<2xi32, #tpu.memory_space<smem>>) -> (i32, i32) {
    %c0_i32 = arith.constant 0 : i32
    %c0_i32_0 = arith.constant 0 : i32
    %c0_i32_1 = arith.constant 0 : i32
    return %c0_i32, %c0_i32_0 : i32, i32
  }
  func.func @transform_6(%arg0: i32, %arg1: i32, %arg2: memref<2xi32, #tpu.memory_space<smem>>) -> (i32, i32, i32) {
    %c0_i32 = arith.constant 0 : i32
    %c0_i32_0 = arith.constant 0 : i32
    %c0_i32_1 = arith.constant 0 : i32
    return %arg0, %c0_i32, %c0_i32_0 : i32, i32, i32
  }
  func.func @transform_7(%arg0: i32, %arg1: i32, %arg2: memref<2xi32, #tpu.memory_space<smem>>) -> (i32, i32, i32) {
    %c0_i32 = arith.constant 0 : i32
    %c0_i32_0 = arith.constant 0 : i32
    %c0_i32_1 = arith.constant 0 : i32
    return %arg0, %c0_i32, %c0_i32_0 : i32, i32, i32
  }
}

</mosaic_0001>

<bundles_post_ra>
// kernel: deepfake_forward.1
= control target key start
LH: loop header
LB: loop body
LE: loop exit
PB: predicated region body
PF: predicated region fallthrough
CT: control target
= control target key end

     0   :  { %s7744_s0 = inlined_call_operand.vmem [shape: s32[2], index: 0, kind: input, shape index: {}]   ;;  %s7745_s1 = inlined_call_operand.vmem [shape: bf16[2,3,2304], index: 1, kind: input, shape index: {}, may-alias: {1,2}]   ;;  %s7746_s2 = inlined_call_operand.vmem [shape: bf16[2,3,2304], index: 2, kind: input, shape index: {}, may-alias: {1,2}]   ;;  %s7747_s3 = inlined_call_operand.vmem [shape: bf16[16,32], index: 3, kind: input, shape index: {}]   ;;  %s7748_s4 = inlined_call_operand.vmem [shape: f32[16,1], index: 4, kind: input, shape index: {}]   ;;  %s7749_s5 = inlined_call_operand.vmem [shape: f32[16,2], index: 5, kind: input, shape index: {}]   ;;  %s7750_s6 = inlined_call_operand.vmem [shape: f32[1,2], index: 6, kind: input, shape index: {}]   ;;  %s7751_s7 = inlined_call_operand.vmem [shape: f32[2,1,1], index: 7, kind: output, shape index: {0}]   ;;  %s7752_s8 = inlined_call_operand.vmem [shape: f32[2,1,1], index: 8, kind: output, shape index: {1}]  }
   0x1   :  { %s14_s29 = sshll.u32 %s7744_s0, 4  ;;  %s15_s29 = int_to_ptr.vmem [resolvable:$true] %s14_s29 }
   0x2   :  { %s4069_s30 = scalar_lea.vmem %s15_s29, 16  ;;  %p4074_p1 = scmp.lt.s32.totalorder %s15_s29, %s15_s29 }
   0x3   :  { %p4070_p0 = scmp.ne.s32.totalorder %s15_s29, %s4069_s30  ;;  %p4075_p2 = scmp.lt.s32.totalorder %s4069_s30, %s4069_s30 }
   0x5   :  { %p4076_p3 = por %p4075_p2, %p4074_p1 }
   0x7   :  { %p4077_p4 = pnand %p4076_p3, %p4070_p0 }
   0x9   :  { %4080 = shalt.err (!%p4077_p4)  }
   0xa   :  { %s4107_s9 = smov [#allocation4]  }
   0xb   :  { %17 = dma.vmem_to_smem %s15_s29, 16, %s4107_s9, [#allocation3] }
   0xc   :  { %4093 = dma.done.wait [#allocation3], 16 }
   0xd   :  { %4094 = vsyncadd [#allocation3], 4294967280 }
   0xe   :  { %19 = sfence }
   0xf   :  { %s4162_s10 = smov 0   ;;  %s4164_s11 = smov 0  }
  0x10   :  { %s4166_s12 = smov 0  }
  0x11 LB: > { %s37_s0 = sadd.s32 1, %s4101_s11  ;;  %p3783_p5 = scmp.ge.s32.totalorder %s4105_s12, 1  ;;  %s4105_s12 = sphi %s4166_s12, %s25_s12   ;;  %s4101_s11 = sphi %s4164_s11, %s8825_s11   ;;  %s4097_s10 = sphi %s4162_s10, %s8824_s10  }
  0x12   : > { %p39_p6 = scmp.ge.s32.totalorder %s37_s0, 2  ;;  %p299_p7 = scmp.lt.s32.totalorder %s4105_s12, 3 }
  0x14   : > { %s8827_s0 = smov (%p39_p6, %s37_s0), 0  ;;  %p300_p8 = pnand %p3783_p5, %p299_p7 }
  0x16   : > { %303 = sbr.rel (%p300_p8) target bundleno = 1814 (0x716), region = 44 }
  0x1b   : > { %p356_p9 = scmp.lt.s32.totalorder %s4097_s10, 1  ;;  %v7753_v0 = vlaneseq  ;;  %v4108_v1 = vmov 1983009808   ;;  %s4109_s18 = smov 127   ;;  %v7791_v51 = vmov 0   ;;  %vm584_vm0 = vcmask 1039360  }
  0x1c   : > { %v408_v2 = vunpack.c.l.s4 %v4108_v1  ;;  %s4110_s19 = smov 1   ;;  %3075 = vmatprep.mubr.bf16.mxu0 %v7791_v51  ;;  %3118 = vmatprep.mubr.bf16.mxu1 %v7791_v51  ;;  %vm1442_vm1 = vcmask 1040384   ;;  %vm1443_vm2 = vsmask.f32 256  ;;  %vm8028_vm3 = vcmask 7168   ;;  %s4112_s24 = smov 126  }
  0x1d   : > { %s4184_s13 = scalar_select %p356_p9, %s4097_s10, 1  ;;  %v4187_v3 = vshrl.u32 %v7753_v0, 7  ;;  %4052 = vset.pattern.permute.xlu1 %v7791_v51  ;;  %4051 = vset.pattern.permute.xlu0 %v7791_v51  ;;  %vm4735_vm4 = vmand %vm1442_vm1, %vm1443_vm2  ;;  %vm8034_vm5 = vcmask 1041408   ;;  %vm1527_vm6 = vsmask.f32 1280  ;;  %vm8040_vm7 = vcmask 1042432  }
  0x1e   : > { %v409_v4 = vunpack.c.0.s8 %v408_v2  ;;  %vm1611_vm8 = vsmask.f32 2304  ;;  %vm4761_vm9 = vmand %vm8034_vm5, %vm1527_vm6  ;;  %vm1694_vm11 = vcmask 1043456   ;;  %vm1695_vm12 = vsmask.f32 3328 }
  0x1f   : > { %8097 = vst [vmem:[#allocation6_spill] sm:$0xff] %v4187_v3  ;;  %s3802_s14 = smul.u32 36, %s4184_s13  ;;  %vm4780_vm10 = vmand %vm8040_vm7, %vm1611_vm8  ;;  %vm8036_vm13 = vcmask 1044480   ;;  %vm1779_vm14 = vsmask.f32 4352  ;;  %vm8035_vm6 = vcmask 1045504   ;;  %s388_s26 = scalar_lea.vmem %s7752_s8, %s4184_s13 }
  0x20   : > { %v4191_v5 = vsub.s32 %v409_v4, %v4187_v3  ;;  %vm4807_vm15 = vmand %vm1694_vm11, %vm1695_vm12  ;;  %vm1863_vm8 = vsmask.f32 5376  ;;  %s385_s28 = scalar_lea.vmem %s7751_s7, %s4184_s13 }
  0x21   : > { %s4198_s17 = scalar_lea.vmem %s7745_s1, %s3802_s14  ;;  %s3801_s20 = sadd.s32 32, %s3802_s14  ;;  %vm4828_vm2 = vmand %vm8036_vm13, %vm1779_vm14  ;;  %vm668_vm14 = vcmask 1031168  }
  0x22   : > { %v398_v6 = vld [vmem:[%s4198_s17 + $0x8] sm:$0xff]  ;;  %v397_v7 = vld [vmem:[%s4198_s17] sm:$0xff]  ;;  %v400_v10 = vld [vmem:[%s4198_s17 + $0x18] sm:$0xff]  ;;  %s4591_s23 = scalar_lea.vmem %s7746_s2, %s3801_s20 }
  0x23   : > { %v4203_v8 = vrot.slane %v398_v6, %v4191_v5  ;;  %v406_v9 = vcombine.high %v397_v7, %v397_v7  ;;  %v4207_v11 = vrot.slane %v400_v10, %v4191_v5  ;;  %v4216_v13 = vrot.slane %v397_v7, %v4191_v5  ;;  %v399_v45 = vld [vmem:[%s4198_s17 + $0x10] sm:$0xff]  ;;  %vm5139_vm12 = vmand %vm8035_vm6, %vm1863_vm8 }
  0x24   : > { %v423_v18 = vcombine.high %v398_v6, %v398_v6  ;;  %v457_v20 = vcombine.high %v400_v10, %v400_v10  ;;  %v4336_v50 = vrot.slane %v399_v45, %v4191_v5  ;;  %v440_v63 = vcombine.high %v399_v45, %v399_v45 }
  0x25   : > { %8098 = vst [vmem:[#allocation7_spill] sm:$0xff] %v4203_v8  ;;  %8099 = vst [vmem:[#allocation8_spill] sm:$0xff] %v4207_v11  ;;  %2072 = vrot.lane.b32.xlu0 %v4203_v8, %s4109_s18  ;;  %v4213_v12 = vcombine.high %v4203_v8, %v4203_v8  ;;  %v4221_v14 = vrot.slane %v406_v9, %v4191_v5  ;;  %v4229_v15 = vcombine.high %v4216_v13, %v4216_v13  ;;  %vm8041_vm8 = vcmask 1046528  }
  0x26   : > { %v4248_v22 = vrot.slane %v423_v18, %v4191_v5  ;;  %v4263_v26 = vshll.u32 %v4203_v8, 16  ;;  %v4275_v30 = vrot.slane %v457_v20, %v4191_v5  ;;  %v7787_v31 = vrot.slane %v4216_v13, 7  ;;  %8110 = vst [vmem:[#allocation19_spill] sm:$0xff] %v4336_v50 }
  0x27   : > { %8100 = vst [vmem:[#allocation9_spill] sm:$0xff] %v4213_v12  ;;  %2074 = vrot.lane.b32.xlu1 %v4213_v12, %s4109_s18  ;;  %8101 = vst [vmem:[#allocation10_spill] sm:$0xff] %v4221_v14  ;;  %v4235_v16 = vcombine.high %v4221_v14, %v4221_v14  ;;  %v7789_v17 = vrot.slane %v4229_v15, 7  ;;  %v7788_v19 = vrot.slane %v4221_v14, 7  ;;  %v4251_v23 = vshll.u32 %v4229_v15, 16 }
  0x28   : > { %8102 = vst [vmem:[#allocation11_spill] sm:$0xff] %v4248_v22  ;;  %v4254_v24 = vshll.u32 %v4221_v14, 16  ;;  %8105 = vst [vmem:[#allocation14_spill] sm:$0xff] %v4263_v26  ;;  %v4270_v27 = vcombine.high %v4248_v22, %v4248_v22  ;;  %v7765_v33 = vrot.slane %v4263_v26, 7  ;;  %v7783_v39 = vrot.slane %v4263_v26, 6 }
  0x29   : > { %2135 = vrot.lane.b32.xlu0 %v4216_v13, %s4110_s19  ;;  %v7786_v21 = vrot.slane %v4235_v16, 7  ;;  %8103 = vst [vmem:[#allocation12_spill] sm:$0xff] %v4251_v23  ;;  %v4260_v25 = vshll.u32 %v4235_v16, 16  ;;  %v7768_v28 = vrot.slane %v4251_v23, 7  ;;  %8107 = vst [vmem:[#allocation16_spill] sm:$0xff] %v4275_v30  ;;  %v7784_v38 = vrot.slane %v4251_v23, 6 }
  0x2a   : > { %8106 = vst [vmem:[#allocation15_spill] sm:$0xff] %v4270_v27  ;;  %v7772_v29 = vrot.slane %v4254_v24, 7  ;;  %v785_v36 = vrot.slane %v4254_v24, 6  ;;  %v7782_v42 = vrot.slane %v4203_v8, 7  ;;  %v7781_v43 = vrot.slane %v4213_v12, 7 }
  0x2b   : > { %2068 = vrot.lane.b32.xlu1 %v4221_v14, %s4109_s18  ;;  %8104 = vst [vmem:[#allocation13_spill] sm:$0xff] %v4260_v25  ;;  %v7766_v32 = vrot.slane %v4260_v25, 7  ;;  %v786_v37 = vrot.slane %v4260_v25, 6  ;;  %v3851_v41 = vpack.i.bf16 %v7784_v38, %v7783_v39  ;;  %v7767_v44 = vrot.slane %v4221_v14, 5 }
  0x2c   : > { %v3836_v34 = vpack.i.bf16 %v7772_v29, %v7768_v28  ;;  %v7770_v46 = vrot.slane %v4235_v16, 5  ;;  %v4326_v47 = vshll.u32 %v4213_v12, 16  ;;  %v4329_v48 = vshll.u32 %v4248_v22, 16 }
  0x2d   : > { %2139 = vrot.lane.b32.xlu0 %v4221_v14, %s4110_s19  ;;  %v3841_v35 = vpack.i.bf16 %v7765_v33, %v7766_v32  ;;  %v4303_v40 = vpack.i.bf16 %v786_v37, %v785_v36  ;;  %v7764_v49 = vrot.slane %v4203_v8, 5  ;;  %v4352_v54 = vcombine.high %v4336_v50, %v4336_v50 }
  0x2e   : > { %8108 = vst [vmem:[#allocation17_spill] sm:$0xff] %v4326_v47  ;;  %8109 = vst [vmem:[#allocation18_spill] sm:$0xff] %v4329_v48  ;;  %v7762_v52 = vrot.slane %v4326_v47, 7  ;;  %v7761_v53 = vrot.slane %v4329_v48, 7  ;;  %v4368_v56 = vrot.slane %v4203_v8, 4  ;;  %v788_v57 = vrot.slane %v4326_v47, 6 }
  0x2f   : > { %2137 = vrot.lane.b32.xlu1 %v4229_v15, %s4110_s19  ;;  %8111 = vst [vmem:[#allocation20_spill] sm:$0xff] %v4352_v54  ;;  %v789_v58 = vrot.slane %v4329_v48, 6  ;;  %v4381_v60 = vrot.slane %v4221_v14, 4  ;;  %v7780_v61 = vrot.slane %v4248_v22, 7  ;;  %v7779_v62 = vrot.slane %v4270_v27, 7 }
  0x30   : > { %v3856_v55 = vpack.i.bf16 %v7761_v53, %v7762_v52  ;;  %8112 = vst [vmem:[#allocation21_spill] sm:$0xff] %v4368_v56  ;;  %v7763_v1 = vrot.slane %v4213_v12, 5  ;;  %v4394_v2 = vshll.u32 %v4270_v27, 16  ;;  %v4397_v4 = vshll.u32 %v4336_v50, 16 }
  0x31   : > { %2070 = vrot.lane.b32.xlu0 %v4235_v16, %s4109_s18  ;;  %v4376_v59 = vpack.i.bf16 %v789_v58, %v788_v57  ;;  %8113 = vst [vmem:[#allocation22_spill] sm:$0xff] %v4381_v60  ;;  %v7760_v6 = vrot.slane %v4248_v22, 5  ;;  %v4404_v7 = vrot.slane %v440_v63, %v4191_v5  ;;  %v4430_v20 = vrot.slane %v4248_v22, 4 }
  0x32   : > { %8114 = vst [vmem:[#allocation23_spill] sm:$0xff] %v4394_v2  ;;  %8115 = vst [vmem:[#allocation24_spill] sm:$0xff] %v4397_v4  ;;  %v7757_v9 = vrot.slane %v4394_v2, 7  ;;  %v7755_v10 = vrot.slane %v4397_v4, 7  ;;  %v7778_v37 = vrot.slane %v4336_v50, 7  ;;  %v7759_v45 = vrot.slane %v4270_v27, 5 }
  0x33   : > { %2202 = vrot.lane.b32.xlu1 %v7789_v17, %s4109_s18  ;;  %8116 = vst [vmem:[#allocation25_spill] sm:$0xff] %v4404_v7  ;;  %v4416_v18 = vcombine.high %v4404_v7, %v4404_v7  ;;  %8118 = vst [vmem:[#allocation27_spill] sm:$0xff] %v4430_v20  ;;  %v4454_v57 = vshll.u32 %v4404_v7, 16  ;;  %v7754_v58 = vrot.slane %v4336_v50, 5  ;;  %v4484_v0 = vrot.slane %v4336_v50, 4 }
  0x34   : > { %v3866_v5 = vpack.i.bf16 %v7755_v10, %v7757_v9  ;;  %v7771_v52 = vrot.slane %v4404_v7, 5  ;;  %v4597_v39 = vshll.u32 %v4275_v30, 16  ;;  %vm2031_vm6 = vsmask.f32 7424 }
  0x35   : > { %2204 = vrot.lane.b32.xlu0 %v7788_v19, %s4109_s18  ;;  %8117 = vst [vmem:[#allocation26_spill] sm:$0xff] %v4416_v18  ;;  %8121 = vst [vmem:[#allocation30_spill] sm:$0xff] %v4454_v57  ;;  %v793_v10 = vrot.slane %v4454_v57, 6 }
  0x36   : > { %8123 = vst [vmem:[#allocation32_spill] sm:$0xff] %v4484_v0  ;;  %8132 = vst [vmem:[#allocation41_spill] sm:$0xff] %v4597_v39  ;;  %v7804_v17 = vrot.slane %v4597_v39, 7 }
  0x37   : > { %2206 = vrot.lane.b32.xlu1 %v7786_v21, %s4109_s18  ;;  %v4606_v21 = vld.sshfl [vmem:[%s4591_s23] sm:$0x33 pattern:$0x76325410] }
  0x38   : > { %8133 = vst [vmem:[#allocation42_spill] sm:$0xff] %v4606_v21  ;;  %v4622_v51 = vcombine.high %v4606_v21, %v4606_v21 }
  0x39   : > { %2076 = vrot.lane.b32.xlu0 %v4248_v22, %s4109_s18 }
  0x3a   : > { %8136 = vst [vmem:[#allocation45_spill] sm:$0xff] %v4622_v51 }
  0x3b   : > { %2078 = vrot.lane.b32.xlu1 %v4270_v27, %s4109_s18 }
  0x3d   : > { %2200 = vrot.lane.b32.xlu0 %v7787_v31, %s4109_s18 }
  0x3f   : > { %3837 = vrot.lane.b32.xlu1 %v3836_v34, %s4110_s19  ;;  %v790_v34 = vrot.slane %v4394_v2, 6 }
  0x41   : > { %3842 = vrot.lane.b32.xlu0 %v3841_v35, %s4110_s19  ;;  %v791_v35 = vrot.slane %v4397_v4, 6 }
  0x43   : > { %2141 = vrot.lane.b32.xlu1 %v4235_v16, %s4110_s19  ;;  %v4438_v36 = vpack.i.bf16 %v791_v35, %v790_v34  ;;  %v4470_v34 = vcombine.high %v4207_v11, %v4207_v11 }
  0x45   : > { %2143 = vrot.lane.b32.xlu0 %v4203_v8, %s4110_s19  ;;  %8119 = vst [vmem:[#allocation28_spill] sm:$0xff] %v4438_v36  ;;  %8122 = vst [vmem:[#allocation31_spill] sm:$0xff] %v4470_v34 }
  0x47   : > { %3847 = vrot.lane.b32.xlu1 %v4303_v40, %s4109_s18 }
  0x49   : > { %3852 = vrot.lane.b32.xlu0 %v3851_v41, %s4109_s18  ;;  %v7777_v41 = vrot.slane %v4352_v54, 7 }
  0x4b   : > { %2208 = vrot.lane.b32.xlu1 %v7782_v42, %s4109_s18 }
  0x4d   : > { %2210 = vrot.lane.b32.xlu0 %v7781_v43, %s4109_s18  ;;  %v7790_v43 = vrot.slane %v4470_v34, 7 }
  0x4f   : > { %2381 = vrot.lane.b32.xlu1 %v7767_v44, %s4110_s19  ;;  %v4534_v44 = vcombine.high %v4275_v30, %v4275_v30 }
  0x51   : > { %2383 = vrot.lane.b32.xlu0 %v7770_v46, %s4110_s19  ;;  %8127 = vst [vmem:[#allocation36_spill] sm:$0xff] %v4534_v44 }
  0x53   : > { %2385 = vrot.lane.b32.xlu1 %v7764_v49, %s4110_s19 }
  0x55   : > { %2080 = vrot.lane.b32.xlu0 %v4336_v50, %s4109_s18 }
  0x57   : > { %2082 = vrot.lane.b32.xlu1 %v4352_v54, %s4109_s18 }
  0x59   : > { %3857 = vrot.lane.b32.xlu0 %v3856_v55, %s4110_s19  ;;  %v4451_v55 = vshll.u32 %v4352_v54, 16 }
  0x5b   : > { %2145 = vrot.lane.b32.xlu1 %v4213_v12, %s4110_s19  ;;  %8120 = vst [vmem:[#allocation29_spill] sm:$0xff] %v4451_v55  ;;  %v7756_v63 = vrot.slane %v4451_v55, 7 }
  0x5d   : > { %2147 = vrot.lane.b32.xlu0 %v4248_v22, %s4110_s19 }
  0x5f   : > { %2447 = vrot.lane.b32.xlu1 %v4235_v16, %s4109_s18 }
  0x61   : > { %2449 = vrot.lane.b32.xlu0 %v4368_v56, %s4109_s18 }
  0x63   : > { %2451 = vrot.lane.b32.xlu1 %v4213_v12, %s4109_s18 }
  0x65   : > { %3862 = vrot.lane.b32.xlu0 %v4376_v59, %s4109_s18 }
  0x67   : > { %2445 = vrot.lane.b32.xlu1 %v4381_v60, %s4109_s18 }
  0x69   : > { %2212 = vrot.lane.b32.xlu0 %v7780_v61, %s4109_s18 }
  0x6b   : > { %2214 = vrot.lane.b32.xlu1 %v7779_v62, %s4109_s18  ;;  %v7785_v62 = vrot.slane %v4207_v11, 7 }
  0x6d   : > { %2387 = vrot.lane.b32.xlu0 %v7763_v1, %s4110_s19 }
  0x6f   : > { %2389 = vrot.lane.b32.xlu1 %v7760_v6, %s4110_s19  ;;  %v4512_v6 = vshll.u32 %v4207_v11, 16 }
  0x71   : > { %2084 = vrot.lane.b32.xlu0 %v4404_v7, %s4109_s18  ;;  %8126 = vst [vmem:[#allocation35_spill] sm:$0xff] %v4512_v6  ;;  %v7774_v33 = vrot.slane %v4512_v6, 7 }
  0x73   : > { %2086 = vrot.lane.b32.xlu1 %v4416_v18, %s4109_s18 }
  0x75   : > { %3867 = vrot.lane.b32.xlu0 %v3866_v5, %s4110_s19  ;;  %v7758_v5 = vrot.slane %v4454_v57, 7 }
  0x77   : > { %2149 = vrot.lane.b32.xlu1 %v4270_v27, %s4110_s19  ;;  %v3876_v35 = vpack.i.bf16 %v7758_v5, %v7756_v63  ;;  %v7773_v5 = vrot.slane %v4416_v18, 7 }
  0x79   : > { %2151 = vrot.lane.b32.xlu0 %v4336_v50, %s4110_s19 }
  0x7b   : > { %2453 = vrot.lane.b32.xlu1 %v4430_v20, %s4109_s18 }
  0x7d   : > { %2455 = vrot.lane.b32.xlu0 %v4270_v27, %s4109_s18 }
  0x7f   : > { %3872 = vrot.lane.b32.xlu1 %v4438_v36, %s4109_s18 }
  0x81   : > { %2216 = vrot.lane.b32.xlu0 %v7778_v37, %s4109_s18 }
  0x83   : > { %2218 = vrot.lane.b32.xlu1 %v7777_v41, %s4109_s18 }
  0x85   : > { %2391 = vrot.lane.b32.xlu0 %v7759_v45, %s4110_s19 }
  0x87   : > { %2393 = vrot.lane.b32.xlu1 %v7754_v58, %s4110_s19  ;;  %v792_v58 = vrot.slane %v4451_v55, 6 }
  0x89   : > { %2088 = vrot.lane.b32.xlu0 %v4207_v11, %s4109_s18  ;;  %v4492_v63 = vpack.i.bf16 %v793_v10, %v792_v58  ;;  %v7769_v10 = vrot.slane %v4352_v54, 5  ;;  %v4509_v58 = vshll.u32 %v4416_v18, 16 }
  0x8b   : > { %2090 = vrot.lane.b32.xlu1 %v4470_v34, %s4109_s18  ;;  %8124 = vst [vmem:[#allocation33_spill] sm:$0xff] %v4492_v63  ;;  %8125 = vst [vmem:[#allocation34_spill] sm:$0xff] %v4509_v58  ;;  %v7775_v49 = vrot.slane %v4509_v58, 7 }
  0x8d   : > { %3877 = vrot.lane.b32.xlu0 %v3876_v35, %s4110_s19  ;;  %v7776_v35 = vrot.slane %v4404_v7, 7 }
  0x8f   : > { %2153 = vrot.lane.b32.xlu1 %v4352_v54, %s4110_s19 }
  0x91   : > { %2155 = vrot.lane.b32.xlu0 %v4404_v7, %s4110_s19 }
  0x93   : > { %2457 = vrot.lane.b32.xlu1 %v4484_v0, %s4109_s18 }
  0x95   : > { %2459 = vrot.lane.b32.xlu0 %v4352_v54, %s4109_s18 }
  0x97   : > { %v4497_v9 = vpop.permute.xlu0 %2072  ;;  %3882 = vrot.lane.b32.xlu1 %v4492_v63, %s4109_s18  ;;  %v7836_v63 = vrot.slane %v4470_v34, 5 }
  0x99   : > { %v4502_v45 = vpop.permute.xlu1 %2074  ;;  %2220 = vrot.lane.b32.xlu0 %v7776_v35, %s4109_s18 }
  0x9b   : > { %v4514_v53 = vpop.permute.xlu0 %2135  ;;  %2222 = vrot.lane.b32.xlu1 %v7773_v5, %s4109_s18  ;;  %v4556_v5 = vrot.slane %v4404_v7, 4 }
  0x9d   : > { %v4520_v1 = vpop.permute.xlu1 %2068  ;;  %2395 = vrot.lane.b32.xlu0 %v7769_v10, %s4110_s19  ;;  %v3886_v10 = vpack.i.bf16 %v7774_v33, %v7775_v49  ;;  %8128 = vst [vmem:[#allocation37_spill] sm:$0xff] %v4556_v5  ;;  %v794_v33 = vrot.slane %v4509_v58, 6  ;;  %v795_v49 = vrot.slane %v4512_v6, 6 }
  0x9f   : > { %v4527_v32 = vpop.permute.xlu0 %2139  ;;  %2397 = vrot.lane.b32.xlu1 %v7771_v52, %s4110_s19 }
  0xa1   : > { %v4536_v28 = vpop.permute.xlu1 %2137  ;;  %2092 = vrot.lane.b32.xlu0 %v4275_v30, %s4109_s18 }
  0xa3   : > { %v4544_v46 = vpop.permute.xlu0 %2070  ;;  %2094 = vrot.lane.b32.xlu1 %v4534_v44, %s4109_s18 }
  0xa5   : > { %v4548_v52 = vpop.permute.xlu1 %2202  ;;  %3887 = vrot.lane.b32.xlu0 %v3886_v10, %s4110_s19  ;;  %v4568_v10 = vpack.i.bf16 %v795_v49, %v794_v33  ;;  %v7795_v33 = vrot.slane %v4416_v18, 5  ;;  %v4594_v49 = vshll.u32 %v4470_v34, 16 }
  0xa7   : > { %v4551_v29 = vpop.permute.xlu0 %2204  ;;  %2157 = vrot.lane.b32.xlu1 %v4416_v18, %s4110_s19  ;;  %8129 = vst [vmem:[#allocation38_spill] sm:$0xff] %v4568_v10  ;;  %8131 = vst [vmem:[#allocation40_spill] sm:$0xff] %v4594_v49  ;;  %v7805_v19 = vrot.slane %v4594_v49, 7 }
  0xa9   : > { %v4560_v35 = vpop.permute.xlu1 %2206  ;;  %2159 = vrot.lane.b32.xlu0 %v4207_v11, %s4110_s19 }
  0xab   : > { %v4564_v41 = vpop.permute.xlu0 %2076  ;;  %2461 = vrot.lane.b32.xlu1 %v4556_v5, %s4109_s18  ;;  %v4644_v5 = vrot.slane %v4207_v11, 4 }
  0xad   : > { %v4570_v37 = vpop.permute.xlu1 %2078  ;;  %2463 = vrot.lane.b32.xlu0 %v4416_v18, %s4109_s18  ;;  %8138 = vst [vmem:[#allocation47_spill] sm:$0xff] %v4644_v5  ;;  %v796_v18 = vrot.slane %v4594_v49, 6  ;;  %v7828_v49 = vrot.slane %v4275_v30, 7 }
  0xae   : > { %8130 = vst [vmem:[#allocation39_spill] sm:$0xff] %v4570_v37 }
  0xaf   : > { %v4577_v61 = vpop.permute.xlu0 %2200  ;;  %3892 = vrot.lane.b32.xlu1 %v4568_v10, %s4109_s18 }
  0xb1   : > { %v4582_v42 = vpop.permute.xlu1 %3837  ;;  %2224 = vrot.lane.b32.xlu0 %v7785_v62, %s4109_s18  ;;  %v7796_v62 = vrot.slane %v4207_v11, 5 }
  0xb3   : > { %2226 = vrot.lane.b32.xlu1 %v7790_v43, %s4109_s18  ;;  %v4602_v38 = vpop.permute.xlu0 %3842 }
  0xb5   : > { %v4608_v31 = vpop.permute.xlu1 %2141  ;;  %2399 = vrot.lane.b32.xlu0 %v7795_v33, %s4110_s19  ;;  %v3896_v33 = vpack.i.bf16 %v7804_v17, %v7805_v19  ;;  %v797_v17 = vrot.slane %v4597_v39, 6  ;;  %v4664_v39 = vshll.u32 %v4534_v44, 16 }
  0xb6   : > { %8134 = vst [vmem:[#allocation43_spill] sm:$0xff] %v4608_v31 }
  0xb7   : > { %2401 = vrot.lane.b32.xlu1 %v7796_v62, %s4110_s19  ;;  %v4618_v43 = vpop.permute.xlu0 %2143  ;;  %v4656_v58 = vpack.i.bf16 %v797_v17, %v796_v18  ;;  %8140 = vst [vmem:[#allocation49_spill] sm:$0xff] %v4664_v39  ;;  %v4672_v17 = vshll.u32 %v4606_v21, 16  ;;  %v7837_v57 = vrot.slane %v4664_v39, 6  ;;  %v7842_v0 = vrot.slane %v4664_v39, 7 }
  0xb8   : > { %8135 = vst [vmem:[#allocation44_spill] sm:$0xff] %v4618_v43 }
  0xb9   : > { %v4624_v3 = vpop.permute.xlu1 %3847  ;;  %2096 = vrot.lane.b32.xlu0 %v4606_v21, %s4109_s18  ;;  %8139 = vst [vmem:[#allocation48_spill] sm:$0xff] %v4656_v58  ;;  %8142 = vst [vmem:[#allocation51_spill] sm:$0xff] %v4672_v17 }
  0xbb   : > { %2098 = vrot.lane.b32.xlu1 %v4622_v51, %s4109_s18  ;;  %v4634_v62 = vpop.permute.xlu0 %3852 }
  0xbd   : > { %v4636_v10 = vpop.permute.xlu1 %2208  ;;  %3897 = vrot.lane.b32.xlu0 %v3896_v33, %s4110_s19 }
  0xbf   : > { %2161 = vrot.lane.b32.xlu1 %v4470_v34, %s4110_s19  ;;  %v4641_v6 = vpop.permute.xlu0 %2210 }
  0xc0   : > { %8137 = vst [vmem:[#allocation46_spill] sm:$0xff] %v4641_v6 }
  0xc1   : > { %v4648_v19 = vpop.permute.xlu1 %2381  ;;  %2163 = vrot.lane.b32.xlu0 %v4275_v30, %s4110_s19 }
  0xc3   : > { %2465 = vrot.lane.b32.xlu1 %v4644_v5, %s4109_s18  ;;  %v4654_v33 = vpop.permute.xlu0 %2383  ;;  %v7831_v5 = vrot.slane %v4534_v44, 7 }
  0xc5   : > { %v4658_v7 = vpop.permute.xlu1 %2385  ;;  %2467 = vrot.lane.b32.xlu0 %v4470_v34, %s4109_s18  ;;  %v8153_v34 = vrot.slane %v4672_v17, 6 }
  0xc7   : > { %3902 = vrot.lane.b32.xlu1 %v4656_v58, %s4109_s18  ;;  %v4668_v11 = vpop.permute.xlu0 %2080 }
  0xc8   : > { %8141 = vst [vmem:[#allocation50_spill] sm:$0xff] %v4668_v11  ;;  %v7838_v11 = vrot.slane %v4275_v30, 5 }
  0xc9   : > { %v4674_v18 = vpop.permute.xlu1 %2082  ;;  %2228 = vrot.lane.b32.xlu0 %v7828_v49, %s4109_s18  ;;  %v8146_v49 = vmov 0  }
  0xca   : > { %8143 = vst [vmem:[#allocation52_spill] sm:$0xff] %v4674_v18  ;;  %v7841_v18 = vrot.slane %v4672_v17, 7  ;;  %v3906_v55 = vpack.i.bf16 %v7837_v57, %v8146_v49  ;;  %v4714_v57 = vrot.slane %v4275_v30, 4 }
  0xcb   : > { %2230 = vrot.lane.b32.xlu1 %v7831_v5, %s4109_s18  ;;  %v4684_v58 = vpop.permute.xlu0 %3857 }
  0xcc   : > { %8144 = vst [vmem:[#allocation53_spill] sm:$0xff] %v4684_v58  ;;  %v3911_v50 = vpack.i.bf16 %v7841_v18, %v7842_v0  ;;  %8148 = vst [vmem:[#allocation56_spill] sm:$0xff] %v4714_v57  ;;  %v4722_v18 = vshrl.u32 %v4248_v22, 16  ;;  %v2171_v0 = vsel %vm8028_vm3, %v4608_v31, %v4618_v43 }
  0xcd   : > { %v4689_v54 = vpop.permute.xlu1 %2145  ;;  %2403 = vrot.lane.b32.xlu0 %v7836_v63, %s4110_s19 }
  0xce   : > { %8145 = vst [vmem:[#allocation54_spill] sm:$0xff] %v4689_v54  ;;  %v7843_v54 = vshll.u32 %v4622_v51, 16  ;;  %8150 = vst [vmem:[#allocation58_spill] sm:$0xff] %v4722_v18 }
  0xcf   : > { %2405 = vrot.lane.b32.xlu1 %v7838_v11, %s4110_s19  ;;  %v4700_v5 = vpop.permute.xlu0 %2147 }
  0xd0   : > { %8147 = vst [vmem:[#allocation55_spill] sm:$0xff] %v4700_v5  ;;  %v4719_v39 = vrot.slane %v7843_v54, 6 }
  0xd1   : > { %v4707_v36 = vpop.permute.xlu1 %2447  ;;  %3907 = vrot.lane.b32.xlu0 %v3906_v55, %s4109_s18 }
  0xd2   : > { %8149 = vst [vmem:[#allocation57_spill] sm:$0xff] %v4719_v39  ;;  %v3916_v5 = vpack.i.bf16 %v4719_v39, %v8153_v34  ;;  %v2238_v34 = vsel %vm584_vm0, %v4636_v10, %v4641_v6 }
  0xd3   : > { %3912 = vrot.lane.b32.xlu1 %v3911_v50, %s4110_s19  ;;  %v4711_v63 = vpop.permute.xlu0 %2449  ;;  %v2106_v50 = vsel %vm584_vm0, %v4564_v41, %v4570_v37  ;;  %v7862_v37 = vunpack.i.h.bf16 %v4602_v38 }
  0xd4   : > { %v2499_v43 = vsel %vm4735_vm4, %v4722_v18, %v2106_v50 }
  0xd5   : > { %v4727_v55 = vpop.permute.xlu1 %2451  ;;  %2165 = vrot.lane.b32.xlu0 %v4534_v44, %s4110_s19  ;;  %v2530_v31 = vsel %vm1442_vm1, %v2499_v43, %v2171_v0  ;;  %v8156_v0 = vunpack.i.l.bf16 %v4684_v58 }
  0xd6   : > { %v2584_v18 = vsel %vm4761_vm9, %v2530_v31, %v4263_v26 }
  0xd7   : > { %2469 = vrot.lane.b32.xlu1 %v4714_v57, %s4109_s18  ;;  %v4742_v30 = vpop.permute.xlu0 %3862  ;;  %v2285_v43 = vsel %vm8028_vm3, %v7862_v37, %v8156_v0  ;;  %v2615_v0 = vsel %vm8034_vm5, %v2584_v18, %v2238_v34  ;;  %v8163_v34 = vrot.slane %v4534_v44, 5  ;;  %v4820_v57 = vrot.slane %v8146_v49, 4 }
  0xd8   : > { %v7864_v39 = vunpack.i.h.bf16 %v4742_v30  ;;  %v2669_v31 = vsel %vm4780_vm10, %v2615_v0, %v2285_v43  ;;  %v7873_v49 = vrot.slane %v4622_v51, 5  ;;  %v8810_v43 = vld [vmem:[#allocation56_spill] sm:$0xff] }
  0xd9   : > { %v4752_v11 = vpop.permute.xlu1 %2445  ;;  %2471 = vrot.lane.b32.xlu0 %v4534_v44, %s4109_s18  ;;  %8170 = vst [vmem:[#allocation63_spill] sm:$0xff] %v4820_v57 }
  0xdb   : > { %3917 = vrot.lane.b32.xlu1 %v3916_v5, %s4109_s18  ;;  %v4773_v17 = vpop.permute.xlu0 %2212  ;;  %v8161_v5 = vrot.slane %v4606_v21, 7 }
  0xdc   : > { %8157 = vst [vmem:[#allocation59_spill] sm:$0xff] %v4773_v17  ;;  %v8162_v17 = vunpack.i.l.bf16 %v4742_v30 }
  0xdd   : > { %v4785_v37 = vpop.permute.xlu1 %2214  ;;  %2232 = vrot.lane.b32.xlu0 %v8161_v5, %s4109_s18 }
  0xde   : > { %8160 = vst [vmem:[#allocation60_spill] sm:$0xff] %v4785_v37  ;;  %v2352_v18 = vsel %vm584_vm0, %v8162_v17, %v7864_v39  ;;  %v8168_v17 = vrot.slane %v4213_v12, 6 }
  0xdf   : > { %2407 = vrot.lane.b32.xlu1 %v8163_v34, %s4110_s19  ;;  %v4802_v5 = vpop.permute.xlu0 %2387  ;;  %v8169_v34 = vrot.slane %v4606_v21, 5 }
  0xe0   : > { %8164 = vst [vmem:[#allocation61_spill] sm:$0xff] %v4802_v5  ;;  %v2700_v39 = vsel %vm8040_vm7, %v2669_v31, %v8168_v17  ;;  %v8173_v17 = vrot.slane %v4606_v21, 4 }
  0xe1   : > { %v4811_v0 = vpop.permute.xlu1 %2389  ;;  %2409 = vrot.lane.b32.xlu0 %v8169_v34, %s4110_s19  ;;  %v2754_v44 = vsel %vm4807_vm15, %v2700_v39, %v2352_v18  ;;  %v7875_v18 = vshll.u32 %v4216_v13, 16 }
  0xe2   : > { %8167 = vst [vmem:[#allocation62_spill] sm:$0xff] %v4811_v0  ;;  %v2416_v6 = vsel %vm8028_vm3, %v4802_v5, %v4811_v0  ;;  %v8175_v0 = vrot.slane %v4329_v48, 5 }
  0xe3   : > { %v2785_v31 = vsel %vm1694_vm11, %v2754_v44, %v2416_v6  ;;  %2473 = vrot.lane.b32.xlu1 %v8173_v17, %s4109_s18  ;;  %v4836_v34 = vpop.permute.xlu0 %2084  ;;  %v3921_v44 = vpack.i.bf16 %v4251_v23, %v4820_v57  ;;  %v8182_v57 = vrot.slane %v4221_v14, 7 }
  0xe4   : > { %8174 = vst [vmem:[#allocation64_spill] sm:$0xff] %v4836_v34  ;;  %v4843_v39 = vsel %vm4828_vm2, %v2785_v31, %v8175_v0  ;;  %v3926_v0 = vpack.i.bf16 %v7875_v18, %v4254_v24 }
  0xe5   : > { %8176 = vst [vmem:[#allocation65_spill] sm:$0xff] %v4843_v39  ;;  %v4846_v5 = vpop.permute.xlu1 %2086  ;;  %2475 = vrot.lane.b32.xlu0 %v4622_v51, %s4109_s18  ;;  %v7882_v51 = vrot.slane %v4221_v14, 6  ;;  %v2169_v39 = vsel %vm8028_vm3, %v4536_v28, %v4527_v32 }
  0xe6   : > { %8177 = vst [vmem:[#allocation66_spill] sm:$0xff] %v4846_v5 }
  0xe7   : > { %2411 = vrot.lane.b32.xlu1 %v7873_v49, %s4110_s19  ;;  %v4855_v6 = vpop.permute.xlu0 %3867  ;;  %v8181_v49 = vrot.slane %v4229_v15, 7 }
  0xe8   : > { %8178 = vst [vmem:[#allocation67_spill] sm:$0xff] %v4855_v6  ;;  %v2168_v6 = vsel %vm8028_vm3, %v4514_v53, %v4536_v28 }
  0xe9   : > { %v4860_v31 = vpop.permute.xlu1 %2149  ;;  %3922 = vrot.lane.b32.xlu0 %v3921_v44, %s4109_s18 }
  0xea   : > { %8179 = vst [vmem:[#allocation68_spill] sm:$0xff] %v4860_v31  ;;  %v7888_v31 = vrot.slane %v4229_v15, 6 }
  0xeb   : > { %3927 = vrot.lane.b32.xlu1 %v3926_v0, %s4109_s18  ;;  %v4864_v17 = vpop.permute.xlu0 %2151  ;;  %v8185_v0 = vrot.slane %v4216_v13, 7 }
  0xec   : > { %8180 = vst [vmem:[#allocation69_spill] sm:$0xff] %v4864_v17  ;;  %v7884_v17 = vrot.slane %v4235_v16, 6 }
  0xed   : > { %v4866_v21 = vpop.permute.xlu1 %2453  ;;  %636 = vrot.lane.b32.xlu0 %v8181_v49, %s4112_s24 }
  0xef   : > { %638 = vrot.lane.b32.xlu1 %v8182_v57, %s4112_s24  ;;  %v4874_v18 = vpop.permute.xlu0 %2455  ;;  %v3931_v57 = vpack.i.bf16 %v4263_v26, %v4260_v25 }
  0xf0   : > { %8183 = vst [vmem:[#allocation70_spill] sm:$0xff] %v4874_v18 }
  0xf1   : > { %v4877_v44 = vpop.permute.xlu1 %3872  ;;  %634 = vrot.lane.b32.xlu0 %v8185_v0, %s4112_s24 }
  0xf2   : > { %8184 = vst [vmem:[#allocation71_spill] sm:$0xff] %v4877_v44 }
  0xf3   : > { %736 = vrot.lane.b32.xlu1 %v7882_v51, %s4109_s18  ;;  %v4886_v49 = vpop.permute.xlu0 %2216 }
  0xf4   : > { %8186 = vst [vmem:[#allocation72_spill] sm:$0xff] %v4886_v49  ;;  %v8194_v49 = vrot.slane %v4263_v26, 6 }
  0xf5   : > { %v4890_v5 = vpop.permute.xlu1 %2218  ;;  %738 = vrot.lane.b32.xlu0 %v7884_v17, %s4109_s18  ;;  %v8192_v17 = vrot.slane %v4235_v16, 7 }
  0xf6   : > { %8187 = vst [vmem:[#allocation73_spill] sm:$0xff] %v4890_v5 }
  0xf7   : > { %3932 = vrot.lane.b32.xlu1 %v3931_v57, %s4109_s18  ;;  %v4897_v0 = vpop.permute.xlu0 %2391  ;;  %v8193_v57 = vrot.slane %v4251_v23, 6 }
  0xf8   : > { %8188 = vst [vmem:[#allocation74_spill] sm:$0xff] %v4897_v0  ;;  %v7893_v0 = vrot.slane %v4260_v25, 5 }
  0xf9   : > { %v4899_v34 = vpop.permute.xlu1 %2393  ;;  %734 = vrot.lane.b32.xlu0 %v7888_v31, %s4109_s18  ;;  %v7892_v31 = vrot.slane %v4263_v26, 5 }
  0xfa   : > { %8189 = vst [vmem:[#allocation75_spill] sm:$0xff] %v4899_v34  ;;  %v3941_v34 = vpack.i.bf16 %v8194_v49, %v8193_v57  ;;  %v7896_v49 = vrot.slane %v4254_v24, 5  ;;  %v7895_v57 = vrot.slane %v4203_v8, 6 }
  0xfb   : > { %3937 = vrot.lane.b32.xlu1 %v4303_v40, %s4112_s24  ;;  %v4906_v51 = vpop.permute.xlu0 %2088  ;;  %v8195_v40 = vrot.slane %v4203_v8, 7 }
  0xfc   : > { %8190 = vst [vmem:[#allocation76_spill] sm:$0xff] %v4906_v51 }
  0xfd   : > { %v4908_v5 = vpop.permute.xlu1 %2090  ;;  %640 = vrot.lane.b32.xlu0 %v8192_v17, %s4112_s24  ;;  %v3946_v17 = vpack.i.bf16 %v7892_v31, %v7893_v0  ;;  %v3951_v31 = vpack.i.bf16 %v4326_v47, %v7896_v49 }
  0xfe   : > { %8191 = vst [vmem:[#allocation77_spill] sm:$0xff] %v4908_v5 }
  0xff   : > { %642 = vrot.lane.b32.xlu1 %v8195_v40, %s4112_s24  ;;  %v4922_v51 = vpop.permute.xlu0 %3877 }
 0x100   : > { %8196 = vst [vmem:[#allocation78_spill] sm:$0xff] %v4922_v51  ;;  %v1058_v51 = vshrl.u32 %v4216_v13, 16 }
 0x101   : > { %v4928_v5 = vpop.permute.xlu1 %2153  ;;  %3942 = vrot.lane.b32.xlu0 %v3941_v34, %s4112_s24  ;;  %v8200_v34 = vrot.slane %v4213_v12, 6 }
 0x102   : > { %8197 = vst [vmem:[#allocation79_spill] sm:$0xff] %v4928_v5 }
 0x103   : > { %3947 = vrot.lane.b32.xlu1 %v3946_v17, %s4109_s18  ;;  %v4934_v44 = vpop.permute.xlu0 %2155  ;;  %v7899_v17 = vrot.slane %v4326_v47, 5 }
 0x104   : > { %8198 = vst [vmem:[#allocation80_spill] sm:$0xff] %v4934_v44 }
 0x105   : > { %v4936_v40 = vpop.permute.xlu1 %2457  ;;  %740 = vrot.lane.b32.xlu0 %v7895_v57, %s4109_s18  ;;  %v3956_v49 = vpack.i.bf16 %v7899_v17, %v4329_v48 }
 0x106   : > { %8199 = vst [vmem:[#allocation81_spill] sm:$0xff] %v4936_v40 }
 0x107   : > { %742 = vrot.lane.b32.xlu1 %v8200_v34, %s4109_s18  ;;  %v4947_v0 = vpop.permute.xlu0 %2459 }
 0x108   : > { %8201 = vst [vmem:[#allocation82_spill] sm:$0xff] %v4947_v0 }
 0x109   : > { %v4949_v5 = vpop.permute.xlu1 %3882  ;;  %3952 = vrot.lane.b32.xlu0 %v3951_v31, %s4109_s18 }
 0x10a   : > { %8202 = vst [vmem:[#allocation83_spill] sm:$0xff] %v4949_v5 }
 0x10b   : > { %992 = vrot.lane.b32.xlu1 %v4235_v16, %s4112_s24  ;;  %v4955_v57 = vpop.permute.xlu0 %2220 }
 0x10c   : > { %8203 = vst [vmem:[#allocation84_spill] sm:$0xff] %v4955_v57  ;;  %v4972_v57 = vshrl.u32 %v4229_v15, 16 }
 0x10d   : > { %v4960_v44 = vpop.permute.xlu1 %2222  ;;  %994 = vrot.lane.b32.xlu0 %v4368_v56, %s4112_s24  ;;  %v2103_v56 = vsel %vm584_vm0, %v4544_v46, %v4497_v9 }
 0x10e   : > { %8204 = vst [vmem:[#allocation85_spill] sm:$0xff] %v4960_v44  ;;  %8207 = vst [vmem:[#allocation88_spill] sm:$0xff] %v4972_v57  ;;  %v4979_v44 = vshrl.u32 %v4235_v16, 16 }
 0x10f   : > { %3957 = vrot.lane.b32.xlu1 %v3956_v49, %s4109_s18  ;;  %v4965_v34 = vpop.permute.xlu0 %2395  ;;  %v4982_v49 = vshrl.u32 %v4221_v14, 16 }
 0x110   : > { %8205 = vst [vmem:[#allocation86_spill] sm:$0xff] %v4965_v34  ;;  %8209 = vst [vmem:[#allocation90_spill] sm:$0xff] %v4979_v44 }
 0x111   : > { %v4967_v31 = vpop.permute.xlu1 %2397  ;;  %3962 = vrot.lane.b32.xlu0 %v4376_v59, %s4112_s24  ;;  %8210 = vst [vmem:[#allocation91_spill] sm:$0xff] %v4982_v49  ;;  %v8212_v59 = vrot.slane %v4213_v12, 7  ;;  %v1066_v5 = vrot.slane %v4982_v49, 3 }
 0x112   : > { %8206 = vst [vmem:[#allocation87_spill] sm:$0xff] %v4967_v31 }
 0x113   : > { %990 = vrot.lane.b32.xlu1 %v4381_v60, %s4112_s24  ;;  %v4976_v17 = vpop.permute.xlu0 %2092  ;;  %v1063_v60 = vrot.slane %v4972_v57, 3 }
 0x114   : > { %8208 = vst [vmem:[#allocation89_spill] sm:$0xff] %v4976_v17  ;;  %v8213_v17 = vrot.slane %v4248_v22, 7 }
 0x115   : > { %v4987_v31 = vpop.permute.xlu1 %2094  ;;  %644 = vrot.lane.b32.xlu0 %v8212_v59, %s4112_s24  ;;  %v8216_v59 = vrot.slane %v4329_v48, 5  ;;  %v1060_v48 = vrot.slane %v1058_v51, 3  ;;  %v2235_v51 = vsel %vm584_vm0, %v4548_v52, %v4551_v29 }
 0x116   : > { %8211 = vst [vmem:[#allocation92_spill] sm:$0xff] %v4987_v31  ;;  %v2496_v31 = vsel %vm4735_vm4, %v4979_v44, %v2103_v56 }
 0x117   : > { %646 = vrot.lane.b32.xlu1 %v8213_v17, %s4112_s24  ;;  %v4996_v34 = vpop.permute.xlu0 %3887  ;;  %v3966_v40 = vpack.i.bf16 %v4394_v2, %v8216_v59  ;;  %v5010_v17 = vshrl.u32 %v4203_v8, 16  ;;  %v2518_v56 = vsel %vm1442_vm1, %v2496_v31, %v2168_v6  ;;  %v1160_v6 = vrot.slane %v4229_v15, 3 }
 0x118   : > { %8214 = vst [vmem:[#allocation93_spill] sm:$0xff] %v4996_v34  ;;  %v2104_v34 = vsel %vm584_vm0, %v4497_v9, %v4502_v45  ;;  %v2581_v28 = vsel %vm4761_vm9, %v2518_v56, %v4251_v23  ;;  %v2236_v56 = vsel %vm584_vm0, %v4551_v29, %v4560_v35  ;;  %v2102_v29 = vsel %vm584_vm0, %v4520_v1, %v4544_v46 }
 0x119   : > { %v5003_v0 = vpop.permute.xlu1 %2157  ;;  %1111 = vrot.lane.b32.xlu0 %v1063_v60, %s4109_s18  ;;  %8217 = vst [vmem:[#allocation95_spill] sm:$0xff] %v5010_v17  ;;  %v7921_v60 = vunpack.i.l.bf16 %v4582_v42  ;;  %v2497_v31 = vsel %vm4735_vm4, %v5010_v17, %v2104_v34  ;;  %v3849_v34 = vunpack.i.l.bf16 %v4624_v3  ;;  %v2603_v23 = vsel %vm8034_vm5, %v2581_v28, %v2235_v51 }
 0x11a   : > { %8215 = vst [vmem:[#allocation94_spill] sm:$0xff] %v5003_v0  ;;  %v3840_v0 = vunpack.i.h.bf16 %v4582_v42  ;;  %v2522_v9 = vsel %vm1442_vm1, %v2497_v31, %v2169_v39  ;;  %v8220_v39 = vunpack.i.l.bf16 %v4602_v38  ;;  %v7924_v28 = vrot.slane %v4248_v22, 6 }
 0x11b   : > { %1113 = vrot.lane.b32.xlu1 %v1066_v5, %s4109_s18  ;;  %v5022_v59 = vpop.permute.xlu0 %2159  ;;  %v1161_v5 = vrot.slane %v4221_v14, 3  ;;  %v8223_v1 = vrot.slane %v4221_v14, 6 }
 0x11c   : > { %8218 = vst [vmem:[#allocation96_spill] sm:$0xff] %v5022_v59  ;;  %v3850_v59 = vunpack.i.h.bf16 %v4624_v3  ;;  %v2283_v31 = vsel %vm8028_vm3, %v3840_v0, %v8220_v39  ;;  %v2582_v3 = vsel %vm4761_vm9, %v2522_v9, %v4254_v24  ;;  %v2495_v39 = vsel %vm4735_vm4, %v4982_v49, %v2102_v29 }
 0x11d   : > { %v5028_v47 = vpop.permute.xlu1 %2461  ;;  %3967 = vrot.lane.b32.xlu0 %v3966_v40, %s4109_s18  ;;  %v2282_v40 = vsel %vm8028_vm3, %v7921_v60, %v3840_v0  ;;  %v7926_v60 = vunpack.i.l.bf16 %v4634_v62  ;;  %v2607_v51 = vsel %vm8034_vm5, %v2582_v3, %v2236_v56  ;;  %v7923_v56 = vrot.slane %v4270_v27, 6 }
 0x11e   : > { %8219 = vst [vmem:[#allocation97_spill] sm:$0xff] %v5028_v47  ;;  %v2349_v0 = vsel %vm584_vm0, %v3849_v34, %v3850_v59  ;;  %v2667_v9 = vsel %vm4780_vm10, %v2607_v51, %v2283_v31 }
 0x11f   : > { %1109 = vrot.lane.b32.xlu1 %v1060_v48, %s4109_s18  ;;  %v5049_v47 = vpop.permute.xlu0 %2463  ;;  %v2666_v48 = vsel %vm4780_vm10, %v2603_v23, %v2282_v40  ;;  %v2413_v23 = vsel %vm8028_vm3, %v4648_v19, %v4654_v33  ;;  %v2350_v46 = vsel %vm584_vm0, %v3850_v59, %v7926_v60  ;;  %v2414_v59 = vsel %vm8028_vm3, %v4654_v33, %v4658_v7 }
 0x120   : > { %v2688_v40 = vsel %vm8040_vm7, %v2666_v48, %v8223_v1  ;;  %v8225_v48 = vrot.slane %v4235_v16, 6  ;;  %v2514_v33 = vsel %vm1442_vm1, %v2495_v39, %v4514_v53  ;;  %v3855_v39 = vunpack.i.h.bf16 %v4634_v62 }
 0x121   : > { %v5059_v18 = vpop.permute.xlu1 %3892  ;;  %1178 = vrot.lane.b32.xlu0 %v1160_v6, %s4112_s24  ;;  %v2751_v31 = vsel %vm4807_vm15, %v2688_v40, %v2349_v0  ;;  %v2480_v0 = vsel %vm584_vm0, %v4707_v36, %v4711_v63  ;;  %v1159_v40 = vrot.slane %v4216_v13, 3  ;;  %v1343_v60 = vrot.slane %v4979_v44, 1 }
 0x122   : > { %8221 = vst [vmem:[#allocation98_spill] sm:$0xff] %v5059_v18  ;;  %v2773_v3 = vsel %vm1694_vm11, %v2751_v31, %v2413_v23  ;;  %v2692_v51 = vsel %vm8040_vm7, %v2667_v9, %v8225_v48  ;;  %v2481_v31 = vsel %vm584_vm0, %v4711_v63, %v4727_v55  ;;  %v8228_v48 = vrot.slane %v4260_v25, 5 }
 0x123   : > { %1180 = vrot.lane.b32.xlu1 %v1161_v5, %s4112_s24  ;;  %v5074_v6 = vpop.permute.xlu0 %2224  ;;  %v2752_v29 = vsel %vm4807_vm15, %v2692_v51, %v2350_v46  ;;  %v2234_v46 = vsel %vm584_vm0, %v4577_v61, %v4548_v52  ;;  %v8232_v61 = vshll.u32 %v4216_v13, 16 }
 0x124   : > { %8222 = vst [vmem:[#allocation99_spill] sm:$0xff] %v5074_v6  ;;  %v2777_v9 = vsel %vm1694_vm11, %v2752_v29, %v2414_v59  ;;  %v2836_v53 = vsel %vm4828_vm2, %v2773_v3, %v8228_v48  ;;  %v8233_v3 = vrot.slane %v4263_v26, 5  ;;  %v8302_v6 = vld [vmem:[#allocation67_spill] sm:$0xff] }
 0x125   : > { %v5088_v5 = vpop.permute.xlu1 %2226  ;;  %744 = vrot.lane.b32.xlu0 %v7924_v28, %s4109_s18  ;;  %v2858_v52 = vsel %vm8036_vm13, %v2836_v53, %v2480_v0  ;;  %v2580_v63 = vsel %vm4761_vm9, %v2514_v33, %v8232_v61  ;;  %v7925_v0 = vrot.slane %v4394_v2, 5  ;;  %v8235_v53 = vunpack.i.l.bf16 %v4582_v42 }
 0x126   : > { %8224 = vst [vmem:[#allocation100_spill] sm:$0xff] %v5088_v5  ;;  %v2837_v29 = vsel %vm4828_vm2, %v2777_v9, %v8233_v3  ;;  %v2599_v48 = vsel %vm8034_vm5, %v2580_v63, %v2234_v46  ;;  %v2921_v61 = vsel %vm5139_vm12, %v2858_v52, 0  ;;  %v2348_v9 = vsel %vm584_vm0, %v3855_v39, %v3849_v34  ;;  %v8301_v5 = vld [vmem:[#allocation53_spill] sm:$0xff] }
 0x127   : > { %746 = vrot.lane.b32.xlu1 %v7923_v56, %s4109_s18  ;;  %v5108_v1 = vpop.permute.xlu0 %2399  ;;  %v2862_v28 = vsel %vm8036_vm13, %v2837_v29, %v2481_v31  ;;  %v2665_v33 = vsel %vm4780_vm10, %v2599_v48, %v8235_v53  ;;  %v8237_v42 = vrot.slane %v4229_v15, 6  ;;  %v2479_v29 = vsel %vm584_vm0, %v4752_v11, %v4707_v36  ;;  %v8241_v53 = vld [vmem:[#allocation28_spill] sm:$0xff] }
 0x128   : > { %8226 = vst [vmem:[#allocation101_spill] sm:$0xff] %v5108_v1  ;;  %v2922_v31 = vsel %vm5139_vm12, %v2862_v28, 0  ;;  %v1259_v28 = vrot.slane %v4221_v14, 2 }
 0x129   : > { %v5118_v23 = vpop.permute.xlu1 %2401  ;;  %996 = vrot.lane.b32.xlu0 %v4213_v12, %s4112_s24  ;;  %v2684_v63 = vsel %vm8040_vm7, %v2665_v33, %v8237_v42  ;;  %v1260_v33 = vrot.slane %v4235_v16, 2 }
 0x12a   : > { %8227 = vst [vmem:[#allocation102_spill] sm:$0xff] %v5118_v23  ;;  %v2750_v34 = vsel %vm4807_vm15, %v2684_v63, %v2348_v9  ;;  %v8247_v63 = vrot.slane %v4270_v27, 7  ;;  %v8308_v23 = vunpack.i.l.bf16 %v8301_v5 }
 0x12b   : > { %998 = vrot.lane.b32.xlu1 %v4430_v20, %s4112_s24  ;;  %v5136_v59 = vpop.permute.xlu0 %2096  ;;  %v2769_v39 = vsel %vm1694_vm11, %v2750_v34, %v4648_v19  ;;  %v1069_v34 = vrot.slane %v4979_v44, 3  ;;  %v7929_v20 = vrot.slane %v4397_v4, 5  ;;  %v8293_v44 = vld [vmem:[#allocation54_spill] sm:$0xff] }
 0x12c   : > { %8229 = vst [vmem:[#allocation103_spill] sm:$0xff] %v5136_v59  ;;  %v8299_v59 = vld [vmem:[#allocation59_spill] sm:$0xff] }
 0x12d   : > { %v5153_v56 = vpop.permute.xlu1 %2098  ;;  %1176 = vrot.lane.b32.xlu0 %v1159_v40, %s4112_s24  ;;  %v3971_v40 = vpack.i.bf16 %v7925_v0, %v4397_v4 }
 0x12e   : > { %8234 = vst [vmem:[#allocation104_spill] sm:$0xff] %v5153_v56 }
 0x12f   : > { %2956 = vrot.lane.b32.xlu1 %v2921_v61, %s4109_s18  ;;  %v5166_v46 = vpop.permute.xlu0 %3897  ;;  %v8242_v61 = vrot.slane %v4254_v24, 5 }
 0x130   : > { %8236 = vst [vmem:[#allocation105_spill] sm:$0xff] %v5166_v46  ;;  %v8300_v46 = vld [vmem:[#allocation46_spill] sm:$0xff] }
 0x131   : > { %v5176_v3 = vpop.permute.xlu1 %2161  ;;  %2958 = vrot.lane.b32.xlu0 %v2922_v31, %s4109_s18  ;;  %v2835_v19 = vsel %vm4828_vm2, %v2769_v39, %v8242_v61  ;;  %v1258_v61 = vrot.slane %v4229_v15, 2 }
 0x132   : > { %8238 = vst [vmem:[#allocation106_spill] sm:$0xff] %v5176_v3  ;;  %v2854_v9 = vsel %vm8036_vm13, %v2835_v19, %v2479_v29  ;;  %v5228_v19 = vshrl.u32 %v4213_v12, 16  ;;  %v8298_v3 = vld [vmem:[#allocation55_spill] sm:$0xff] }
 0x133   : > { %3972 = vrot.lane.b32.xlu1 %v3971_v40, %s4109_s18  ;;  %v5184_v52 = vpop.permute.xlu0 %2163  ;;  %v2920_v11 = vsel %vm5139_vm12, %v2854_v9, 0  ;;  %v2105_v9 = vsel %vm584_vm0, %v4502_v45, %v4564_v41 }
 0x134   : > { %8239 = vst [vmem:[#allocation107_spill] sm:$0xff] %v5184_v52  ;;  %8252 = vst [vmem:[#allocation114_spill] sm:$0xff] %v5228_v19  ;;  %v2498_v41 = vsel %vm4735_vm4, %v5228_v19, %v2105_v9  ;;  %v1162_v9 = vrot.slane %v4235_v16, 3 }
 0x135   : > { %v5190_v48 = vpop.permute.xlu1 %2465  ;;  %3977 = vrot.lane.b32.xlu0 %v8241_v53, %s4112_s24  ;;  %v1072_v53 = vrot.slane %v5010_v17, 3 }
 0x136   : > { %8240 = vst [vmem:[#allocation108_spill] sm:$0xff] %v5190_v48 }
 0x137   : > { %1277 = vrot.lane.b32.xlu1 %v1259_v28, %s4109_s18  ;;  %v5201_v40 = vpop.permute.xlu0 %2467  ;;  %v8249_v28 = vld [vmem:[#allocation19_spill] sm:$0xff] }
 0x138   : > { %8243 = vst [vmem:[#allocation28_spill] sm:$0xff] %v5201_v40  ;;  %v8250_v29 = vrot.slane %v8249_v28, 7  ;;  %v5392_v52 = vshrl.u32 %v8249_v28, 16 }
 0x139   : > { %v5203_v31 = vpop.permute.xlu1 %3902  ;;  %1279 = vrot.lane.b32.xlu0 %v1260_v33, %s4109_s18 }
 0x13a   : > { %8244 = vst [vmem:[#allocation109_spill] sm:$0xff] %v5203_v31  ;;  %v8294_v31 = vld [vmem:[#allocation44_spill] sm:$0xff] }
 0x13b   : > { %v5208_v36 = vpop.permute.xlu0 %2228  ;;  %2954 = vrot.lane.b32.xlu1 %v2920_v11, %s4109_s18 }
 0x13c   : > { %8245 = vst [vmem:[#allocation110_spill] sm:$0xff] %v5208_v36 }
 0x13d   : > { %v5211_v42 = vpop.permute.xlu1 %2230  ;;  %648 = vrot.lane.b32.xlu0 %v8247_v63, %s4112_s24  ;;  %v1342_v63 = vrot.slane %v4982_v49, 1  ;;  %v8351_v49 = vld [vmem:[#allocation83_spill] sm:$0xff] }
 0x13e   : > { %8246 = vst [vmem:[#allocation111_spill] sm:$0xff] %v5211_v42 }
 0x13f   : > { %v5217_v39 = vpop.permute.xlu0 %2403  ;;  %650 = vrot.lane.b32.xlu1 %v8250_v29, %s4112_s24  ;;  %v8254_v29 = vld [vmem:[#allocation43_spill] sm:$0xff] }
 0x140   : > { %8248 = vst [vmem:[#allocation112_spill] sm:$0xff] %v5217_v39  ;;  %v2170_v0 = vsel %vm8028_vm3, %v4527_v32, %v8254_v29  ;;  %v8257_v32 = vld [vmem:[#allocation29_spill] sm:$0xff] }
 0x141   : > { %v5223_v33 = vpop.permute.xlu1 %2405  ;;  %1115 = vrot.lane.b32.xlu0 %v1069_v34, %s4109_s18  ;;  %v2526_v45 = vsel %vm1442_vm1, %v2498_v41, %v2170_v0  ;;  %v3981_v29 = vpack.i.bf16 %v8257_v32, %v7929_v20  ;;  %v1163_v20 = vrot.slane %v4203_v8, 3  ;;  %v8290_v39 = vld [vmem:[#allocation25_spill] sm:$0xff] }
 0x142   : > { %8251 = vst [vmem:[#allocation113_spill] sm:$0xff] %v5223_v33  ;;  %v2583_v0 = vsel %vm4761_vm9, %v2526_v45, %v4260_v25  ;;  %v1341_v45 = vrot.slane %v4972_v57, 1  ;;  %v2239_v25 = vsel %vm584_vm0, %v8300_v46, %v8299_v59 }
 0x143   : > { %v5233_v11 = vpop.permute.xlu0 %3907  ;;  %1117 = vrot.lane.b32.xlu1 %v1072_v53, %s4109_s18 }
 0x144   : > { %8253 = vst [vmem:[#allocation115_spill] sm:$0xff] %v5233_v11 }
 0x145   : > { %v5240_v34 = vpop.permute.xlu1 %3912  ;;  %1275 = vrot.lane.b32.xlu0 %v1258_v61, %s4109_s18  ;;  %v2237_v61 = vsel %vm584_vm0, %v4560_v35, %v4636_v10  ;;  %v8260_v35 = vunpack.i.h.bf16 %v4602_v38  ;;  %v8261_v10 = vunpack.i.l.bf16 %v4602_v38  ;;  %v8266_v38 = vld [vmem:[#allocation61_spill] sm:$0xff] }
 0x146   : > { %8255 = vst [vmem:[#allocation43_spill] sm:$0xff] %v5240_v34 }
 0x147   : > { %v5249_v53 = vpop.permute.xlu0 %2165  ;;  %1362 = vrot.lane.b32.xlu1 %v1342_v63, %s4112_s24  ;;  %v2611_v63 = vsel %vm8034_vm5, %v2583_v0, %v2237_v61  ;;  %v8263_v0 = vunpack.i.l.bf16 %v4742_v30 }
 0x148   : > { %8256 = vst [vmem:[#allocation116_spill] sm:$0xff] %v5249_v53  ;;  %v8292_v53 = vld [vmem:[#allocation58_spill] sm:$0xff] }
 0x149   : > { %v5258_v42 = vpop.permute.xlu1 %2469  ;;  %1364 = vrot.lane.b32.xlu0 %v1343_v60, %s4112_s24  ;;  %v2284_v60 = vsel %vm8028_vm3, %v8261_v10, %v8260_v35  ;;  %v2415_v35 = vsel %vm8028_vm3, %v4658_v7, %v8266_v38  ;;  %v2482_v7 = vsel %vm584_vm0, %v4727_v55, %v4866_v21  ;;  %v8273_v38 = vld [vmem:[#allocation17_spill] sm:$0xff]  ;;  %v1078_v36 = vrot.slane %v8292_v53, 3 }
 0x14a   : > { %8258 = vst [vmem:[#allocation117_spill] sm:$0xff] %v5258_v42  ;;  %v2668_v61 = vsel %vm4780_vm10, %v2611_v63, %v2284_v60  ;;  %v7935_v63 = vrot.slane %v8249_v28, 6  ;;  %v1346_v1 = vrot.slane %v8292_v53, 1 }
 0x14b   : > { %v5266_v41 = vpop.permute.xlu0 %2471  ;;  %3982 = vrot.lane.b32.xlu1 %v3981_v29, %s4109_s18  ;;  %v8264_v29 = vunpack.i.l.bf16 %v4634_v62 }
 0x14c   : > { %8259 = vst [vmem:[#allocation118_spill] sm:$0xff] %v5266_v41 }
 0x14d   : > { %v5275_v42 = vpop.permute.xlu1 %3917  ;;  %1182 = vrot.lane.b32.xlu0 %v1162_v9, %s4112_s24  ;;  %v2351_v41 = vsel %vm584_vm0, %v8264_v29, %v8263_v0  ;;  %v8267_v9 = vrot.slane %v4203_v8, 6 }
 0x14e   : > { %8262 = vst [vmem:[#allocation119_spill] sm:$0xff] %v5275_v42 }
 0x14f   : > { %v5286_v34 = vpop.permute.xlu0 %2232  ;;  %1184 = vrot.lane.b32.xlu1 %v1163_v20, %s4112_s24  ;;  %v2696_v10 = vsel %vm8040_vm7, %v2668_v61, %v8267_v9  ;;  %v8269_v20 = vld [vmem:[#allocation20_spill] sm:$0xff] }
 0x150   : > { %8265 = vst [vmem:[#allocation120_spill] sm:$0xff] %v5286_v34  ;;  %v2753_v62 = vsel %vm4807_vm15, %v2696_v10, %v2351_v41  ;;  %v7934_v29 = vrot.slane %v8269_v20, 6  ;;  %v8272_v41 = vld [vmem:[#allocation70_spill] sm:$0xff]  ;;  %v8288_v34 = vld [vmem:[#allocation39_spill] sm:$0xff] }
 0x151   : > { %v5296_v60 = vpop.permute.xlu1 %2407  ;;  %1360 = vrot.lane.b32.xlu0 %v1341_v45, %s4112_s24  ;;  %v2781_v0 = vsel %vm1694_vm11, %v2753_v62, %v2415_v35  ;;  %v2483_v45 = vsel %vm584_vm0, %v4866_v21, %v8272_v41  ;;  %v8274_v35 = vrot.slane %v8273_v38, 5  ;;  %8295 = vst [vmem:[#allocation39_spill] sm:$0xff] %v5392_v52 }
 0x152   : > { %8268 = vst [vmem:[#allocation61_spill] sm:$0xff] %v5296_v60  ;;  %v8287_v60 = vld [vmem:[#allocation50_spill] sm:$0xff] }
 0x153   : > { %v5303_v42 = vpop.permute.xlu0 %2409  ;;  %748 = vrot.lane.b32.xlu1 %v7935_v63, %s4109_s18  ;;  %v2838_v9 = vsel %vm4828_vm2, %v2781_v0, %v8274_v35  ;;  %v8278_v63 = vld [vmem:[#allocation65_spill] sm:$0xff]  ;;  %v2107_v33 = vsel %vm584_vm0, %v8288_v34, %v8287_v60 }
 0x154   : > { %8270 = vst [vmem:[#allocation121_spill] sm:$0xff] %v5303_v42  ;;  %v2866_v55 = vsel %vm8036_vm13, %v2838_v9, %v2482_v7  ;;  %v2870_v21 = vsel %vm8036_vm13, %v8278_v63, %v2483_v45  ;;  %v1261_v45 = vrot.slane %v4203_v8, 2  ;;  %v1075_v42 = vrot.slane %v5228_v19, 3 }
 0x155   : > { %v5311_v61 = vpop.permute.xlu1 %2473  ;;  %750 = vrot.lane.b32.xlu0 %v7934_v29, %s4109_s18  ;;  %v8277_v29 = vld [vmem:[#allocation32_spill] sm:$0xff]  ;;  %v2923_v0 = vsel %vm5139_vm12, %v2866_v55, 0  ;;  %v2924_v9 = vsel %vm5139_vm12, %v2870_v21, 0  ;;  %v1344_v8 = vrot.slane %v5010_v17, 1 }
 0x156   : > { %8271 = vst [vmem:[#allocation122_spill] sm:$0xff] %v5311_v61  ;;  %v7938_v61 = vrot.slane %v8257_v32, 5 }
 0x157   : > { %v5323_v10 = vpop.permute.xlu0 %2475  ;;  %1000 = vrot.lane.b32.xlu1 %v4270_v27, %s4112_s24 }
 0x158   : > { %8275 = vst [vmem:[#allocation70_spill] sm:$0xff] %v5323_v10  ;;  %v8280_v10 = vld [vmem:[#allocation30_spill] sm:$0xff] }
 0x159   : > { %v5328_v62 = vpop.permute.xlu1 %2411  ;;  %1002 = vrot.lane.b32.xlu0 %v8277_v29, %s4112_s24  ;;  %v3986_v7 = vpack.i.bf16 %v7938_v61, %v8280_v10  ;;  %v1262_v61 = vrot.slane %v4213_v12, 2  ;;  %v7967_v17 = vrot.slane %v8280_v10, 5 }
 0x15a   : > { %8276 = vst [vmem:[#allocation123_spill] sm:$0xff] %v5328_v62 }
 0x15b   : > { %v5337_v35 = vpop.permute.xlu0 %3922  ;;  %2960 = vrot.lane.b32.xlu1 %v2923_v0, %s4109_s18  ;;  %v8283_v0 = vld [vmem:[#allocation33_spill] sm:$0xff] }
 0x15c   : > { %8279 = vst [vmem:[#allocation65_spill] sm:$0xff] %v5337_v35 }
 0x15d   : > { %v5345_v29 = vpop.permute.xlu1 %3927  ;;  %2962 = vrot.lane.b32.xlu0 %v2924_v9, %s4109_s18 }
 0x15e   : > { %8281 = vst [vmem:[#allocation124_spill] sm:$0xff] %v5345_v29 }
 0x15f   : > { %v5348_v63 = vpop.permute.xlu0 %636  ;;  %3987 = vrot.lane.b32.xlu1 %v3986_v7, %s4109_s18  ;;  %v8285_v7 = vrot.slane %v8269_v20, 7 }
 0x161   : > { %v5352_v55 = vpop.permute.xlu1 %638  ;;  %3992 = vrot.lane.b32.xlu0 %v8283_v0, %s4112_s24  ;;  %v5370_v0 = vshrl.u32 %v4270_v27, 16 }
 0x162   : > { %8282 = vst [vmem:[#allocation125_spill] sm:$0xff] %v5352_v55 }
 0x163   : > { %v5357_v62 = vpop.permute.xlu0 %634  ;;  %1281 = vrot.lane.b32.xlu1 %v1261_v45, %s4109_s18  ;;  %8286 = vst [vmem:[#allocation126_spill] sm:$0xff] %v5370_v0  ;;  %v2500_v34 = vsel %vm4735_vm4, %v5370_v0, %v2107_v33  ;;  %v2173_v33 = vsel %vm8028_vm3, %v8293_v44, %v8298_v3 }
 0x165   : > { %v5360_v21 = vpop.permute.xlu1 %736  ;;  %1283 = vrot.lane.b32.xlu0 %v1262_v61, %s4109_s18  ;;  %v8291_v61 = vrot.slane %v8290_v39, 7 }
 0x167   : > { %v5363_v9 = vpop.permute.xlu0 %738  ;;  %652 = vrot.lane.b32.xlu1 %v8285_v7, %s4112_s24  ;;  %v2172_v7 = vsel %vm8028_vm3, %v8294_v31, %v8293_v44 }
 0x168   : > { %8284 = vst [vmem:[#allocation33_spill] sm:$0xff] %v5363_v9  ;;  %v2534_v26 = vsel %vm1442_vm1, %v2500_v34, %v2172_v7 }
 0x169   : > { %v5375_v45 = vpop.permute.xlu1 %3932  ;;  %654 = vrot.lane.b32.xlu0 %v8291_v61, %s4112_s24  ;;  %v8296_v61 = vld [vmem:[#allocation52_spill] sm:$0xff]  ;;  %v2585_v46 = vsel %vm4761_vm9, %v2534_v26, %v8273_v38 }
 0x16a   : > { %8289 = vst [vmem:[#allocation50_spill] sm:$0xff] %v5375_v45  ;;  %v2108_v56 = vsel %vm584_vm0, %v8287_v60, %v8296_v61  ;;  %v3860_v60 = vunpack.i.h.bf16 %v8301_v5  ;;  %v2619_v7 = vsel %vm8034_vm5, %v2585_v46, %v2239_v25  ;;  %v8305_v45 = vld [vmem:[#allocation71_spill] sm:$0xff] }
 0x16b   : > { %v5384_v11 = vpop.permute.xlu0 %734  ;;  %1119 = vrot.lane.b32.xlu1 %v1075_v42, %s4109_s18  ;;  %v1345_v42 = vrot.slane %v5228_v19, 1  ;;  %v2501_v44 = vsel %vm4735_vm4, %v5392_v52, %v2108_v56 }
 0x16c   : > { %v2538_v40 = vsel %vm1442_vm1, %v2501_v44, %v2173_v33  ;;  %v2286_v26 = vsel %vm8028_vm3, %v8308_v23, %v3860_v60  ;;  %v8309_v33 = vunpack.i.l.bf16 %v8302_v6  ;;  %v8312_v44 = vld [vmem:[#allocation74_spill] sm:$0xff] }
 0x16d   : > { %v5398_v31 = vpop.permute.xlu1 %3937  ;;  %1121 = vrot.lane.b32.xlu0 %v1078_v36, %s4109_s18  ;;  %v8304_v36 = vld [vmem:[#allocation34_spill] sm:$0xff]  ;;  %v2670_v38 = vsel %vm4780_vm10, %v2619_v7, %v2286_v26  ;;  %v8314_v26 = vunpack.i.h.bf16 %v8305_v45 }
 0x16e   : > { %8297 = vst [vmem:[#allocation54_spill] sm:$0xff] %v5398_v31  ;;  %v3996_v19 = vpack.i.bf16 %v8304_v36, %v7967_v17  ;;  %v8307_v17 = vld [vmem:[#allocation60_spill] sm:$0xff]  ;;  %v2287_v25 = vsel %vm8028_vm3, %v3860_v60, %v8309_v33 }
 0x16f   : > { %v5411_v34 = vpop.permute.xlu0 %640  ;;  %1366 = vrot.lane.b32.xlu1 %v1344_v8, %s4112_s24  ;;  %v1164_v8 = vrot.slane %v4213_v12, 3  ;;  %v2240_v56 = vsel %vm584_vm0, %v8299_v59, %v8307_v17  ;;  %v8310_v59 = vld [vmem:[#allocation18_spill] sm:$0xff]  ;;  %v8311_v12 = vunpack.i.h.bf16 %v4742_v30 }
 0x170   : > { %8303 = vst [vmem:[#allocation44_spill] sm:$0xff] %v5411_v34  ;;  %v3874_v34 = vunpack.i.l.bf16 %v8305_v45  ;;  %v2586_v5 = vsel %vm4761_vm9, %v2538_v40, %v8310_v59 }
 0x171   : > { %v5426_v48 = vpop.permute.xlu1 %642  ;;  %1368 = vrot.lane.b32.xlu0 %v1345_v42, %s4112_s24  ;;  %v1165_v42 = vrot.slane %v4248_v22, 3  ;;  %v2623_v23 = vsel %vm8034_vm5, %v2586_v5, %v2240_v56  ;;  %v8315_v56 = vrot.slane %v4248_v22, 6 }
 0x172   : > { %8306 = vst [vmem:[#allocation52_spill] sm:$0xff] %v5426_v48  ;;  %v2353_v60 = vsel %vm584_vm0, %v8311_v12, %v3874_v34  ;;  %v8313_v48 = vld [vmem:[#allocation62_spill] sm:$0xff]  ;;  %v2354_v40 = vsel %vm584_vm0, %v3874_v34, %v8314_v26  ;;  %v8318_v34 = vrot.slane %v4270_v27, 6 }
 0x173   : > { %v5440_v46 = vpop.permute.xlu0 %3942  ;;  %3997 = vrot.lane.b32.xlu1 %v3996_v19, %s4109_s18  ;;  %v2671_v19 = vsel %vm4780_vm10, %v2623_v23, %v2287_v25  ;;  %v2417_v7 = vsel %vm8028_vm3, %v8313_v48, %v8312_v44  ;;  %v2704_v30 = vsel %vm8040_vm7, %v2670_v38, %v8315_v56  ;;  %v8317_v25 = vld [vmem:[#allocation75_spill] sm:$0xff]  ;;  %v8319_v38 = vld [vmem:[#allocation26_spill] sm:$0xff] }
 0x174   : > { %v2418_v48 = vsel %vm8028_vm3, %v8312_v44, %v8317_v25  ;;  %v2708_v26 = vsel %vm8040_vm7, %v2671_v19, %v8318_v34  ;;  %v7973_v56 = vrot.slane %v8319_v38, 6  ;;  %v8324_v19 = vld [vmem:[#allocation82_spill] sm:$0xff] }
 0x175   : > { %v5453_v33 = vpop.permute.xlu1 %3947  ;;  %1186 = vrot.lane.b32.xlu0 %v1164_v8, %s4112_s24  ;;  %v2755_v8 = vsel %vm4807_vm15, %v2704_v30, %v2353_v60  ;;  %v2756_v60 = vsel %vm4807_vm15, %v2708_v26, %v2354_v40  ;;  %v8322_v30 = vld [vmem:[#allocation81_spill] sm:$0xff] }
 0x176   : > { %v2789_v23 = vsel %vm1694_vm11, %v2755_v8, %v2417_v7  ;;  %v2484_v44 = vsel %vm584_vm0, %v8272_v41, %v8322_v30  ;;  %v2793_v7 = vsel %vm1694_vm11, %v2756_v60, %v2418_v48  ;;  %v2485_v34 = vsel %vm584_vm0, %v8322_v30, %v8324_v19  ;;  %v8327_v30 = vld [vmem:[#allocation37_spill] sm:$0xff] }
 0x177   : > { %v5468_v5 = vpop.permute.xlu0 %740  ;;  %1188 = vrot.lane.b32.xlu1 %v1165_v42, %s4112_s24  ;;  %v8321_v42 = vrot.slane %v8290_v39, 6  ;;  %v8326_v48 = vrot.slane %v4397_v4, 5 }
 0x178   : > { %8316 = vst [vmem:[#allocation55_spill] sm:$0xff] %v5468_v5  ;;  %v8341_v5 = vld [vmem:[#allocation68_spill] sm:$0xff] }
 0x179   : > { %v5481_v12 = vpop.permute.xlu1 %742  ;;  %752 = vrot.lane.b32.xlu0 %v8321_v42, %s4109_s18  ;;  %v8325_v42 = vrot.slane %v4394_v2, 5  ;;  %v2841_v60 = vsel %vm4828_vm2, %v2793_v7, %v8326_v48 }
 0x17a   : > { %8320 = vst [vmem:[#allocation59_spill] sm:$0xff] %v5481_v12  ;;  %v2878_v59 = vsel %vm8036_vm13, %v2841_v60, %v2485_v34 }
 0x17b   : > { %v5492_v8 = vpop.permute.xlu0 %3952  ;;  %754 = vrot.lane.b32.xlu1 %v7973_v56, %s4109_s18  ;;  %v2840_v40 = vsel %vm4828_vm2, %v2789_v23, %v8325_v42  ;;  %v7975_v23 = vrot.slane %v8304_v36, 5 }
 0x17c   : > { %8323 = vst [vmem:[#allocation46_spill] sm:$0xff] %v5492_v8  ;;  %v2874_v41 = vsel %vm8036_vm13, %v2840_v40, %v2484_v44  ;;  %v8329_v44 = vld [vmem:[#allocation35_spill] sm:$0xff]  ;;  %v2926_v40 = vsel %vm5139_vm12, %v2878_v59, 0 }
 0x17d   : > { %v5504_v26 = vpop.permute.xlu1 %992  ;;  %1004 = vrot.lane.b32.xlu0 %v8269_v20, %s4112_s24  ;;  %v2925_v42 = vsel %vm5139_vm12, %v2874_v41, 0  ;;  %v4001_v7 = vpack.i.bf16 %v7975_v23, %v8329_v44  ;;  %v1263_v41 = vrot.slane %v4248_v22, 2  ;;  %v1264_v23 = vrot.slane %v4270_v27, 2 }
 0x17e   : > { %v1081_v22 = vrot.slane %v5370_v0, 3  ;;  %v7999_v53 = vrot.slane %v8329_v44, 5  ;;  %v8354_v44 = vunpack.i.l.bf16 %v8302_v6 }
 0x17f   : > { %v5513_v56 = vpop.permute.xlu0 %994  ;;  %1006 = vrot.lane.b32.xlu1 %v8327_v30, %s4112_s24 }
 0x181   : > { %v5521_v12 = vpop.permute.xlu1 %3957  ;;  %2964 = vrot.lane.b32.xlu0 %v2925_v42, %s4109_s18  ;;  %v8333_v42 = vld [vmem:[#allocation38_spill] sm:$0xff] }
 0x182   : > { %8328 = vst [vmem:[#allocation53_spill] sm:$0xff] %v5521_v12  ;;  %v8339_v12 = vld [vmem:[#allocation8_spill] sm:$0xff] }
 0x183   : > { %v5529_v48 = vpop.permute.xlu0 %3962  ;;  %2966 = vrot.lane.b32.xlu1 %v2926_v40, %s4109_s18 }
 0x184   : > { %8330 = vst [vmem:[#allocation67_spill] sm:$0xff] %v5529_v48  ;;  %v1084_v48 = vrot.slane %v5392_v52, 3 }
 0x185   : > { %v5532_v34 = vpop.permute.xlu1 %990  ;;  %4002 = vrot.lane.b32.xlu0 %v4001_v7, %s4109_s18  ;;  %v8335_v7 = vrot.slane %v8319_v38, 7 }
 0x186   : > { %8331 = vst [vmem:[#allocation71_spill] sm:$0xff] %v5532_v34  ;;  %v8348_v34 = vld [vmem:[#allocation78_spill] sm:$0xff] }
 0x187   : > { %v5536_v60 = vpop.permute.xlu0 %644  ;;  %4007 = vrot.lane.b32.xlu1 %v8333_v42, %s4112_s24  ;;  %v5554_v42 = vshrl.u32 %v8269_v20, 16 }
 0x188   : > { %8332 = vst [vmem:[#allocation60_spill] sm:$0xff] %v5536_v60  ;;  %v8337_v60 = vld [vmem:[#allocation64_spill] sm:$0xff] }
 0x189   : > { %v5541_v30 = vpop.permute.xlu1 %646  ;;  %1285 = vrot.lane.b32.xlu0 %v1263_v41, %s4109_s18  ;;  %8336 = vst [vmem:[#allocation62_spill] sm:$0xff] %v5554_v42 }
 0x18a   : > { %8334 = vst [vmem:[#allocation74_spill] sm:$0xff] %v5541_v30  ;;  %v2109_v30 = vsel %vm584_vm0, %v8296_v61, %v8337_v60 }
 0x18b   : > { %v5544_v59 = vpop.permute.xlu0 %1111  ;;  %1287 = vrot.lane.b32.xlu1 %v1264_v23, %s4109_s18  ;;  %v8340_v23 = vrot.slane %v8339_v12, 7  ;;  %v2502_v61 = vsel %vm4735_vm4, %v5554_v42, %v2109_v30 }
 0x18d   : > { %v5547_v40 = vpop.permute.xlu1 %1113  ;;  %656 = vrot.lane.b32.xlu0 %v8335_v7, %s4112_s24  ;;  %v2174_v7 = vsel %vm8028_vm3, %v8298_v3, %v8341_v5 }
 0x18e   : > { %v2542_v18 = vsel %vm1442_vm1, %v2502_v61, %v2174_v7 }
 0x18f   : > { %v5559_v41 = vpop.permute.xlu0 %3967  ;;  %658 = vrot.lane.b32.xlu1 %v8340_v23, %s4112_s24  ;;  %v8344_v23 = vld [vmem:[#allocation66_spill] sm:$0xff] }
 0x190   : > { %8338 = vst [vmem:[#allocation75_spill] sm:$0xff] %v5559_v41  ;;  %v5576_v41 = vshrl.u32 %v8290_v39, 16  ;;  %v2110_v57 = vsel %vm584_vm0, %v8337_v60, %v8344_v23  ;;  %v8347_v39 = vld [vmem:[#allocation72_spill] sm:$0xff]  ;;  %v3870_v60 = vunpack.i.h.bf16 %v8302_v6 }
 0x191   : > { %v5568_v36 = vpop.permute.xlu1 %1109  ;;  %1123 = vrot.lane.b32.xlu0 %v1081_v22, %s4109_s18  ;;  %v1347_v22 = vrot.slane %v5370_v0, 1  ;;  %v2241_v14 = vsel %vm584_vm0, %v8307_v17, %v8347_v39  ;;  %v2587_v17 = vsel %vm4761_vm9, %v2542_v18, %v4394_v2 }
 0x192   : > { %8342 = vst [vmem:[#allocation81_spill] sm:$0xff] %v5568_v36  ;;  %8343 = vst [vmem:[#allocation82_spill] sm:$0xff] %v5576_v41  ;;  %v8346_v36 = vld [vmem:[#allocation69_spill] sm:$0xff]  ;;  %v2627_v7 = vsel %vm8034_vm5, %v2587_v17, %v2241_v14  ;;  %v2288_v18 = vsel %vm8028_vm3, %v8354_v44, %v3870_v60  ;;  %v8357_v44 = vunpack.i.h.bf16 %v8305_v45 }
 0x193   : > { %v5582_v3 = vpop.permute.xlu0 %1178  ;;  %1125 = vrot.lane.b32.xlu1 %v1084_v48, %s4109_s18  ;;  %v2175_v30 = vsel %vm8028_vm3, %v8341_v5, %v8346_v36  ;;  %v8350_v48 = vld [vmem:[#allocation40_spill] sm:$0xff]  ;;  %v2503_v5 = vsel %vm4735_vm4, %v5576_v41, %v2110_v57  ;;  %v2672_v2 = vsel %vm4780_vm10, %v2627_v7, %v2288_v18  ;;  %v8360_v18 = vunpack.i.h.bf16 %v8351_v49 }
 0x194   : > { %8345 = vst [vmem:[#allocation38_spill] sm:$0xff] %v5582_v3  ;;  %v4011_v0 = vpack.i.bf16 %v8350_v48, %v7999_v53  ;;  %v2546_v52 = vsel %vm1442_vm1, %v2503_v5, %v2175_v30  ;;  %v3884_v3 = vunpack.i.l.bf16 %v8351_v49  ;;  %v8353_v53 = vld [vmem:[#allocation73_spill] sm:$0xff]  ;;  %v8355_v30 = vunpack.i.l.bf16 %v8348_v34  ;;  %v8359_v5 = vld [vmem:[#allocation86_spill] sm:$0xff] }
 0x195   : > { %v5595_v61 = vpop.permute.xlu1 %1180  ;;  %1370 = vrot.lane.b32.xlu0 %v1346_v1, %s4112_s24  ;;  %v1166_v1 = vrot.slane %v4270_v27, 3  ;;  %v2242_v57 = vsel %vm584_vm0, %v8347_v39, %v8353_v53  ;;  %v2588_v6 = vsel %vm4761_vm9, %v2546_v52, %v4397_v4  ;;  %v2419_v7 = vsel %vm8028_vm3, %v8317_v25, %v8359_v5 }
 0x196   : > { %8349 = vst [vmem:[#allocation64_spill] sm:$0xff] %v5595_v61  ;;  %v2289_v14 = vsel %vm8028_vm3, %v3870_v60, %v8355_v30  ;;  %v2631_v39 = vsel %vm8034_vm5, %v2588_v6, %v2242_v57  ;;  %v2355_v60 = vsel %vm584_vm0, %v8357_v44, %v3884_v3  ;;  %v2356_v52 = vsel %vm584_vm0, %v3884_v3, %v8360_v18 }
 0x197   : > { %v5610_v61 = vpop.permute.xlu0 %744  ;;  %1372 = vrot.lane.b32.xlu1 %v1347_v22, %s4112_s24  ;;  %v1167_v22 = vrot.slane %v8249_v28, 3  ;;  %v8361_v57 = vrot.slane %v8249_v28, 6  ;;  %v8365_v18 = vrot.slane %v8269_v20, 6  ;;  %v8004_v6 = vunpack.i.l.bf16 %v5345_v29 }
 0x198   : > { %8352 = vst [vmem:[#allocation68_spill] sm:$0xff] %v5610_v61  ;;  %v8380_v61 = vunpack.i.h.bf16 %v5398_v31 }
 0x199   : > { %v5624_v17 = vpop.permute.xlu1 %746  ;;  %4012 = vrot.lane.b32.xlu0 %v4011_v0, %s4109_s18  ;;  %v2673_v0 = vsel %vm4780_vm10, %v2631_v39, %v2289_v14  ;;  %v2712_v45 = vsel %vm8040_vm7, %v2672_v2, %v8361_v57  ;;  %v8363_v14 = vld [vmem:[#allocation87_spill] sm:$0xff]  ;;  %v3925_v57 = vunpack.i.h.bf16 %v5337_v35  ;;  %v8010_v35 = vrot.slane %v8350_v48, 5 }
 0x19a   : > { %8356 = vst [vmem:[#allocation66_spill] sm:$0xff] %v5624_v17  ;;  %v2420_v25 = vsel %vm8028_vm3, %v8359_v5, %v8363_v14  ;;  %v8364_v39 = vld [vmem:[#allocation31_spill] sm:$0xff]  ;;  %v2716_v2 = vsel %vm8040_vm7, %v2673_v0, %v8365_v18  ;;  %v8378_v17 = vld [vmem:[#allocation16_spill] sm:$0xff] }
 0x19b   : > { %v5637_v30 = vpop.permute.xlu0 %996  ;;  %1190 = vrot.lane.b32.xlu1 %v1166_v1, %s4112_s24  ;;  %v2757_v1 = vsel %vm4807_vm15, %v2712_v45, %v2355_v60  ;;  %v8003_v4 = vrot.slane %v8364_v39, 6  ;;  %v8366_v60 = vrot.slane %v8339_v12, 6  ;;  %v2758_v5 = vsel %vm4807_vm15, %v2716_v2, %v2356_v52  ;;  %v8367_v45 = vld [vmem:[#allocation97_spill] sm:$0xff] }
 0x19c   : > { %8358 = vst [vmem:[#allocation69_spill] sm:$0xff] %v5637_v30  ;;  %v2797_v3 = vsel %vm1694_vm11, %v2757_v1, %v2419_v7  ;;  %v2486_v7 = vsel %vm584_vm0, %v8324_v19, %v8367_v45  ;;  %v2801_v1 = vsel %vm1694_vm11, %v2758_v5, %v2420_v25  ;;  %v2487_v18 = vsel %vm584_vm0, %v8367_v45, %v5049_v47  ;;  %v8382_v30 = vld [vmem:[#allocation36_spill] sm:$0xff] }
 0x19d   : > { %v5652_v44 = vpop.permute.xlu1 %998  ;;  %1192 = vrot.lane.b32.xlu0 %v1167_v22, %s4112_s24  ;;  %v586_v19 = vsel %vm584_vm0, %v3925_v57, %v8004_v6  ;;  %v8370_v45 = vrot.slane %v8280_v10, 5 }
 0x19e   : > { %8362 = vst [vmem:[#allocation72_spill] sm:$0xff] %v5652_v44  ;;  %v1265_v44 = vrot.slane %v8249_v28, 2 }
 0x19f   : > { %v5667_v22 = vpop.permute.xlu0 %1176  ;;  %756 = vrot.lane.b32.xlu1 %v8366_v60, %s4109_s18  ;;  %v8368_v60 = vrot.slane %v8257_v32, 5 }
 0x1a1   : > { %v2957_v0 = vpop.permute.xlu1 %2956  ;;  %758 = vrot.lane.b32.xlu0 %v8003_v4, %s4109_s18  ;;  %v2842_v52 = vsel %vm4828_vm2, %v2797_v3, %v8368_v60  ;;  %v2843_v3 = vsel %vm4828_vm2, %v2801_v1, %v8370_v45  ;;  %v8372_v4 = vld [vmem:[#allocation47_spill] sm:$0xff] }
 0x1a2   : > { %v2882_v2 = vsel %vm8036_vm13, %v2842_v52, %v2486_v7  ;;  %v2886_v6 = vsel %vm8036_vm13, %v2843_v3, %v2487_v18  ;;  %v670_v7 = vsel %vm668_vm14, %v5348_v63, %v5352_v55  ;;  %v1446_v52 = vsel %vm4735_vm4, %v4229_v15, %v586_v19 }
 0x1a3   : > { %1008 = vrot.lane.b32.xlu1 %v8319_v38, %s4112_s24  ;;  %v5693_v25 = vpop.permute.xlu0 %2958  ;;  %v2927_v1 = vsel %vm5139_vm12, %v2882_v2, 0  ;;  %v2928_v27 = vsel %vm5139_vm12, %v2886_v6, 0  ;;  %v5727_v19 = vshrl.u32 %v8319_v38, 16  ;;  %v3930_v2 = vunpack.i.h.bf16 %v5345_v29  ;;  %v8386_v29 = vld [vmem:[#allocation48_spill] sm:$0xff] }
 0x1a4   : > { %8369 = vst [vmem:[#allocation78_spill] sm:$0xff] %v5693_v25  ;;  %v2989_v5 = vsel %vm584_vm0, %v2957_v0, %v5693_v25  ;;  %v1468_v45 = vsel %vm1442_vm1, %v1446_v52, %v670_v7  ;;  %v5741_v6 = vshrl.u32 %v8378_v17, 16  ;;  %v5759_v25 = vld.sshfl [vmem:[%s4591_s23] sm:$0x33 pattern:$0x76325410] }
 0x1a5   : > { %v5702_v60 = vpop.permute.xlu1 %3972  ;;  %1010 = vrot.lane.b32.xlu0 %v8372_v4, %s4112_s24  ;;  %3055 = vmatprep.subr.bf16.mxu0 %v2989_v5  ;;  %v3939_v4 = vunpack.i.l.bf16 %v5398_v31  ;;  %v8374_v5 = vld [vmem:[#allocation41_spill] sm:$0xff]  ;;  %8375 = vst [vmem:[#allocation86_spill] sm:$0xff] %v5727_v19  ;;  %v8385_v52 = vrot.slane %v4254_v24, 7  ;;  %v669_v24 = vsel %vm668_vm14, %v5357_v62, %v5348_v63 }
 0x1a6   : > { %8371 = vst [vmem:[#allocation83_spill] sm:$0xff] %v5702_v60  ;;  %v4016_v3 = vpack.i.bf16 %v8010_v35, %v8374_v5  ;;  %v5738_v35 = vshrl.u32 %v8364_v39, 16  ;;  %8379 = vst [vmem:[#allocation16_spill] sm:$0xff] %v5741_v6 }
 0x1a7   : > { %2968 = vrot.lane.b32.xlu1 %v2927_v1, %s4109_s18  ;;  %v5719_v18 = vpop.permute.xlu0 %3977  ;;  %v5735_v1 = vshrl.u32 %v8339_v12, 16  ;;  %v839_v7 = vsel %vm668_vm14, %v3939_v4, %v8380_v61  ;;  %v5756_v12 = vshrl.u32 %v8382_v30, 16  ;;  %v1530_v31 = vsel %vm4761_vm9, %v1468_v45, %v8385_v52  ;;  %v8388_v45 = vld [vmem:[#allocation77_spill] sm:$0xff] }
 0x1a8   : > { %8373 = vst [vmem:[#allocation73_spill] sm:$0xff] %v5719_v18  ;;  %8377 = vst [vmem:[#allocation97_spill] sm:$0xff] %v5738_v35  ;;  %v769_v18 = vsel %vm584_vm0, %v5360_v21, %v5363_v9  ;;  %v5762_v9 = vshrl.u32 %v5759_v25, 16  ;;  %v8390_v52 = vunpack.i.h.bf16 %v5453_v33 }
 0x1a9   : > { %v5731_v60 = vpop.permute.xlu1 %1277  ;;  %2970 = vrot.lane.b32.xlu0 %v2928_v27, %s4109_s18  ;;  %8376 = vst [vmem:[#allocation87_spill] sm:$0xff] %v5735_v1  ;;  %v3949_v27 = vunpack.i.l.bf16 %v5453_v33  ;;  %8383 = vst [vmem:[#allocation128_spill] sm:$0xff] %v5756_v12  ;;  %v1552_v55 = vsel %vm8034_vm5, %v1530_v31, %v769_v18  ;;  %v1266_v12 = vrot.slane %v8269_v20, 2  ;;  %v8389_v18 = vld [vmem:[#allocation79_spill] sm:$0xff] }
 0x1aa   : > { %8384 = vst [vmem:[#allocation129_spill] sm:$0xff] %v5762_v9  ;;  %v8387_v9 = vld [vmem:[#allocation76_spill] sm:$0xff] }
 0x1ab   : > { %4017 = vrot.lane.b32.xlu1 %v4016_v3, %s4109_s18  ;;  %v5752_v48 = vpop.permute.xlu0 %1279  ;;  %v585_v3 = vsel %vm584_vm0, %v3930_v2, %v3925_v57  ;;  %v2111_v61 = vsel %vm584_vm0, %v8344_v23, %v8387_v9  ;;  %v1614_v57 = vsel %vm4780_vm10, %v1552_v55, %v839_v7  ;;  %v2176_v2 = vsel %vm8028_vm3, %v8346_v36, %v8389_v18  ;;  %v8392_v55 = vld [vmem:[#allocation45_spill] sm:$0xff] }
 0x1ac   : > { %8381 = vst [vmem:[#allocation127_spill] sm:$0xff] %v5752_v48  ;;  %v3944_v23 = vunpack.i.l.bf16 %v5440_v46  ;;  %v941_v62 = vsel %vm584_vm0, %v3949_v27, %v8390_v52  ;;  %v1025_v36 = vsel %vm668_vm14, %v5504_v26, %v5513_v56  ;;  %v2504_v7 = vsel %vm4735_vm4, %v5727_v19, %v2111_v61 }
 0x1ad   : > { %v2955_v28 = vpop.permute.xlu1 %2954  ;;  %4022 = vrot.lane.b32.xlu0 %v8386_v29, %s4112_s24  ;;  %v5787_v29 = vsel %vm584_vm0, %v8387_v9, %v8388_v45  ;;  %v8393_v52 = vrot.slane %v4235_v16, 5  ;;  %v768_v61 = vsel %vm584_vm0, %v5384_v11, %v5360_v21  ;;  %v8397_v11 = vunpack.i.l.bf16 %v8348_v34 }
 0x1ae   : > { %v2988_v31 = vsel %vm584_vm0, %v2955_v28, %v2957_v0  ;;  %v1445_v0 = vsel %vm4735_vm4, %v4216_v13, %v585_v3  ;;  %v2505_v3 = vsel %vm4735_vm4, %v5735_v1, %v5787_v29  ;;  %v2550_v28 = vsel %vm1442_vm1, %v2504_v7, %v2176_v2 }
 0x1af   : > { %1289 = vrot.lane.b32.xlu1 %v1265_v44, %s4109_s18  ;;  %3056 = vmatpush1.bf16.msra.mxu0 %v2988_v31  ;;  %v5797_v63 = vpop.permute.xlu0 %648  ;;  %v1464_v31 = vsel %vm1442_vm1, %v1445_v0, %v669_v24  ;;  %v1636_v9 = vsel %vm8040_vm7, %v1614_v57, %v8393_v52  ;;  %v838_v57 = vsel %vm668_vm14, %v3944_v23, %v3939_v4  ;;  %v3954_v0 = vunpack.i.l.bf16 %v5492_v8  ;;  %v8398_v4 = vld [vmem:[#allocation80_spill] sm:$0xff]  ;;  %v8402_v44 = vld [vmem:[#allocation38_spill] sm:$0xff]  ;;  %v8406_v8 = vld [vmem:[#allocation39_spill] sm:$0xff] }
 0x1b0   : > { %8391 = vst [vmem:[#allocation48_spill] sm:$0xff] %v5797_v63  ;;  %v1698_v24 = vsel %vm4807_vm15, %v1636_v9, %v941_v62  ;;  %v8395_v52 = vrot.slane %v8364_v39, 7  ;;  %v1087_v2 = vrot.slane %v5554_v42, 3  ;;  %v8396_v7 = vunpack.i.h.bf16 %v8348_v34  ;;  %v8399_v62 = vld [vmem:[#allocation12_spill] sm:$0xff] }
 0x1b1   : > { %v5815_v6 = vpop.permute.xlu1 %650  ;;  %1291 = vrot.lane.b32.xlu0 %v1266_v12, %s4109_s18  ;;  %v1720_v12 = vsel %vm1694_vm11, %v1698_v24, %v1025_v36  ;;  %v2177_v23 = vsel %vm8028_vm3, %v8389_v18, %v8398_v4  ;;  %v8400_v9 = vrot.slane %v8399_v62, 7  ;;  %v1144_v24 = vsel %vm584_vm0, %v5544_v59, %v5547_v40 }
 0x1b2   : > { %8394 = vst [vmem:[#allocation76_spill] sm:$0xff] %v5815_v6  ;;  %v5842_v21 = vsel %vm8028_vm3, %v8397_v11, %v8396_v7  ;;  %v8401_v11 = vld [vmem:[#allocation64_spill] sm:$0xff]  ;;  %v8404_v62 = vrot.slane %v8378_v17, 7  ;;  %vm1947_vm3 = vsmask.f32 6400 }
 0x1b3   : > { %660 = vrot.lane.b32.xlu1 %v8395_v52, %s4112_s24  ;;  %v5834_v29 = vpop.permute.xlu0 %1115  ;;  %v1529_v36 = vsel %vm4761_vm9, %v1464_v31, %v8400_v9  ;;  %v2589_v52 = vsel %vm4761_vm9, %v2550_v28, %v8257_v32  ;;  %v1211_v6 = vsel %vm668_vm14, %v8402_v44, %v8401_v11  ;;  %v1090_v31 = vrot.slane %v5576_v41, 3  ;;  %v8405_v32 = vld [vmem:[#allocation91_spill] sm:$0xff] }
 0x1b4   : > { %v1548_v7 = vsel %vm8034_vm5, %v1529_v36, %v768_v61  ;;  %v1782_v28 = vsel %vm4828_vm2, %v1720_v12, %v4229_v15  ;;  %v940_v61 = vsel %vm584_vm0, %v3954_v0, %v3949_v27  ;;  %v1243_v63 = vrot.slane %v8405_v32, 2  ;;  %v8407_v11 = vld [vmem:[#allocation71_spill] sm:$0xff]  ;;  %v8408_v12 = vld [vmem:[#allocation84_spill] sm:$0xff]  ;;  %v8409_v0 = vld [vmem:[#allocation10_spill] sm:$0xff] }
 0x1b5   : > { %v5861_v18 = vpop.permute.xlu1 %1117  ;;  %662 = vrot.lane.b32.xlu0 %v8404_v62, %s4112_s24  ;;  %v1613_v9 = vsel %vm4780_vm10, %v1548_v7, %v838_v57  ;;  %v1804_v36 = vsel %vm8036_vm13, %v1782_v28, %v1144_v24  ;;  %v1348_v41 = vrot.slane %v8406_v8, 1  ;;  %v1024_v57 = vsel %vm668_vm14, %v8407_v11, %v5504_v26  ;;  %vm5889_vm13 = vmand %vm8041_vm8, %vm1947_vm3  ;;  %v8413_v11 = vld [vmem:[#allocation93_spill] sm:$0xff] }
 0x1b6   : > { %8403 = vst [vmem:[#allocation77_spill] sm:$0xff] %v5861_v18  ;;  %v1866_v15 = vsel %vm5139_vm12, %v1804_v36, %v1211_v6  ;;  %vm2030_vm5 = vcmask 1047552   ;;  %v2243_v27 = vsel %vm584_vm0, %v8353_v53, %v8408_v12  ;;  %v8410_v32 = vrot.slane %v8409_v0, 5  ;;  %v8416_v53 = vld [vmem:[#allocation49_spill] sm:$0xff] }
 0x1b7   : > { %1127 = vrot.lane.b32.xlu1 %v1087_v2, %s4109_s18  ;;  %v1276_v62 = vpop.permute.xlu0 %1275  ;;  %v1310_v26 = vsel %vm584_vm0, %v5731_v60, %v5752_v48  ;;  %v1349_v7 = vrot.slane %v5554_v42, 1  ;;  %v1411_v36 = vrot.slane %v4235_v16, 1  ;;  %vm8414_vm3 = vcmask 1045504  }
 0x1b8   : > { %v1632_v2 = vsel %vm8040_vm7, %v1613_v9, %v8410_v32  ;;  %v1040_v9 = vrot.slane %v4216_v13, 4  ;;  %v2554_v32 = vsel %vm1442_vm1, %v2505_v3, %v2177_v23  ;;  %v1888_v48 = vsel %vm8414_vm3, %v1866_v15, %v1243_v63  ;;  %vm5914_vm7 = vmand %vm2030_vm5, %vm2031_vm6  ;;  %v8420_v23 = vld [vmem:[#allocation81_spill] sm:$0xff] }
 0x1b9   : > { %v1363_v6 = vpop.permute.xlu1 %1362  ;;  %1129 = vrot.lane.b32.xlu0 %v1090_v31, %s4109_s18  ;;  %v1697_v28 = vsel %vm4807_vm15, %v1632_v2, %v940_v61  ;;  %v8415_v42 = vrot.slane %v8374_v5, 5  ;;  %vm8419_vm8 = vcmask 1041408   ;;  %v1143_v63 = vsel %vm584_vm0, %v8420_v23, %v5544_v59 }
 0x1ba   : > { %v1716_v8 = vsel %vm1694_vm11, %v1697_v28, %v1024_v57  ;;  %v2635_v3 = vsel %vm8419_vm8, %v2589_v52, %v2243_v27  ;;  %v8421_v57 = vld [vmem:[#allocation98_spill] sm:$0xff]  ;;  %v1210_v15 = vsel %vm668_vm14, %v5667_v22, %v8402_v44  ;;  %vm8423_vm5 = vcmask 1046528   ;;  %v8424_v27 = vld [vmem:[#allocation85_spill] sm:$0xff] }
 0x1bb   : > { %1374 = vrot.lane.b32.xlu1 %v1348_v41, %s4112_s24  ;;  %v5907_v31 = vpop.permute.xlu0 %1364  ;;  %v4026_v18 = vpack.i.bf16 %v8416_v53, %v8415_v42  ;;  %v1950_v41 = vsel %vm5889_vm13, %v1888_v48, %v1310_v26  ;;  %v3894_v42 = vunpack.i.l.bf16 %v8421_v57  ;;  %v1168_v59 = vrot.slane %v8269_v20, 3 }
 0x1bc   : > { %v1395_v61 = vsel %vm668_vm14, %v1363_v6, %v5907_v31  ;;  %v2244_v48 = vsel %vm584_vm0, %v8408_v12, %v8424_v27  ;;  %v8425_v26 = vunpack.i.l.bf16 %v8413_v11  ;;  %v8426_v28 = vunpack.i.h.bf16 %v8348_v34  ;;  %v8430_v34 = vld [vmem:[#allocation25_spill] sm:$0xff] }
 0x1bd   : > { %v5930_v2 = vpop.permute.xlu1 %3982  ;;  %1376 = vrot.lane.b32.xlu0 %v1349_v7, %s4112_s24  ;;  %v1972_v52 = vsel %vm8423_vm5, %v1950_v41, %v1395_v61  ;;  %vm8427_vm6 = vcmask 7168   ;;  %v1781_v22 = vsel %vm4828_vm2, %v1716_v8, %v1040_v9  ;;  %v8044_v7 = vunpack.i.h.bf16 %v8421_v57  ;;  %v8429_v61 = vld [vmem:[#allocation88_spill] sm:$0xff] }
 0x1be   : > { %8422 = vst [vmem:[#allocation79_spill] sm:$0xff] %v5930_v2  ;;  %v2291_v23 = vsel %vm8427_vm6, %v8426_v28, %v8425_v26  ;;  %v2034_v44 = vsel %vm5914_vm7, %v1972_v52, %v1411_v36  ;;  %vm8428_vm8 = vcmask 1044480   ;;  %v1242_v20 = vrot.slane %v8429_v61, 2  ;;  %vm8435_vm5 = vmmov %vm8427_vm6 }
 0x1bf   : > { %v1800_v41 = vsel %vm8428_vm8, %v1781_v22, %v1143_v63  ;;  %4027 = vrot.lane.b32.xlu1 %v4026_v18, %s4109_s18  ;;  %3057 = vmatprep.subr.bf16.mxu0 %v2034_v44  ;;  %v5951_v12 = vpop.permute.xlu0 %1182  ;;  %v1169_v2 = vrot.slane %v8430_v34, 3  ;;  %v2674_v8 = vsel %vm4780_vm10, %v2635_v3, %v5842_v21  ;;  %v2590_v9 = vsel %vm4761_vm9, %v2554_v32, %v8280_v10  ;;  %v8433_v32 = vld [vmem:[#allocation89_spill] sm:$0xff]  ;;  %vm8437_vm6 = vmmov %vm8435_vm5 }
 0x1c0   : > { %v1865_v63 = vsel %vm5139_vm12, %v1800_v41, %v1210_v15  ;;  %vm8431_vm3 = vcmask 1041408   ;;  %v8432_v52 = vunpack.i.h.bf16 %v8351_v49  ;;  %v1309_v21 = vsel %vm584_vm0, %v1276_v62, %v5731_v60  ;;  %v8436_v41 = vld [vmem:[#allocation94_spill] sm:$0xff] }
 0x1c1   : > { %v2639_v18 = vsel %vm8431_vm3, %v2590_v9, %v2244_v48  ;;  %v5970_v3 = vpop.permute.xlu1 %1184  ;;  %1194 = vrot.lane.b32.xlu0 %v1168_v59, %s4112_s24  ;;  %v2113_v22 = vsel %vm584_vm0, %v8388_v45, %v8433_v32  ;;  %v8434_v48 = vld [vmem:[#allocation101_spill] sm:$0xff]  ;;  %v1410_v44 = vrot.slane %v8409_v0, 1  ;;  %v2178_v60 = vsel %vm8437_vm6, %v8398_v4, %v8436_v41  ;;  %v8441_v9 = vld [vmem:[#allocation102_spill] sm:$0xff] }
 0x1c2   : > { %v2357_v26 = vsel %vm584_vm0, %v8432_v52, %v3894_v42  ;;  %v2675_v15 = vsel %vm4780_vm10, %v2639_v18, %v2291_v23  ;;  %v2421_v49 = vsel %vm8435_vm5, %v8363_v14, %v8434_v48  ;;  %v2358_v62 = vsel %vm584_vm0, %v3894_v42, %v8044_v7  ;;  %v8462_v7 = vld [vmem:[#allocation35_spill] sm:$0xff] }
 0x1c3   : > { %v8438_v59 = vrot.slane %v8430_v34, 6  ;;  %vm8439_vm8 = vcmask 1042432   ;;  %vm8440_vm3 = vcmask 1045504   ;;  %1196 = vrot.lane.b32.xlu1 %v1169_v2, %s4112_s24  ;;  %v1361_v61 = vpop.permute.xlu0 %1360  ;;  %v2422_v4 = vsel %vm8435_vm5, %v8434_v48, %v8441_v9  ;;  %v8447_v48 = vld [vmem:[#allocation108_spill] sm:$0xff] }
 0x1c4   : > { %v1884_v23 = vsel %vm8440_vm3, %v1865_v63, %v1242_v20  ;;  %v1394_v42 = vsel %vm668_vm14, %v1361_v61, %v1363_v6  ;;  %v8442_v2 = vrot.slane %v8319_v38, 6  ;;  %vm8443_vm6 = vmmov %vm8439_vm8  ;;  %vm8066_vm3 = vcmask 261120  }
 0x1c5   : > { %v2720_v45 = vsel %vm8439_vm8, %v2674_v8, %v8438_v59  ;;  %v1949_v18 = vsel %vm5889_vm13, %v1884_v23, %v1309_v21  ;;  %v2506_v8 = vsel %vm4735_vm4, %v5738_v35, %v2113_v22  ;;  %v6008_v52 = vpop.permute.xlu1 %748  ;;  %vm8446_vm8 = vcmask 1046528   ;;  %v8449_v23 = vld [vmem:[#allocation92_spill] sm:$0xff] }
 0x1c6   : > { %v2759_v14 = vsel %vm4807_vm15, %v2720_v45, %v2357_v26  ;;  %v2724_v63 = vsel %vm8443_vm6, %v2675_v15, %v8442_v2  ;;  %8444 = vst [vmem:[#allocation45_spill] sm:$0xff] %v6008_v52  ;;  %v8445_v26 = vrot.slane %v8378_v17, 6  ;;  %v1968_v21 = vsel %vm8446_vm8, %v1949_v18, %v1394_v42  ;;  %v6025_v45 = vld [vmem:[%s7747_s3] sm:$0xff]  }
 0x1c7   : > { %v2805_v20 = vsel %vm1694_vm11, %v2759_v14, %v2421_v49  ;;  %v2760_v6 = vsel %vm4807_vm15, %v2724_v63, %v2358_v62  ;;  %v2488_v22 = vsel %vm584_vm0, %v5049_v47, %v8447_v48  ;;  %v8448_v49 = vld [vmem:[#allocation50_spill] sm:$0xff]  ;;  %v2033_v15 = vsel %vm5914_vm7, %v1968_v21, %v1410_v44  ;;  %v6035_v18 = vpop.permute.xlu0 %750  ;;  %v8452_v42 = vld [vmem:[#allocation96_spill] sm:$0xff] }
 0x1c8   : > { %760 = vrot.lane.b32.xlu0 %v8445_v26, %s4109_s18  ;;  %v3934_v59 = vunpack.i.l.bf16 %v8448_v49  ;;  %v2114_v61 = vsel %vm584_vm0, %v8433_v32, %v8449_v23  ;;  %v2558_v62 = vsel %vm1442_vm1, %v2506_v8, %v2178_v60  ;;  %v2809_v14 = vsel %vm1694_vm11, %v2760_v6, %v2422_v4  ;;  %3058 = vmatpush1.bf16.msra.mxu0 %v2033_v15  ;;  %v8453_v63 = vld [vmem:[#allocation28_spill] sm:$0xff]  ;;  %v8454_v60 = vld [vmem:[#allocation34_spill] sm:$0xff]  ;;  %v8456_v26 = vld [vmem:[#allocation99_spill] sm:$0xff] }
 0x1c9   : > { %v8450_v47 = vrot.slane %v8382_v30, 6  ;;  %8451 = vst [vmem:[#allocation80_spill] sm:$0xff] %v6035_v18  ;;  %v2179_v2 = vsel %vm8435_vm5, %v8436_v41, %v8452_v42  ;;  %v2489_v32 = vsel %vm584_vm0, %v8447_v48, %v8453_v63  ;;  %v8455_v4 = vrot.slane %v8454_v60, 5  ;;  %v6052_v15 = vpop.permute.xlu1 %1000  ;;  %v8469_v18 = vld [vmem:[#allocation51_spill] sm:$0xff] }
 0x1ca   : > { %v2245_v21 = vsel %vm584_vm0, %v8424_v27, %v8456_v26  ;;  %8457 = vst [vmem:[#allocation12_spill] sm:$0xff] %v6052_v15  ;;  %vm8458_vm6 = vcmask 1044480   ;;  %v8460_v27 = vld [vmem:[#allocation124_spill] sm:$0xff]  ;;  %v8463_v6 = vrot.slane %v8462_v7, 5  ;;  %v8477_v52 = vunpack.i.h.bf16 %v8448_v49  ;;  %v8482_v15 = vld [vmem:[#allocation67_spill] sm:$0xff] }
 0x1cb   : > { %762 = vrot.lane.b32.xlu1 %v8450_v47, %s4109_s18  ;;  %v2844_v8 = vsel %vm4828_vm2, %v2805_v20, %v8455_v4  ;;  %v8459_v47 = vld [vmem:[#allocation16_spill] sm:$0xff]  ;;  %v2591_v20 = vsel %vm4761_vm9, %v2558_v62, %v8454_v60  ;;  %v8461_v4 = vunpack.i.l.bf16 %v8460_v27  ;;  %3788 = vmatmul.mubr.msk.bf16.vlgmr.msra.gmra.mxu0 %vm8066_vm3, %v6025_v45  ;;  %v6079_v27 = vpop.permute.xlu0 %1002  ;;  %vm8468_vm8 = vmmov %vm8458_vm6  ;;  %v8470_v60 = vmov 0  }
 0x1cc   : > { %1012 = vrot.lane.b32.xlu0 %v8364_v39, %s4112_s24  ;;  %v2890_v41 = vsel %vm8458_vm6, %v2844_v8, %v2488_v22  ;;  %v2507_v36 = vsel %vm4735_vm4, %v8459_v47, %v2114_v61  ;;  %v2845_v44 = vsel %vm4828_vm2, %v2809_v14, %v8463_v6  ;;  %v8464_v8 = vld [vmem:[#allocation44_spill] sm:$0xff]  ;;  %v8465_v61 = vld [vmem:[#allocation125_spill] sm:$0xff]  ;;  %8467 = vst [vmem:[#allocation38_spill] sm:$0xff] %v6079_v27  ;;  %v8471_v14 = vunpack.i.h.bf16 %v8413_v11 }
 0x1cd   : > { %v587_v28 = vsel %vm584_vm0, %v8461_v4, %v3934_v59  ;;  %v2562_v22 = vsel %vm1442_vm1, %v2507_v36, %v2179_v2  ;;  %v671_v48 = vsel %vm668_vm14, %v8465_v61, %v8464_v8  ;;  %v8466_v62 = vld [vmem:[#allocation56_spill] sm:$0xff]  ;;  %v2894_v4 = vsel %vm8468_vm8, %v2845_v44, %v2489_v32  ;;  %3161 = vmatprep.mubr.bf16.mxu0 %v8470_v60  ;;  %v8487_v47 = vld [vmem:[#allocation13_spill] sm:$0xff] }
 0x1ce   : > { %v8472_v6 = vunpack.i.l.bf16 %v8413_v11  ;;  %vm8473_vm6 = vcmask 1041408   ;;  %v2929_v61 = vsel %vm5139_vm12, %v2890_v41, 0  ;;  %v8476_v44 = vld [vmem:[#allocation100_spill] sm:$0xff]  ;;  %v588_v27 = vsel %vm584_vm0, %v3934_v59, %v8477_v52  ;;  %v8480_v59 = vld [vmem:[#allocation55_spill] sm:$0xff] }
 0x1cf   : > { %1014 = vrot.lane.b32.xlu1 %v8466_v62, %s4112_s24  ;;  %v2643_v2 = vsel %vm8473_vm6, %v2591_v20, %v2245_v21  ;;  %v8474_v62 = vshll.u32 %v8392_v55, 16  ;;  %v2246_v32 = vsel %vm584_vm0, %v8456_v26, %v8476_v44  ;;  %v2961_v21 = vpop.permute.xlu1 %2960  ;;  %v8478_v41 = vrot.slane %v8416_v53, 5  ;;  %vm8486_vm8 = vmmov %vm8473_vm6  ;;  %v8506_v49 = vld [vmem:[#allocation8_spill] sm:$0xff] }
 0x1d0   : > { %v2292_v36 = vsel %vm8435_vm5, %v8472_v6, %v8471_v14  ;;  %v1447_v14 = vsel %vm4735_vm4, %v8409_v0, %v587_v28  ;;  %2972 = vrot.lane.b32.xlu0 %v2929_v61, %s4109_s18  ;;  %v8479_v6 = vld [vmem:[#allocation52_spill] sm:$0xff]  ;;  %v2930_v0 = vsel %vm5139_vm12, %v2894_v4, 0  ;;  %v8481_v61 = vld [vmem:[#allocation33_spill] sm:$0xff]  ;;  %vm8492_vm5 = vmmov %vm8473_vm6  ;;  %vm8500_vm6 = vcmask 7168  }
 0x1d1   : > { %v6094_v10 = vrot.slane %v8474_v62, 5  ;;  %v4031_v20 = vpack.i.bf16 %v8478_v41, %v8469_v18  ;;  %v2592_v62 = vsel %vm4761_vm9, %v2562_v22, %v8462_v7  ;;  %v1472_v26 = vsel %vm1442_vm1, %v1447_v14, %v671_v48  ;;  %v6125_v22 = vpop.permute.xlu0 %2962 }
 0x1d2   : > { %v672_v52 = vsel %vm668_vm14, %v8464_v8, %v8479_v6  ;;  %v2676_v28 = vsel %vm4780_vm10, %v2643_v2, %v2292_v36  ;;  %v770_v41 = vsel %vm584_vm0, %v8481_v61, %v8480_v59  ;;  %8483 = vst [vmem:[#allocation71_spill] sm:$0xff] %v6125_v22  ;;  %v8484_v48 = vrot.slane %v8416_v53, 6  ;;  %v8503_v6 = vld [vmem:[#allocation14_spill] sm:$0xff] }
 0x1d3   : > { %8475 = vst [vmem:[#allocation91_spill] sm:$0xff] %v6094_v10  ;;  %2974 = vrot.lane.b32.xlu1 %v2930_v0, %s4109_s18  ;;  %v8485_v8 = vrot.slane %v8469_v18, 6  ;;  %v6132_v4 = vsel %vm8486_vm8, %v2592_v62, %v2246_v32  ;;  %v1448_v36 = vsel %vm4735_vm4, %v4235_v16, %v588_v27  ;;  %v3945_v2 = vunpack.i.h.bf16 %v5440_v46  ;;  %v8490_v32 = vld [vmem:[#allocation78_spill] sm:$0xff]  ;;  %v8491_v62 = vld [vmem:[#allocation105_spill] sm:$0xff] }
 0x1d4   : > { %v2991_v61 = vsel %vm584_vm0, %v2961_v21, %v6125_v22  ;;  %v1476_v0 = vsel %vm1442_vm1, %v1448_v36, %v672_v52  ;;  %v8488_v7 = vrot.slane %v8487_v47, 7  ;;  %4032 = vrot.lane.b32.xlu0 %v4031_v20, %s4109_s18  ;;  %v2990_v27 = vsel %vm584_vm0, %v8490_v32, %v2961_v21  ;;  %v8493_v52 = vld [vmem:[#allocation59_spill] sm:$0xff]  ;;  %v8494_v36 = vld [vmem:[#allocation53_spill] sm:$0xff] }
 0x1d5   : > { %v4036_v14 = vpack.i.bf16 %v8485_v8, %v8484_v48  ;;  %v6145_v48 = vpop.permute.xlu1 %3987  ;;  %3098 = vmatprep.subr.bf16.mxu1 %v2991_v61  ;;  %v1267_v46 = vrot.slane %v8430_v34, 2  ;;  %v3899_v8 = vunpack.i.l.bf16 %v8491_v62  ;;  %v771_v47 = vsel %vm584_vm0, %v8480_v59, %v8493_v52  ;;  %v8497_v32 = vld [vmem:[#allocation75_spill] sm:$0xff]  ;;  %v8501_v52 = vld [vmem:[#allocation54_spill] sm:$0xff] }
 0x1d6   : > { %v1531_v35 = vsel %vm4761_vm9, %v1472_v26, %v8488_v7  ;;  %8489 = vst [vmem:[#allocation84_spill] sm:$0xff] %v6145_v48  ;;  %v3960_v7 = vunpack.i.h.bf16 %v8494_v36  ;;  %3099 = vmatpush1.bf16.msra.mxu1 %v2990_v27  ;;  %v8495_v26 = vld [vmem:[#allocation103_spill] sm:$0xff]  ;;  %v8496_v61 = vunpack.i.l.bf16 %v8482_v15  ;;  %v8499_v48 = vld [vmem:[#allocation106_spill] sm:$0xff]  ;;  %v8507_v36 = vrot.slane %v8506_v49, 6 }
 0x1d7   : > { %v1556_v22 = vsel %vm8492_vm5, %v1531_v35, %v770_v41  ;;  %v2115_v20 = vsel %vm584_vm0, %v8449_v23, %v8495_v26  ;;  %4037 = vrot.lane.b32.xlu1 %v4036_v14, %s4112_s24  ;;  %v6165_v35 = vpop.permute.xlu0 %3992  ;;  %v1268_v41 = vrot.slane %v8319_v38, 2  ;;  %v2180_v27 = vsel %vm8500_vm6, %v8452_v42, %v8499_v48  ;;  %v8505_v14 = vld [vmem:[#allocation104_spill] sm:$0xff] }
 0x1d8   : > { %v841_v21 = vsel %vm668_vm14, %v3945_v2, %v8496_v61  ;;  %8498 = vst [vmem:[#allocation10_spill] sm:$0xff] %v6165_v35  ;;  %v8502_v23 = vunpack.i.h.bf16 %v8501_v52  ;;  %v8504_v61 = vrot.slane %v8503_v6, 7  ;;  %v2116_v35 = vsel %vm584_vm0, %v8495_v26, %v8505_v14  ;;  %1293 = vrot.lane.b32.xlu0 %v1267_v46, %s4109_s18  ;;  %v8509_v6 = vld [vmem:[#allocation128_spill] sm:$0xff] }
 0x1d9   : > { %vm8508_vm8 = vcmask 1042432  }
 0x1da   : > { %v840_v15 = vsel %vm668_vm14, %v8502_v23, %v3945_v2  ;;  %v1532_v34 = vsel %vm4761_vm9, %v1476_v0, %v8504_v61  ;;  %v6185_v59 = vsel %vm8508_vm8, %v2676_v28, %v8507_v36  ;;  %v1282_v2 = vpop.permute.xlu1 %1281  ;;  %v2508_v0 = vsel %vm4735_vm4, %v8509_v6, %v2115_v20  ;;  %vm8513_vm8 = vmmov %vm8500_vm6  ;;  %v8515_v36 = vld [vmem:[#allocation69_spill] sm:$0xff]  ;;  %v8528_v6 = vld [vmem:[#allocation40_spill] sm:$0xff] }
 0x1db   : > { %v1615_v42 = vsel %vm4780_vm10, %v1556_v22, %v840_v15  ;;  %v1560_v52 = vsel %vm8492_vm5, %v1532_v34, %v771_v47  ;;  %v8510_v23 = vunpack.i.h.bf16 %v8413_v11  ;;  %v8511_v61 = vunpack.i.h.bf16 %v5453_v33  ;;  %v8512_v22 = vld [vmem:[#allocation107_spill] sm:$0xff]  ;;  %1295 = vrot.lane.b32.xlu1 %v1268_v41, %s4109_s18  ;;  %v6215_v20 = vpop.permute.xlu0 %1283  ;;  %vm8518_vm5 = vmmov %vm8500_vm6 }
 0x1dc   : > { %v1616_v15 = vsel %vm4780_vm10, %v1560_v52, %v841_v21  ;;  %v6203_v34 = vsel %vm1442_vm1, %v2508_v0, %v2180_v27  ;;  %v2181_v46 = vsel %vm8513_vm8, %v8499_v48, %v8512_v22  ;;  %v8514_v47 = vunpack.i.l.bf16 %v8497_v32  ;;  %v8516_v21 = vld [vmem:[#allocation129_spill] sm:$0xff]  ;;  %v8519_v0 = vld [vmem:[#allocation7_spill] sm:$0xff]  ;;  %v8541_v32 = vld [vmem:[#allocation90_spill] sm:$0xff] }
 0x1dd   : > { %v2293_v26 = vsel %vm8500_vm6, %v8510_v23, %v3899_v8  ;;  %v942_v28 = vsel %vm584_vm0, %v8511_v61, %v3960_v7  ;;  %v1026_v33 = vsel %vm668_vm14, %v5513_v56, %v8515_v36  ;;  %v2509_v27 = vsel %vm4735_vm4, %v8516_v21, %v2116_v35  ;;  %v8522_v61 = vld [vmem:[#allocation72_spill] sm:$0xff] }
 0x1de   : > { %v943_v11 = vsel %vm584_vm0, %v3960_v7, %v8514_v47  ;;  %v8517_v52 = vunpack.i.h.bf16 %v8491_v62  ;;  %v8520_v23 = vrot.slane %v8519_v0, 5  ;;  %vm8521_vm6 = vcmask 1042432   ;;  %v8523_v47 = vld [vmem:[#allocation9_spill] sm:$0xff] }
 0x1df   : > { %v1027_v56 = vsel %vm668_vm14, %v8515_v36, %v8522_v61  ;;  %v2677_v41 = vsel %vm4780_vm10, %v6132_v4, %v2293_v26  ;;  %v8524_v21 = vrot.slane %v8523_v47, 5  ;;  %vm8525_vm8 = vmmov %vm8521_vm6  ;;  %v6246_v36 = vsel %vm1442_vm1, %v2509_v27, %v2181_v46  ;;  %v8530_v46 = vld [vmem:[#allocation42_spill] sm:$0xff] }
 0x1e0   : > { %v6223_v48 = vsel %vm8518_vm5, %v3899_v8, %v8517_v52  ;;  %v1640_v7 = vsel %vm8521_vm6, %v1615_v42, %v8520_v23  ;;  %v6239_v52 = vpop.permute.xlu1 %652  ;;  %v8527_v42 = vrot.slane %v8382_v30, 7  ;;  %v1093_v23 = vrot.slane %v5727_v19, 3  ;;  %vm8535_vm5 = vmmov %vm8521_vm6 }
 0x1e1   : > { %v1699_v35 = vsel %vm4807_vm15, %v1640_v7, %v942_v28  ;;  %v1644_v8 = vsel %vm8525_vm8, %v1616_v15, %v8524_v21  ;;  %8526 = vst [vmem:[#allocation93_spill] sm:$0xff] %v6239_v52  ;;  %v2593_v4 = vsel %vm4761_vm9, %v6203_v34, %v8528_v6  ;;  %v8529_v15 = vld [vmem:[#allocation115_spill] sm:$0xff]  ;;  %v8531_v27 = vrot.slane %v8530_v46, 7  ;;  %v6263_v52 = vpop.permute.xlu0 %654 }
 0x1e2   : > { %664 = vrot.lane.b32.xlu0 %v8527_v42, %s4112_s24  ;;  %v1724_v26 = vsel %vm1694_vm11, %v1699_v35, %v1026_v33  ;;  %v1700_v28 = vsel %vm4807_vm15, %v1644_v8, %v943_v11  ;;  %v3909_v21 = vunpack.i.l.bf16 %v8529_v15  ;;  %v1145_v42 = vsel %vm584_vm0, %v5547_v40, %v5834_v29  ;;  %8532 = vst [vmem:[#allocation81_spill] sm:$0xff] %v6263_v52  ;;  %v8533_v33 = vld [vmem:[#allocation109_spill] sm:$0xff]  ;;  %v8537_v40 = vld [vmem:[#allocation64_spill] sm:$0xff]  ;;  %v8538_v52 = vld [vmem:[#allocation22_spill] sm:$0xff] }
 0x1e3   : > { %v1728_v7 = vsel %vm1694_vm11, %v1700_v28, %v1027_v56  ;;  %666 = vrot.lane.b32.xlu1 %v8531_v27, %s4112_s24  ;;  %v1096_v34 = vrot.slane %v5735_v1, 3  ;;  %v3904_v35 = vunpack.i.l.bf16 %v8533_v33  ;;  %v8534_v11 = vrot.slane %v8364_v39, 6  ;;  %v8536_v56 = vld [vmem:[#allocation77_spill] sm:$0xff]  ;;  %v8542_v46 = vld [vmem:[#allocation95_spill] sm:$0xff] }
 0x1e4   : > { %v1146_v28 = vsel %vm584_vm0, %v5834_v29, %v8536_v56  ;;  %v1212_v61 = vsel %vm668_vm14, %v8537_v40, %v5951_v12  ;;  %v1783_v1 = vsel %vm4828_vm2, %v1724_v26, %v8538_v52  ;;  %v8539_v29 = vld [vmem:[#allocation82_spill] sm:$0xff]  ;;  %vm8540_vm6 = vcmask 1044480  }
 0x1e5   : > { %v6270_v8 = vsel %vm8535_vm5, %v2677_v41, %v8534_v11  ;;  %v1213_v41 = vsel %vm668_vm14, %v5951_v12, %v5970_v3  ;;  %v6288_v11 = vpop.permute.xlu1 %1119  ;;  %v1350_v56 = vrot.slane %v8539_v29, 1  ;;  %v1808_v40 = vsel %vm8540_vm6, %v1783_v1, %v1145_v42  ;;  %vm8543_vm8 = vmmov %vm8540_vm6  ;;  %v6304_v29 = vpop.permute.xlu0 %1121  ;;  %v8546_v42 = vld [vmem:[#allocation127_spill] sm:$0xff] }
 0x1e6   : > { %1131 = vrot.lane.b32.xlu0 %v1093_v23, %s4109_s18  ;;  %v1784_v27 = vsel %vm4828_vm2, %v1728_v7, %v4235_v16  ;;  %v1244_v39 = vrot.slane %v8541_v32, 2  ;;  %v1245_v52 = vrot.slane %v8542_v46, 2  ;;  %v2117_v26 = vsel %vm584_vm0, %v8505_v14, %v3909_v21  ;;  %8544 = vst [vmem:[#allocation98_spill] sm:$0xff] %v6304_v29 }
 0x1e7   : > { %v1812_v12 = vsel %vm8543_vm8, %v1784_v27, %v1146_v28  ;;  %v1867_v23 = vsel %vm5139_vm12, %v1808_v40, %v1212_v61  ;;  %1133 = vrot.lane.b32.xlu1 %v1096_v34, %s4109_s18  ;;  %v1351_v1 = vrot.slane %v5727_v19, 1  ;;  %v8545_v32 = vunpack.i.h.bf16 %v8421_v57  ;;  %v8547_v28 = vld [vmem:[#allocation110_spill] sm:$0xff] }
 0x1e8   : > { %v1868_v14 = vsel %vm5139_vm12, %v1812_v12, %v1213_v41  ;;  %v1311_v46 = vsel %vm584_vm0, %v8546_v42, %v1282_v2  ;;  %v2247_v61 = vsel %vm584_vm0, %v8476_v44, %v8547_v28  ;;  %v2511_v34 = vsel %vm4735_vm4, 0, %v3909_v21 }
 0x1e9   : > { %v2359_v7 = vsel %vm584_vm0, %v8545_v32, %v3904_v35  ;;  %v1312_v27 = vsel %vm584_vm0, %v1282_v2, %v6215_v20  ;;  %v1367_v40 = vpop.permute.xlu1 %1366  ;;  %v8548_v57 = vrot.slane %v8469_v18, 5  ;;  %v8549_v12 = vshrl.u32 %v8392_v55, 16 }
 0x1ea   : > { %1378 = vrot.lane.b32.xlu0 %v1350_v56, %s4112_s24  ;;  %vm8550_vm5 = vcmask 1045504   ;;  %v1396_v21 = vsel %vm668_vm14, %v5907_v31, %v1367_v40  ;;  %v1413_v42 = vrot.slane %v8523_v47, 1  ;;  %v1170_v16 = vrot.slane %v8319_v38, 3 }
 0x1eb   : > { %v4041_v41 = vpack.i.bf16 %v6094_v10, %v8548_v57  ;;  %v2510_v32 = vsel %vm4735_vm4, %v8549_v12, %v2117_v26  ;;  %v1892_v44 = vsel %vm8550_vm5, %v1867_v23, %v1244_v39  ;;  %vm8551_vm6 = vmmov %vm8550_vm5  ;;  %1380 = vrot.lane.b32.xlu1 %v1351_v1, %s4112_s24  ;;  %v6338_v57 = vpop.permute.xlu0 %1368  ;;  %v1412_v26 = vrot.slane %v8519_v0, 1  ;;  %v8552_v12 = vld [vmem:[#allocation116_spill] sm:$0xff] }
 0x1ec   : > { %v1951_v2 = vsel %vm5889_vm13, %v1892_v44, %v1311_v46  ;;  %v1896_v56 = vsel %vm8551_vm6, %v1868_v14, %v1245_v52  ;;  %vm8553_vm8 = vcmask 7168   ;;  %v1397_v23 = vsel %vm668_vm14, %v1367_v40, %v6338_v57 }
 0x1ed   : > { %v2182_v39 = vsel %vm8553_vm8, %v8512_v22, %v8552_v12  ;;  %v1952_v31 = vsel %vm5889_vm13, %v1896_v56, %v1312_v27  ;;  %vm8554_vm5 = vcmask 1046528   ;;  %v8555_v1 = vunpack.i.h.bf16 %v8533_v33  ;;  %v6354_v44 = vpop.permute.xlu1 %3997  ;;  %v8558_v27 = vld [vmem:[#allocation112_spill] sm:$0xff]  ;;  %v8559_v56 = vld [vmem:[#allocation113_spill] sm:$0xff] }
 0x1ee   : > { %v1976_v52 = vsel %vm8554_vm5, %v1951_v2, %v1396_v21  ;;  %vm8556_vm6 = vcmask 1041408   ;;  %4042 = vrot.lane.b32.xlu0 %v4041_v41, %s4109_s18  ;;  %vm8557_vm3 = vmmov %vm8554_vm5  ;;  %v1171_v19 = vrot.slane %v8506_v49, 3  ;;  %v2423_v40 = vsel %vm8553_vm8, %v8441_v9, %v8558_v27  ;;  %v8561_v2 = vld [vmem:[#allocation43_spill] sm:$0xff] }
 0x1ef   : > { %v2360_v14 = vsel %vm584_vm0, %v3904_v35, %v8555_v1  ;;  %v2651_v46 = vsel %vm8556_vm6, %v2593_v4, %v2247_v61  ;;  %v1980_v22 = vsel %vm8557_vm3, %v1952_v31, %v1397_v23  ;;  %vm8560_vm5 = vmmov %vm8553_vm8  ;;  %v3914_v35 = vunpack.i.l.bf16 %v8561_v2  ;;  %1198 = vrot.lane.b32.xlu1 %v1170_v16, %s4112_s24  ;;  %v6375_v9 = vpop.permute.xlu0 %1186  ;;  %v8563_v16 = vld [vmem:[#allocation111_spill] sm:$0xff] }
 0x1f0   : > { %v2424_v21 = vsel %vm8560_vm5, %v8558_v27, %v8559_v56  ;;  %v2036_v4 = vsel %vm5914_vm7, %v1980_v22, %v1413_v42  ;;  %v2574_v61 = vsel %vm1442_vm1, %v2510_v32, %v2182_v39  ;;  %v2578_v41 = vsel %vm1442_vm1, %v2511_v34, %v8552_v12  ;;  %v8562_v12 = vld [vmem:[#allocation120_spill] sm:$0xff]  ;;  %vm8566_vm3 = vmmov %vm8560_vm5  ;;  %v8568_v27 = vld [vmem:[#allocation119_spill] sm:$0xff] }
 0x1f1   : > { %v6372_v31 = vrot.slane %v8470_v60, 5  ;;  %3100 = vmatprep.subr.bf16.mxu1 %v2036_v4  ;;  %v2035_v23 = vsel %vm5914_vm7, %v1976_v52, %v1412_v26  ;;  %v2678_v42 = vsel %vm4780_vm10, %v2651_v46, %v6223_v48  ;;  %v2761_v32 = vsel %vm4807_vm15, %v6185_v59, %v2359_v7  ;;  %v6397_v59 = vpop.permute.xlu1 %1188  ;;  %v8567_v46 = vld [vmem:[#allocation117_spill] sm:$0xff]  ;;  %vm8569_vm8 = vmmov %vm8556_vm6 }
 0x1f2   : > { %v2762_v34 = vsel %vm4807_vm15, %v6270_v8, %v2360_v14  ;;  %v2249_v39 = vsel %vm584_vm0, %v8563_v16, %v8562_v12  ;;  %3101 = vmatpush1.bf16.msra.mxu1 %v2035_v23  ;;  %v2248_v26 = vsel %vm584_vm0, %v8547_v28, %v8563_v16  ;;  %v2813_v52 = vsel %vm1694_vm11, %v2761_v32, %v2423_v40  ;;  %v8575_v23 = vld [vmem:[#allocation46_spill] sm:$0xff] }
 0x1f3   : > { %v3910_v48 = vunpack.i.h.bf16 %v8529_v15  ;;  %v3915_v1 = vunpack.i.h.bf16 %v8561_v2  ;;  %8564 = vst [vmem:[#allocation85_spill] sm:$0xff] %v6397_v59  ;;  %1200 = vrot.lane.b32.xlu0 %v1171_v19, %s4112_s24  ;;  %v2817_v8 = vsel %vm1694_vm11, %v2762_v34, %v2424_v21  ;;  %v8565_v7 = vunpack.i.h.bf16 %v8491_v62  ;;  %v6420_v2 = vpop.permute.xlu0 %752 }
 0x1f4   : > { %v2595_v28 = vsel %vm4761_vm9, %v2574_v61, %v8416_v53  ;;  %v2596_v15 = vsel %vm4761_vm9, %v2578_v41, %v8469_v18  ;;  %v2490_v22 = vsel %vm584_vm0, %v8453_v63, %v8567_v46  ;;  %v3919_v19 = vunpack.i.l.bf16 %v8568_v27  ;;  %v8574_v61 = vld [vmem:[#allocation118_spill] sm:$0xff] }
 0x1f5   : > { %v2295_v14 = vsel %vm8566_vm3, %v8565_v7, %v3914_v35  ;;  %v2659_v40 = vsel %vm8556_vm6, %v2595_v28, %v2249_v39  ;;  %v2663_v62 = vsel %vm8569_vm8, %v2596_v15, %v8562_v12  ;;  %v8570_v21 = vrot.slane %v5759_v25, 6  ;;  %vm8573_vm3 = vmmov %vm8556_vm6  ;;  %v6445_v7 = vpop.permute.xlu1 %754 }
 0x1f6   : > { %vm8571_vm5 = vcmask 261120   ;;  %v8572_v63 = vsel %vm4761_vm9, %v6246_v36, %v8374_v5  ;;  %v2491_v41 = vsel %vm584_vm0, %v8567_v46, %v8574_v61  ;;  %v3955_v32 = vunpack.i.h.bf16 %v8575_v23  ;;  %v8584_v23 = vld [vmem:[#allocation53_spill] sm:$0xff] }
 0x1f7   : > { %764 = vrot.lane.b32.xlu1 %v8570_v21, %s4109_s18  ;;  %3789 = vmatmul.mubr.msk.bf16.vlgmr.msra.gmra.mxu1 %vm8571_vm5, %v6025_v45  ;;  %v2655_v4 = vsel %vm8573_vm3, %v8572_v63, %v2248_v26  ;;  %v8576_v34 = vrot.slane %v8528_v6, 5  ;;  %v8577_v16 = vunpack.i.h.bf16 %v8533_v33  ;;  %vm8578_vm6 = vcmask 7168   ;;  %v8613_v6 = vld [vmem:[#allocation31_spill] sm:$0xff] }
 0x1f8   : > { %3204 = vmatprep.mubr.bf16.mxu1 %v8470_v60  ;;  %v2296_v36 = vsel %vm8578_vm6, %v3914_v35, %v3915_v1  ;;  %v2679_v26 = vsel %vm4780_vm10, %v2655_v4, %v2295_v14  ;;  %v8579_v28 = vrot.slane %v8392_v55, 6  ;;  %v8580_v15 = vrot.slane %v8374_v5, 5 }
 0x1f9   : > { %v2846_v12 = vsel %vm4828_vm2, %v2813_v52, %v8576_v34  ;;  %v2361_v39 = vsel %vm584_vm0, %v8577_v16, %v3910_v48  ;;  %v3920_v33 = vunpack.i.h.bf16 %v8568_v27  ;;  %v2680_v46 = vsel %vm4780_vm10, %v2659_v40, %v2296_v36  ;;  %v8587_v40 = vld [vmem:[#allocation61_spill] sm:$0xff] }
 0x1fa   : > { %766 = vrot.lane.b32.xlu0 %v8579_v28, %s4109_s18  ;;  %v2847_v52 = vsel %vm4828_vm2, %v2817_v8, %v8580_v15  ;;  %v2681_v35 = vsel %vm4780_vm10, %v2663_v62, %v3915_v1  ;;  %vm8581_vm8 = vcmask 1044480   ;;  %v2362_v21 = vsel %vm584_vm0, %v3910_v48, %v3919_v19  ;;  %v6467_v8 = vpop.permute.xlu0 %1004  ;;  %v8590_v62 = vld [vmem:[#allocation50_spill] sm:$0xff]  ;;  %v8595_v15 = vld [vmem:[#allocation60_spill] sm:$0xff] }
 0x1fb   : > { %v2898_v14 = vsel %vm8581_vm8, %v2846_v12, %v2490_v22  ;;  %v8582_v63 = vrot.slane %v8378_v17, 6  ;;  %vm8583_vm5 = vcmask 1042432   ;;  %v8068_v34 = vunpack.i.l.bf16 %v8584_v23  ;;  %1016 = vrot.lane.b32.xlu1 %v8382_v30, %s4112_s24  ;;  %8585 = vst [vmem:[#allocation88_spill] sm:$0xff] %v6467_v8  ;;  %vm8586_vm3 = vmmov %vm8581_vm8  ;;  %v8615_v8 = vld [vmem:[#allocation66_spill] sm:$0xff]  ;;  %v8642_v23 = vld [vmem:[#allocation15_spill] sm:$0xff] }
 0x1fc   : > { %v2902_v27 = vsel %vm8586_vm3, %v2847_v52, %v2491_v41  ;;  %v2425_v1 = vsel %vm8578_vm6, %v8559_v56, %v8587_v40  ;;  %v8588_v22 = vrot.slane %v8382_v30, 6  ;;  %vm8589_vm8 = vmmov %vm8583_vm5  ;;  %v8591_v12 = vunpack.i.h.bf16 %v8590_v62  ;;  %v8596_v52 = vld [vmem:[#allocation52_spill] sm:$0xff] }
 0x1fd   : > { %v2736_v4 = vsel %vm8583_vm5, %v2678_v42, %v8582_v63  ;;  %v8592_v36 = vrot.slane %v5759_v25, 6  ;;  %v8593_v41 = vrot.slane %v8392_v55, 6  ;;  %vm8594_vm3 = vmmov %vm8583_vm5  ;;  %v6492_v63 = vpop.permute.xlu1 %1006  ;;  %v2931_v25 = vsel %vm5139_vm12, %v2898_v14, 0 }
 0x1fe   : > { %v2763_v48 = vsel %vm4807_vm15, %v2736_v4, %v2361_v39  ;;  %v2740_v42 = vsel %vm8589_vm8, %v2679_v26, %v8588_v22  ;;  %v589_v16 = vsel %vm584_vm0, %v8591_v12, %v3955_v32  ;;  %v673_v39 = vsel %vm668_vm14, %v8596_v52, %v8595_v15  ;;  %8597 = vst [vmem:[#allocation89_spill] sm:$0xff] %v6492_v63  ;;  %v8598_v26 = vld [vmem:[#allocation42_spill] sm:$0xff]  ;;  %v8600_v22 = vld [vmem:[#allocation121_spill] sm:$0xff]  ;;  %v2965_v14 = vpop.permute.xlu0 %2964  ;;  %v8602_v52 = vld [vmem:[#allocation63_spill] sm:$0xff] }
 0x1ff   : > { %v6484_v28 = vsel %vm8583_vm5, %v2680_v46, %v8592_v36  ;;  %v2748_v56 = vsel %vm8594_vm3, %v2681_v35, %v8593_v41  ;;  %v8599_v4 = vrot.slane %v8598_v26, 4  ;;  %v6500_v46 = vsel %vm584_vm0, %v3919_v19, %v3920_v33  ;;  %2976 = vrot.lane.b32.xlu1 %v2931_v25, %s4109_s18  ;;  %v8612_v26 = vld [vmem:[#allocation71_spill] sm:$0xff] }
 0x200   : > { %v2426_v35 = vsel %vm8578_vm6, %v8587_v40, %v8600_v22  ;;  %v2764_v62 = vsel %vm4807_vm15, %v2740_v42, %v2362_v21  ;;  %v2932_v12 = vsel %vm5139_vm12, %v2902_v27, 0  ;;  %v2821_v36 = vsel %vm1694_vm11, %v2763_v48, %v2425_v1  ;;  %v8601_v40 = vld [vmem:[#allocation57_spill] sm:$0xff]  ;;  %v8603_v1 = vld [vmem:[#allocation74_spill] sm:$0xff]  ;;  %v8604_v42 = vld [vmem:[#allocation68_spill] sm:$0xff] }
 0x201   : > { %1018 = vrot.lane.b32.xlu0 %v8599_v4, %s4112_s24  ;;  %v590_v41 = vsel %vm584_vm0, %v3955_v32, %v8068_v34  ;;  %v1449_v19 = vsel %vm4735_vm4, %v8519_v0, %v589_v16  ;;  %v4046_v4 = vpack.i.bf16 %v8602_v52, %v8601_v40  ;;  %v6525_v27 = vsel %vm4807_vm15, %v2748_v56, %v3920_v33  ;;  %v8605_v16 = vld [vmem:[#allocation59_spill] sm:$0xff]  ;;  %v8606_v40 = vld [vmem:[#allocation73_spill] sm:$0xff]  ;;  %v6536_v34 = vpop.permute.xlu1 %2966  ;;  %v8608_v56 = vld [vmem:[#allocation122_spill] sm:$0xff] }
 0x202   : > { %v1480_v32 = vsel %vm1442_vm1, %v1449_v19, %v673_v39  ;;  %v674_v0 = vsel %vm668_vm14, %v8595_v15, %v8603_v1  ;;  %v2825_v48 = vsel %vm1694_vm11, %v2764_v62, %v2426_v35  ;;  %v772_v25 = vsel %vm584_vm0, %v8605_v16, %v8604_v42  ;;  %8607 = vst [vmem:[#allocation101_spill] sm:$0xff] %v6536_v34  ;;  %v8609_v19 = vld [vmem:[#allocation67_spill] sm:$0xff]  ;;  %v8610_v21 = vld [vmem:[#allocation17_spill] sm:$0xff] }
 0x203   : > { %v1269_v33 = vrot.slane %v8506_v49, 2  ;;  %v2492_v39 = vsel %vm584_vm0, %v8574_v61, %v8608_v56  ;;  %v3965_v15 = vunpack.i.h.bf16 %v8609_v19  ;;  %v1450_v35 = vsel %vm4735_vm4, %v8523_v47, %v590_v41  ;;  %4047 = vrot.lane.b32.xlu1 %v4046_v4, %s4112_s24  ;;  %v6557_v61 = vpop.permute.xlu0 %4002 }
 0x204   : > { %v2993_v62 = vsel %vm584_vm0, %v2965_v14, %v6536_v34  ;;  %v1484_v16 = vsel %vm1442_vm1, %v1450_v35, %v674_v0  ;;  %v8611_v52 = vrot.slane %v8610_v21, 7  ;;  %v2992_v5 = vsel %vm584_vm0, %v8612_v26, %v2965_v14  ;;  %v8616_v21 = vld [vmem:[#allocation83_spill] sm:$0xff] }
 0x205   : > { %2978 = vrot.lane.b32.xlu0 %v2932_v12, %s4109_s18  ;;  %3141 = vmatprep.subr.bf16.mxu0 %v2993_v62  ;;  %v1270_v41 = vrot.slane %v8613_v6, 2  ;;  %vm8614_vm8 = vcmask 1041408   ;;  %v773_v0 = vsel %vm584_vm0, %v8604_v42, %v8615_v8  ;;  %v3975_v35 = vunpack.i.h.bf16 %v8616_v21  ;;  %v6573_v49 = vpop.permute.xlu1 %4007 }
 0x206   : > { %v1533_v12 = vsel %vm4761_vm9, %v1480_v32, %v8611_v52  ;;  %3142 = vmatpush1.bf16.msra.mxu0 %v2992_v5  ;;  %v8617_v32 = vrot.slane %v8416_v53, 5  ;;  %v8618_v14 = vunpack.i.l.bf16 %v8606_v40  ;;  %v8619_v52 = vld [vmem:[#allocation79_spill] sm:$0xff]  ;;  %vm8621_vm5 = vcmask 1044480   ;;  %v8622_v5 = vld [vmem:[#allocation70_spill] sm:$0xff]  ;;  %vm8627_vm3 = vmmov %vm8614_vm8 }
 0x207   : > { %v1564_v63 = vsel %vm8614_vm8, %v1533_v12, %v772_v25  ;;  %v8620_v25 = vld [vmem:[#allocation97_spill] sm:$0xff]  ;;  %v2493_v53 = vsel %vm584_vm0, %v8608_v56, %v8622_v5  ;;  %1299 = vrot.lane.b32.xlu1 %v1270_v41, %s4109_s18  ;;  %vm8639_vm6 = vcmask 1042432   ;;  %vm8641_vm8 = vmmov %vm8621_vm5 }
 0x208   : > { %v2848_v26 = vsel %vm4828_vm2, %v2821_v36, %v8617_v32  ;;  %v843_v4 = vsel %vm668_vm14, %v3965_v15, %v8618_v14  ;;  %v1099_v42 = vrot.slane %v8620_v25, 3  ;;  %v8623_v36 = vunpack.i.l.bf16 %v8609_v19  ;;  %v8624_v14 = vld [vmem:[#allocation18_spill] sm:$0xff]  ;;  %v1286_v19 = vpop.permute.xlu0 %1285 }
 0x209   : > { %1297 = vrot.lane.b32.xlu0 %v1269_v33, %s4109_s18  ;;  %v6578_v12 = vsel %vm8621_vm5, %v2848_v26, %v2492_v39  ;;  %v8625_v34 = vrot.slane %v8624_v14, 7  ;;  %v8626_v33 = vrot.slane %v8469_v18, 5  ;;  %v8629_v14 = vld [vmem:[#allocation75_spill] sm:$0xff]  ;;  %v8635_v18 = vld [vmem:[#allocation84_spill] sm:$0xff]  ;;  %v6617_v1 = vpop.permute.xlu1 %1287  ;;  %vm8644_vm5 = vmmov %vm8639_vm6 }
 0x20a   : > { %v842_v32 = vsel %vm668_vm14, %v8623_v36, %v3965_v15  ;;  %v8628_v15 = vld [vmem:[#allocation16_spill] sm:$0xff]  ;;  %v8630_v8 = vunpack.i.l.bf16 %v8629_v14  ;;  %8636 = vst [vmem:[#allocation94_spill] sm:$0xff] %v6617_v1 }
 0x20b   : > { %v1534_v62 = vsel %vm4761_vm9, %v1484_v16, %v8625_v34  ;;  %v2849_v40 = vsel %vm4828_vm2, %v2825_v48, %v8626_v33  ;;  %v1617_v39 = vsel %vm4780_vm10, %v1564_v63, %v842_v32  ;;  %v1102_v36 = vrot.slane %v8628_v15, 3  ;;  %v8631_v48 = vld [vmem:[#allocation87_spill] sm:$0xff]  ;;  %v8634_v32 = vld [vmem:[#allocation72_spill] sm:$0xff] }
 0x20c   : > { %v1568_v26 = vsel %vm8627_vm3, %v1534_v62, %v773_v0  ;;  %v944_v34 = vsel %vm584_vm0, %v8630_v8, %v3975_v35  ;;  %v1352_v33 = vrot.slane %v8631_v48, 1  ;;  %v8632_v0 = vunpack.i.l.bf16 %v8619_v52  ;;  %v8633_v62 = vld [vmem:[#allocation12_spill] sm:$0xff]  ;;  %v8640_v48 = vld [vmem:[#allocation38_spill] sm:$0xff] }
 0x20d   : > { %v1618_v16 = vsel %vm4780_vm10, %v1568_v26, %v843_v4  ;;  %v1028_v56 = vsel %vm668_vm14, %v8634_v32, %v8633_v62  ;;  %1135 = vrot.lane.b32.xlu0 %v1099_v42, %s4109_s18  ;;  %v8637_v4 = vld [vmem:[#allocation11_spill] sm:$0xff]  ;;  %v6628_v32 = vsel %vm8641_vm8, %v2849_v40, %v2493_v53  ;;  %v8643_v42 = vrot.slane %v8642_v23, 5  ;;  %1137 = vrot.lane.b32.xlu1 %v1102_v36, %s4109_s18  ;;  %v6660_v10 = vpop.permute.xlu1 %658 }
 0x20e   : > { %v945_v41 = vsel %vm584_vm0, %v3975_v35, %v8632_v0  ;;  %v8638_v26 = vrot.slane %v8637_v4, 5  ;;  %v1029_v35 = vsel %vm668_vm14, %v8633_v62, %v8640_v48  ;;  %v1353_v0 = vrot.slane %v8620_v25, 1  ;;  %v657_v25 = vpop.permute.xlu0 %656  ;;  %v8647_v53 = vld [vmem:[#allocation123_spill] sm:$0xff]  ;;  %8653 = vst [vmem:[#allocation102_spill] sm:$0xff] %v6660_v10 }
 0x20f   : > { %v1652_v60 = vsel %vm8644_vm5, %v1618_v16, %v8643_v42  ;;  %vm8648_vm3 = vcmask 7168   ;;  %v8649_v16 = vld [vmem:[#allocation114_spill] sm:$0xff]  ;;  %v8650_v48 = vunpack.i.l.bf16 %v8635_v18  ;;  %vm8663_vm5 = vcmask 1045504  }
 0x210   : > { %v1648_v63 = vsel %vm8639_vm6, %v1617_v39, %v8638_v26  ;;  %v8645_v39 = vunpack.i.l.bf16 %v6557_v61  ;;  %v8646_v26 = vunpack.i.h.bf16 %v6354_v44  ;;  %v6645_v40 = vsel %vm8648_vm3, %v8600_v22, %v8647_v53  ;;  %vm8657_vm6 = vmmov %vm8641_vm8 }
 0x211   : > { %v1701_v8 = vsel %vm4807_vm15, %v1648_v63, %v944_v34  ;;  %v1702_v63 = vsel %vm4807_vm15, %v1652_v60, %v945_v41  ;;  %v1246_v42 = vrot.slane %v8649_v16, 2  ;;  %1382 = vrot.lane.b32.xlu0 %v1352_v33, %s4112_s24  ;;  %v1172_v60 = vrot.slane %v8613_v6, 3  ;;  %v8656_v16 = vld [vmem:[#allocation21_spill] sm:$0xff]  ;;  %1384 = vrot.lane.b32.xlu1 %v1353_v0, %s4112_s24  ;;  %vm8660_vm8 = vmmov %vm8657_vm6 }
 0x212   : > { %v596_v62 = vsel %vm584_vm0, %v8646_v26, %v8645_v39  ;;  %v1732_v34 = vsel %vm1694_vm11, %v1701_v8, %v1028_v56  ;;  %v1736_v15 = vsel %vm1694_vm11, %v1702_v63, %v1029_v35  ;;  %v8651_v39 = vunpack.i.h.bf16 %v8619_v52  ;;  %v8652_v26 = vld [vmem:[#allocation77_spill] sm:$0xff]  ;;  %vm8666_vm3 = vmmov %vm8663_vm5 }
 0x213   : > { %v1147_v22 = vsel %vm584_vm0, %v8652_v26, %v6288_v11  ;;  %v1148_v56 = vsel %vm584_vm0, %v6288_v11, %v6304_v29  ;;  %v1214_v41 = vsel %vm668_vm14, %v5970_v3, %v6375_v9  ;;  %v1456_v8 = vsel %vm4735_vm4, %v8319_v38, %v596_v62  ;;  %v8654_v35 = vld [vmem:[#allocation81_spill] sm:$0xff]  ;;  %v6688_v26 = vpop.permute.xlu0 %1123 }
 0x214   : > { %v594_v36 = vsel %vm584_vm0, %v8651_v39, %v8650_v48  ;;  %v680_v48 = vsel %vm668_vm14, %v657_v25, %v6660_v10  ;;  %v8655_v63 = vld [vmem:[#allocation93_spill] sm:$0xff]  ;;  %v1785_v39 = vsel %vm4828_vm2, %v1732_v34, %v8656_v16  ;;  %v1215_v11 = vsel %vm668_vm14, %v6375_v9, %v6397_v59  ;;  %v8658_v34 = vld [vmem:[#allocation58_spill] sm:$0xff]  ;;  %v8659_v10 = vld [vmem:[#allocation20_spill] sm:$0xff] }
 0x215   : > { %v678_v33 = vsel %vm668_vm14, %v8655_v63, %v8654_v35  ;;  %v6685_v3 = vsel %vm1442_vm1, %v1456_v8, %v680_v48  ;;  %v1816_v62 = vsel %vm8657_vm6, %v1785_v39, %v1147_v22  ;;  %v1786_v6 = vsel %vm4828_vm2, %v1736_v15, %v8523_v47  ;;  %v6702_v8 = vpop.permute.xlu1 %1125  ;;  %938 = vrot.lane.b32.xlu0 %v6372_v31, %s4109_s18  ;;  %v8661_v15 = vld [vmem:[#allocation10_spill] sm:$0xff] }
 0x216   : > { %v4009_v29 = vunpack.i.l.bf16 %v6573_v49  ;;  %v1247_v16 = vrot.slane %v8658_v34, 2  ;;  %v1454_v9 = vsel %vm4735_vm4, %v8659_v10, %v594_v36  ;;  %v1820_v48 = vsel %vm8660_vm8, %v1786_v6, %v1148_v56  ;;  %v8662_v56 = vld [vmem:[#allocation65_spill] sm:$0xff]  ;;  %1202 = vrot.lane.b32.xlu1 %v1172_v60, %s4112_s24 }
 0x217   : > { %v1869_v0 = vsel %vm5139_vm12, %v1816_v62, %v1214_v41  ;;  %v1173_v47 = vrot.slane %v8378_v17, 3  ;;  %v8089_v22 = vunpack.i.h.bf16 %v8661_v15  ;;  %v1500_v39 = vsel %vm1442_vm1, %v1454_v9, %v678_v33 }
 0x218   : > { %v1870_v34 = vsel %vm5139_vm12, %v1820_v48, %v1215_v11  ;;  %v1313_v6 = vsel %vm584_vm0, %v6215_v20, %v1286_v19  ;;  %v6716_v36 = vsel %vm1694_vm11, %v6525_v27, %v8647_v53  ;;  %v777_v62 = vsel %vm584_vm0, %v6420_v2, %v6445_v7  ;;  %v1371_v11 = vpop.permute.xlu0 %1370  ;;  %v8664_v48 = vld [vmem:[#allocation30_spill] sm:$0xff] }
 0x219   : > { %v1314_v33 = vsel %vm584_vm0, %v1286_v19, %v6617_v1  ;;  %v847_v20 = vsel %vm668_vm14, %v8089_v22, %v4009_v29  ;;  %v1900_v27 = vsel %vm8663_vm5, %v1869_v0, %v1246_v42  ;;  %v1398_v53 = vsel %vm668_vm14, %v6338_v57, %v1371_v11  ;;  %v6741_v59 = vpop.permute.xlu1 %1372  ;;  %1204 = vrot.lane.b32.xlu0 %v1173_v47, %s4112_s24 }
 0x21a   : > { %v1415_v9 = vrot.slane %v8642_v23, 1  ;;  %v8665_v41 = vrot.slane %v8664_v48, 7  ;;  %v1953_v60 = vsel %vm5889_vm13, %v1900_v27, %v1313_v6  ;;  %v1904_v1 = vsel %vm8666_vm3, %v1870_v34, %v1247_v16  ;;  %1020 = vrot.lane.b32.xlu1 %v8392_v55, %s4112_s24 }
 0x21b   : > { %v1414_v42 = vrot.slane %v8637_v4, 1  ;;  %vm8667_vm6 = vcmask 1041408   ;;  %v1954_v0 = vsel %vm5889_vm13, %v1904_v1, %v1314_v33  ;;  %vm8668_vm8 = vcmask 1046528  }
 0x21c   : > { %v1538_v19 = vsel %vm4761_vm9, %v1500_v39, %v8665_v41  ;;  %v1984_v48 = vsel %vm8668_vm8, %v1953_v60, %v1398_v53  ;;  %v1399_v39 = vsel %vm668_vm14, %v1371_v11, %v6741_v59  ;;  %v8669_v6 = vunpack.i.h.bf16 %v6354_v44  ;;  %v6761_v1 = vpop.permute.xlu0 %4012  ;;  %vm8671_vm5 = vmmov %vm8668_vm8 }
 0x21d   : > { %v1584_v57 = vsel %vm8667_vm6, %v1538_v19, %v777_v62  ;;  %v8670_v16 = vunpack.i.l.bf16 %v8635_v18  ;;  %v8087_v47 = vunpack.i.h.bf16 %v6557_v61  ;;  %v1988_v62 = vsel %vm8671_vm5, %v1954_v0, %v1399_v39  ;;  %v6777_v60 = vpop.permute.xlu1 %1190 }
 0x21e   : > { %v1622_v41 = vsel %vm4780_vm10, %v1584_v57, %v847_v20  ;;  %v679_v33 = vsel %vm668_vm14, %v8654_v35, %v657_v25  ;;  %v8091_v11 = vunpack.i.h.bf16 %v6761_v1  ;;  %v8090_v27 = vunpack.i.l.bf16 %v6761_v1 }
 0x21f   : > { %v595_v34 = vsel %vm584_vm0, %v8670_v16, %v8669_v6  ;;  %v2038_v53 = vsel %vm5914_vm7, %v1988_v62, %v1415_v9  ;;  %v8672_v20 = vsel %vm4807_vm15, %v6484_v28, %v6500_v46  ;;  %v8673_v25 = vsel %vm5139_vm12, %v6578_v12, 0  ;;  %v8674_v46 = vld [vmem:[#allocation25_spill] sm:$0xff] }
 0x220   : > { %v2829_v19 = vsel %vm1694_vm11, %v8672_v20, %v6645_v40  ;;  %2980 = vrot.lane.b32.xlu0 %v8673_v25, %s4109_s18  ;;  %3143 = vmatprep.subr.bf16.mxu0 %v2038_v53  ;;  %v2037_v35 = vsel %vm5914_vm7, %v1984_v48, %v1414_v42  ;;  %v2934_v9 = vsel %vm5139_vm12, %v6628_v32, 0  ;;  %v1271_v28 = vrot.slane %v8378_v17, 2  ;;  %v6815_v6 = vpop.permute.xlu0 %1192  ;;  %v8680_v25 = vld [vmem:[#allocation128_spill] sm:$0xff] }
 0x221   : > { %v1455_v40 = vsel %vm4735_vm4, %v8674_v46, %v595_v34  ;;  %v8675_v57 = vunpack.i.l.bf16 %v6557_v61  ;;  %v6805_v42 = vsel %vm584_vm0, %v8087_v47, %v8090_v27  ;;  %3144 = vmatpush1.bf16.msra.mxu0 %v2037_v35  ;;  %v8677_v32 = vrot.slane %v8319_v38, 5  ;;  %2982 = vrot.lane.b32.xlu1 %v2934_v9, %s4109_s18  ;;  %v757_v20 = vpop.permute.xlu1 %756  ;;  %v8709_v38 = vld [vmem:[#allocation24_spill] sm:$0xff] }
 0x222   : > { %8676 = vst [vmem:[#allocation108_spill] sm:$0xff] %v6805_v42  ;;  %vm8678_vm3 = vcmask 1042432   ;;  %v8088_v48 = vunpack.i.h.bf16 %v6573_v49  ;;  %v1504_v39 = vsel %vm1442_vm1, %v1455_v40, %v679_v33  ;;  %v1272_v16 = vrot.slane %v8382_v30, 2  ;;  %v8682_v40 = vld [vmem:[#allocation34_spill] sm:$0xff]  ;;  %v8711_v42 = vld [vmem:[#allocation80_spill] sm:$0xff] }
 0x223   : > { %v6798_v12 = vsel %vm584_vm0, %v8675_v57, %v8091_v11  ;;  %v6810_v0 = vsel %vm8678_vm3, %v1622_v41, %v8677_v32  ;;  %v3970_v62 = vunpack.i.h.bf16 %v8629_v14  ;;  %v8679_v41 = vunpack.i.l.bf16 %v8662_v56  ;;  %v8684_v57 = vld [vmem:[#allocation91_spill] sm:$0xff] }
 0x224   : > { %v3974_v33 = vunpack.i.l.bf16 %v8616_v21  ;;  %1301 = vrot.lane.b32.xlu0 %v1271_v28, %s4109_s18  ;;  %v1105_v35 = vrot.slane %v8680_v25, 3  ;;  %vm8681_vm6 = vcmask 261120   ;;  %v2851_v14 = vsel %vm4828_vm2, %v6716_v36, %v6372_v31  ;;  %v8687_v36 = vld [vmem:[#allocation129_spill] sm:$0xff]  ;;  %v8707_v11 = vld [vmem:[#allocation23_spill] sm:$0xff] }
 0x225   : > { %v2494_v53 = vsel %vm584_vm0, %v8622_v5, %v8679_v41  ;;  %3790 = vmatmul.mubr.msk.bf16.vlgmr.msra.gmra.mxu0 %vm8681_vm6, %v6025_v45  ;;  %v778_v9 = vsel %vm584_vm0, %v6445_v7, %v757_v20  ;;  %v8683_v5 = vrot.slane %v8682_v40, 7  ;;  %v2850_v28 = vsel %vm4828_vm2, %v2829_v19, %v8684_v57  ;;  %1303 = vrot.lane.b32.xlu1 %v1272_v16, %s4109_s18  ;;  %v6857_v7 = vpop.permute.xlu0 %758  ;;  %v8689_v41 = vld [vmem:[#allocation53_spill] sm:$0xff]  ;;  %v8691_v16 = vld [vmem:[#allocation35_spill] sm:$0xff]  ;;  %v6884_v47 = vpop.permute.xlu1 %1008 }
 0x226   : > { %v8685_v32 = vmov 0   ;;  %v6851_v45 = vsel %vm668_vm14, %v4009_v29, %v8088_v48  ;;  %vm8686_vm8 = vcmask 1041408   ;;  %vm8688_vm5 = vcmask 1044480   ;;  %v8706_v29 = vld [vmem:[#allocation73_spill] sm:$0xff] }
 0x227   : > { %v1539_v21 = vsel %vm4761_vm9, %v1504_v39, %v8683_v5  ;;  %3247 = vmatprep.mubr.bf16.mxu0 %v8685_v32  ;;  %v1108_v39 = vrot.slane %v8687_v36, 3  ;;  %v6861_v19 = vsel %vm8688_vm5, %v2850_v28, %v2494_v53  ;;  %v8690_v40 = vunpack.i.l.bf16 %v8689_v41  ;;  %v8693_v28 = vld [vmem:[#allocation48_spill] sm:$0xff]  ;;  %v8694_v41 = vld [vmem:[#allocation74_spill] sm:$0xff]  ;;  %vm8695_vm3 = vmmov %vm8686_vm8 }
 0x228   : > { %v6854_v31 = vsel %vm8686_vm8, %v1539_v21, %v778_v9  ;;  %v779_v9 = vsel %vm584_vm0, %v757_v20, %v6857_v7  ;;  %v8692_v21 = vrot.slane %v8691_v16, 7  ;;  %v592_v53 = vsel %vm584_vm0, %v3970_v62, %v3974_v33  ;;  %1139 = vrot.lane.b32.xlu0 %v1105_v35, %s4109_s18  ;;  %v8696_v20 = vld [vmem:[#allocation16_spill] sm:$0xff]  ;;  %vm8699_vm6 = vmmov %vm8688_vm5 }
 0x229   : > { %v591_v5 = vsel %vm584_vm0, %v8690_v40, %v3970_v62  ;;  %v675_v40 = vsel %vm668_vm14, %v8694_v41, %v8693_v28  ;;  %v1354_v48 = vrot.slane %v8696_v20, 1  ;;  %v8697_v16 = vld [vmem:[#allocation76_spill] sm:$0xff]  ;;  %1141 = vrot.lane.b32.xlu1 %v1108_v39, %s4109_s18  ;;  %v6903_v35 = vpop.permute.xlu0 %1010  ;;  %v2969_v41 = vpop.permute.xlu1 %2968  ;;  %v3980_v27 = vunpack.i.h.bf16 %v8706_v29  ;;  %vm8712_vm8 = vmmov %vm8695_vm3 }
 0x22a   : > { %v1540_v57 = vsel %vm4761_vm9, %v6685_v3, %v8692_v21  ;;  %v676_v22 = vsel %vm668_vm14, %v8693_v28, %v8697_v16  ;;  %v8698_v3 = vunpack.i.l.bf16 %v8662_v56  ;;  %v8700_v21 = vunpack.i.h.bf16 %v8619_v52  ;;  %vm8717_vm5 = vmmov %vm8695_vm3 }
 0x22b   : > { %v6882_v34 = vsel %vm8695_vm3, %v1540_v57, %v779_v9  ;;  %v1451_v9 = vsel %vm4735_vm4, %v8637_v4, %v591_v5  ;;  %v1355_v28 = vrot.slane %v8680_v25, 1  ;;  %v677_v4 = vsel %vm668_vm14, %v8697_v16, %v8655_v63  ;;  %v8703_v16 = vld [vmem:[#allocation19_spill] sm:$0xff] }
 0x22c   : > { %v6894_v62 = vsel %vm8699_vm6, %v2851_v14, %v8698_v3  ;;  %v593_v57 = vsel %vm584_vm0, %v3974_v33, %v8700_v21  ;;  %v1488_v56 = vsel %vm1442_vm1, %v1451_v9, %v675_v40  ;;  %v1452_v14 = vsel %vm4735_vm4, %v8642_v23, %v592_v53  ;;  %1386 = vrot.lane.b32.xlu0 %v1354_v48, %s4112_s24  ;;  %v8701_v3 = vld [vmem:[#allocation45_spill] sm:$0xff]  ;;  %v8702_v9 = vld [vmem:[#allocation66_spill] sm:$0xff] }
 0x22d   : > { %v2935_v33 = vsel %vm5139_vm12, %v6861_v19, 0  ;;  %v1492_v39 = vsel %vm1442_vm1, %v1452_v14, %v676_v22  ;;  %v3994_v5 = vunpack.i.l.bf16 %v8661_v15  ;;  %v1174_v40 = vrot.slane %v8382_v30, 3  ;;  %v6930_v22 = vld.sshfl [vmem:[%s4591_s23] sm:$0x33 pattern:$0x76325410]  ;;  %1388 = vrot.lane.b32.xlu1 %v1355_v28, %s4112_s24 }
 0x22e   : > { %v2936_v53 = vsel %vm5139_vm12, %v6894_v62, 0  ;;  %v774_v63 = vsel %vm584_vm0, %v8702_v9, %v8701_v3  ;;  %v1453_v19 = vsel %vm4735_vm4, %v8703_v16, %v593_v57  ;;  %8704 = vst [vmem:[#allocation92_spill] sm:$0xff] %v6930_v22  ;;  %v1175_v21 = vrot.slane %v6930_v22, 3  ;;  %v8705_v14 = vld [vmem:[#allocation126_spill] sm:$0xff]  ;;  %v6941_v9 = vpop.permute.xlu0 %2970  ;;  %s3645_s23 = sld [smem:[#allocation4 + %s4097_s10]] }
 0x22f   : > { %v8708_v25 = vrot.slane %v8707_v11, 7  ;;  %v1496_v20 = vsel %vm1442_vm1, %v1453_v19, %v677_v4  ;;  %v1273_v57 = vrot.slane %v6930_v22, 2  ;;  %v8710_v30 = vrot.slane %v8709_v38, 7  ;;  %v8713_v19 = vld [vmem:[#allocation101_spill] sm:$0xff] }
 0x230   : > { %v775_v11 = vsel %vm584_vm0, %v8701_v3, %v8711_v42  ;;  %v2995_v28 = vsel %vm584_vm0, %v2969_v41, %v6941_v9  ;;  %v3990_v4 = vunpack.i.h.bf16 %v8635_v18  ;;  %v845_v38 = vsel %vm668_vm14, %v3980_v27, %v3994_v5  ;;  %1206 = vrot.lane.b32.xlu0 %v1174_v40, %s4112_s24 }
 0x231   : > { %v1535_v62 = vsel %vm4761_vm9, %v1488_v56, %v8708_v25  ;;  %v1536_v48 = vsel %vm4761_vm9, %v1492_v39, %v8710_v30  ;;  %v776_v25 = vsel %vm584_vm0, %v8711_v42, %v6420_v2  ;;  %v2994_v30 = vsel %vm584_vm0, %v8713_v19, %v2969_v41  ;;  %v6961_v39 = vpop.permute.xlu1 %4017  ;;  %3184 = vmatprep.subr.bf16.mxu1 %v2995_v28  ;;  %v8714_v2 = vld [vmem:[#allocation29_spill] sm:$0xff] }
 0x232   : > { %v1572_v56 = vsel %vm8712_vm8, %v1535_v62, %v774_v63  ;;  %v3999_v3 = vunpack.i.l.bf16 %v6354_v44  ;;  %v8715_v42 = vrot.slane %v8714_v2, 7  ;;  %v4020_v63 = vunpack.i.h.bf16 %v6961_v39  ;;  %3185 = vmatpush1.bf16.msra.mxu1 %v2994_v30  ;;  %1208 = vrot.lane.b32.xlu1 %v1175_v21, %s4112_s24  ;;  %v6977_v44 = vpop.permute.xlu0 %4022  ;;  %v8720_v21 = vld [vmem:[#allocation8_spill] sm:$0xff] }
 0x233   : > { %v4019_v18 = vunpack.i.l.bf16 %v6961_v39  ;;  %v8716_v62 = vunpack.i.l.bf16 %v8706_v29  ;;  %v1576_v19 = vsel %vm8717_vm5, %v1536_v48, %v775_v11  ;;  %v1274_v28 = vrot.slane %v8392_v55, 2 }
 0x234   : > { %v1537_v22 = vsel %vm4761_vm9, %v1496_v20, %v8715_v42  ;;  %v8718_v20 = vunpack.i.h.bf16 %v6761_v1  ;;  %v8721_v48 = vrot.slane %v8720_v21, 5  ;;  %v8722_v11 = vsel %vm4780_vm10, %v6854_v31, %v6851_v45  ;;  %2984 = vrot.lane.b32.xlu0 %v2935_v33, %s4109_s18  ;;  %v8738_v45 = vld [vmem:[#allocation102_spill] sm:$0xff]  ;;  %p3646_p10 = scmp.eq.s32.totalorder %s3645_s23, 1 }
 0x235   : > { %v844_v41 = vsel %vm668_vm14, %v8716_v62, %v3980_v27  ;;  %v1580_v40 = vsel %vm8695_vm3, %v1537_v22, %v776_v25  ;;  %v8719_v27 = vunpack.i.l.bf16 %v6761_v1  ;;  %v4024_v22 = vunpack.i.l.bf16 %v6977_v44  ;;  %v8816_v51 = vld [vmem:[#allocation92_spill] sm:$0xff] }
 0x236   : > { %v598_v30 = vsel %vm584_vm0, %v8718_v20, %v4019_v18  ;;  %vm8723_vm6 = vcmask 1042432   ;;  %v1619_v2 = vsel %vm4780_vm10, %v1572_v56, %v844_v41  ;;  %v8724_v1 = vunpack.i.h.bf16 %v8661_v15  ;;  %v1290_v20 = vpop.permute.xlu1 %1289  ;;  %v8728_v41 = vld [vmem:[#allocation38_spill] sm:$0xff]  ;;  %2986 = vrot.lane.b32.xlu1 %v2936_v53, %s4109_s18 }
 0x237   : > { %v6990_v29 = vsel %vm584_vm0, %v8719_v27, %v4020_v63  ;;  %v7001_v25 = vsel %vm8723_vm6, %v8722_v11, %v8721_v48  ;;  %v1620_v62 = vsel %vm4780_vm10, %v1576_v19, %v845_v38  ;;  %v8725_v31 = vunpack.i.l.bf16 %v8619_v52  ;;  %v8727_v38 = vld [vmem:[#allocation88_spill] sm:$0xff]  ;;  %vm8731_vm8 = vmmov %vm8723_vm6 }
 0x238   : > { %v846_v42 = vsel %vm668_vm14, %v3994_v5, %v8724_v1  ;;  %v947_v56 = vsel %vm584_vm0, %v3990_v4, %v3999_v3  ;;  %v8726_v5 = vunpack.i.h.bf16 %v6573_v49  ;;  %v1030_v19 = vsel %vm668_vm14, %v8728_v41, %v8727_v38  ;;  %vm8734_vm5 = vmmov %vm8723_vm6  ;;  %1305 = vrot.lane.b32.xlu0 %v1273_v57, %s4109_s18  ;;  %v8739_v57 = vld [vmem:[#allocation98_spill] sm:$0xff] }
 0x239   : > { %v946_v27 = vsel %vm584_vm0, %v8725_v31, %v3990_v4  ;;  %v1621_v15 = vsel %vm4780_vm10, %v1580_v40, %v846_v42  ;;  %v8729_v52 = vunpack.i.h.bf16 %v6557_v61  ;;  %v7039_v40 = vpop.permute.xlu0 %1291  ;;  %v1356_v49 = vrot.slane %v8687_v36, 1  ;;  %v8732_v42 = vld [vmem:[#allocation89_spill] sm:$0xff]  ;;  %vm8736_vm3 = vmmov %vm8734_vm5 }
 0x23a   : > { %v7026_v33 = vsel %vm668_vm14, %v8726_v5, %v4024_v22  ;;  %v8730_v11 = vrot.slane %v8703_v16, 5  ;;  %v1031_v61 = vsel %vm668_vm14, %v8727_v38, %v8732_v42  ;;  %v1032_v53 = vsel %vm668_vm14, %v8732_v42, %v6884_v47  ;;  %1307 = vrot.lane.b32.xlu1 %v1274_v28, %s4109_s18 }
 0x23b   : > { %v948_v48 = vsel %vm584_vm0, %v3999_v3, %v8729_v52  ;;  %v1624_v4 = vsel %vm4780_vm10, %v6882_v34, %v7026_v33  ;;  %v8733_v3 = vrot.slane %v8659_v10, 5  ;;  %v8737_v38 = vshrl.u32 %v8392_v55, 16  ;;  %v7199_v34 = vld [vmem:[%s7747_s3] sm:$0xff]  }
 0x23c   : > { %v1656_v1 = vsel %vm8731_vm8, %v1619_v2, %v8730_v11  ;;  %v8735_v2 = vrot.slane %v8674_v46, 5  ;;  %v661_v11 = vpop.permute.xlu1 %660  ;;  %1390 = vrot.lane.b32.xlu0 %v1356_v49, %s4112_s24  ;;  %vm8744_vm6 = vcmask 1044480   ;;  %v4025_v39 = vunpack.i.h.bf16 %v6977_v44 }
 0x23d   : > { %v1660_v31 = vsel %vm8734_vm5, %v1620_v62, %v8733_v3  ;;  %v1703_v5 = vsel %vm4807_vm15, %v1656_v1, %v946_v27  ;;  %v1359_v62 = vrot.slane %v8737_v38, 1  ;;  %v681_v27 = vsel %vm668_vm14, %v8738_v45, %v661_v11  ;;  %vm8746_vm8 = vmmov %vm8744_vm6 }
 0x23e   : > { %v1704_v41 = vsel %vm4807_vm15, %v1660_v31, %v947_v56  ;;  %v1664_v52 = vsel %vm8736_vm3, %v1621_v15, %v8735_v2  ;;  %v1740_v3 = vsel %vm1694_vm11, %v1703_v5, %v1030_v19  ;;  %v1457_v56 = vsel %vm4735_vm4, %v8720_v21, %v6798_v12  ;;  %v8740_v12 = vld [vmem:[#allocation85_spill] sm:$0xff]  ;;  %v8742_v2 = vld [vmem:[#allocation27_spill] sm:$0xff]  ;;  %vm8747_vm5 = vmmov %vm8744_vm6 }
 0x23f   : > { %v1705_v42 = vsel %vm4807_vm15, %v1664_v52, %v948_v48  ;;  %v1744_v15 = vsel %vm1694_vm11, %v1704_v41, %v1031_v61  ;;  %v1149_v1 = vsel %vm584_vm0, %v8739_v57, %v6688_v26  ;;  %v7079_v19 = vsel %vm1442_vm1, %v1457_v56, %v681_v27  ;;  %v7082_v48 = vpop.permute.xlu0 %662  ;;  %v8741_v41 = vld [vmem:[#allocation31_spill] sm:$0xff]  ;;  %v8745_v56 = vld [vmem:[#allocation32_spill] sm:$0xff]  ;;  %1392 = vrot.lane.b32.xlu1 %v1359_v62, %s4112_s24  ;;  %s3647_s24 = scalar_select %p3646_p10, 1, 0 }
 0x240   : > { %v1748_v31 = vsel %vm1694_vm11, %v1705_v42, %v1032_v53  ;;  %v1150_v45 = vsel %vm584_vm0, %v6688_v26, %v6702_v8  ;;  %v1216_v61 = vsel %vm668_vm14, %v8740_v12, %v6777_v60  ;;  %v682_v5 = vsel %vm668_vm14, %v661_v11, %v7082_v48  ;;  %v8743_v26 = vld [vmem:[#allocation39_spill] sm:$0xff]  ;;  %v7103_v27 = vpop.permute.xlu1 %1127  ;;  %v3022_v57 = vld [vmem:[%s7748_s4] sm:$0xff] }
 0x241   : > { %v1458_v53 = vsel %vm4735_vm4, %v8741_v41, %v598_v30  ;;  %v1787_v28 = vsel %vm4828_vm2, %v1740_v3, %v8742_v2  ;;  %v1217_v52 = vsel %vm668_vm14, %v6777_v60, %v6815_v6  ;;  %v1249_v38 = vrot.slane %v8743_v26, 2  ;;  %3026 = vperm.xlu0 %4051, %v3022_v57  }
 0x242   : > { %v1516_v42 = vsel %vm1442_vm1, %v1458_v53, %v682_v5  ;;  %v1824_v11 = vsel %vm8744_vm6, %v1787_v28, %v1149_v1  ;;  %v1788_v30 = vsel %vm4828_vm2, %v1744_v15, %v8642_v23  ;;  %v1151_v3 = vsel %vm584_vm0, %v6702_v8, %v7103_v27  ;;  %v8748_v15 = vld [vmem:[#allocation94_spill] sm:$0xff] }
 0x243   : > { %v1789_v60 = vsel %vm4828_vm2, %v1748_v31, %v8745_v56  ;;  %v1828_v49 = vsel %vm8746_vm8, %v1788_v30, %v1150_v45  ;;  %v1871_v1 = vsel %vm5139_vm12, %v1824_v11, %v1216_v61  ;;  %v7126_v23 = vpop.permute.xlu0 %1129  ;;  %v1315_v31 = vsel %vm584_vm0, %v8748_v15, %v1290_v20  ;;  %v3023_v45 = vld [vmem:[%s7748_s4 + $0x8] sm:$0xff] }
 0x244   : > { %v7123_v12 = vsel %vm8747_vm5, %v1789_v60, %v1151_v3  ;;  %v1872_v8 = vsel %vm5139_vm12, %v1828_v49, %v1217_v52  ;;  %v4113_v5 = vmov 0.0   ;;  %vm8749_vm3 = vcmask 7168   ;;  %v1375_v61 = vpop.permute.xlu1 %1374  ;;  %3031 = vperm.xlu1 %4052, %v3023_v45  }
 0x245   : > { %395 = vst.msk [vmem:[#allocation2] sm:$0xff] %vm8749_vm3, %v4113_v5  ;;  %vm8750_vm6 = vmmov %vm8749_vm3  ;;  %v1316_v62 = vsel %vm584_vm0, %v1290_v20, %v7039_v40  ;;  %v8751_v53 = vrot.slane %v8705_v14, 2  ;;  %vm8752_vm8 = vcmask 1045504   ;;  %v1400_v28 = vsel %vm668_vm14, %v6741_v59, %v1375_v61 }
 0x246   : > { %396 = vst.msk [vmem:[#allocation2 + $0x8] sm:$0xff] %vm8750_vm6, %v4113_v5  ;;  %v1417_v52 = vrot.slane %v8659_v10, 1  ;;  %vm8753_vm5 = vmmov %vm8752_vm8  ;;  %v1416_v20 = vrot.slane %v8703_v16, 1  ;;  %vm8754_vm3 = vcmask 1046528   ;;  %v8756_v45 = vrot.slane %v8741_v41, 5 }
 0x247   : > { %v1908_v2 = vsel %vm8752_vm8, %v1871_v1, %v8751_v53  ;;  %v1912_v11 = vsel %vm8753_vm5, %v1872_v8, %v1249_v38  ;;  %v7150_v30 = vpop.permute.xlu0 %1376  ;;  %vm8755_vm6 = vmmov %vm8754_vm3  ;;  %vm8757_vm8 = vcmask 1042432   ;;  %vm8758_vm5 = vcmask 261120  }
 0x248   : > { %v1955_v26 = vsel %vm5889_vm13, %v1908_v2, %v1315_v31  ;;  %v1956_v14 = vsel %vm5889_vm13, %v1912_v11, %v1316_v62  ;;  %v1401_v59 = vsel %vm668_vm14, %v1375_v61, %v7150_v30  ;;  %v4028_v56 = vpop.permute.xlu1 %4027  ;;  %v7183_v62 = vsel %vm8757_vm8, %v1624_v4, %v8756_v45  ;;  %v8759_v4 = vld [vmem:[#allocation40_spill] sm:$0xff] }
 0x249   : > { %v1992_v3 = vsel %vm8754_vm3, %v1955_v26, %v1400_v28  ;;  %v1996_v60 = vsel %vm8755_vm6, %v1956_v14, %v1401_v59  ;;  %v4030_v57 = vunpack.i.h.bf16 %v4028_v56  ;;  %v4029_v49 = vunpack.i.l.bf16 %v4028_v56 }
 0x24a   : > { %v2040_v38 = vsel %vm5914_vm7, %v1996_v60, %v1417_v52  ;;  %v2039_v16 = vsel %vm5914_vm7, %v1992_v3, %v1416_v20  ;;  %v8760_v53 = vrot.slane %v8759_v4, 7  ;;  %v850_v28 = vsel %vm668_vm14, %v4024_v22, %v4025_v39  ;;  %v8762_v20 = vld [vmem:[#allocation41_spill] sm:$0xff] }
 0x24b   : > { %v1195_v1 = vpop.permute.xlu0 %1194  ;;  %3186 = vmatprep.subr.bf16.mxu1 %v2040_v38  ;;  %v599_v8 = vsel %vm584_vm0, %v4019_v18, %v4030_v57  ;;  %v7169_v15 = vsel %vm584_vm0, %v4020_v63, %v4029_v49  ;;  %vm8761_vm3 = vcmask 1041408   ;;  %v8763_v14 = vrot.slane %v8762_v20, 7 }
 0x24c   : > { %v7173_v31 = vsel %vm668_vm14, %v6815_v6, %v1195_v1  ;;  %3187 = vmatpush1.bf16.msra.mxu1 %v2039_v16  ;;  %v7190_v6 = vpop.permute.xlu1 %1196  ;;  %v1708_v18 = vsel %vm4807_vm15, %v7183_v62, %v7169_v15  ;;  %v1541_v2 = vsel %vm4761_vm9, %v7079_v19, %v8760_v53  ;;  %vm8764_vm6 = vmmov %vm8761_vm3  ;;  %v8765_v59 = vsel %vm4807_vm15, %v7001_v25, %v6990_v29  ;;  %v8789_v62 = vld [vmem:[#allocation86_spill] sm:$0xff] }
 0x24d   : > { %v1873_v63 = vsel %vm5139_vm12, %v7123_v12, %v7173_v31  ;;  %v1542_v19 = vsel %vm4761_vm9, %v1516_v42, %v8763_v14  ;;  %v1033_v14 = vsel %vm668_vm14, %v6884_v47, %v6903_v35  ;;  %v1152_v47 = vsel %vm584_vm0, %v7103_v27, %v7126_v23 }
 0x24f   : > { %v761_v61 = vpop.permute.xlu0 %760  ;;  %3791 = vmatmul.mubr.msk.bf16.vlgmr.msra.gmra.mxu1 %vm8758_vm5, %v7199_v34  ;;  %vm8775_vm5 = vcmask 1045504  }
 0x250   : > { %v780_v33 = vsel %vm584_vm0, %v6857_v7, %v761_v61  ;;  %3290 = vmatprep.mubr.bf16.mxu1 %v8685_v32  ;;  %v7215_v26 = vpop.permute.xlu1 %762 }
 0x251   : > { %v1596_v52 = vsel %vm8761_vm3, %v1541_v2, %v780_v33  ;;  %v781_v7 = vsel %vm584_vm0, %v761_v61, %v7215_v26  ;;  %vm8777_vm3 = vmmov %vm8775_vm5 }
 0x252   : > { %v1625_v11 = vsel %vm4780_vm10, %v1596_v52, %v850_v28  ;;  %v7226_v3 = vsel %vm8764_vm6, %v1542_v19, %v781_v7  ;;  %v8766_v28 = vrot.slane %v8378_v17, 5  ;;  %v1459_v19 = vsel %vm4735_vm4, %v8378_v17, %v599_v8  ;;  %v8769_v8 = vld [vmem:[#allocation36_spill] sm:$0xff] }
 0x253   : > { %v7228_v44 = vpop.permute.xlu0 %1012  ;;  %vm8778_vm6 = vcmask 1046528  }
 0x254   : > { %v1034_v22 = vsel %vm668_vm14, %v6903_v35, %v7228_v44  ;;  %v7239_v60 = vpop.permute.xlu1 %1014  ;;  %v7257_v52 = vsel %vm8757_vm8, %v1625_v11, %v8766_v28  ;;  %v8770_v28 = vld [vmem:[#allocation62_spill] sm:$0xff]  ;;  %vm8779_vm8 = vmmov %vm8778_vm6 }
 0x255   : > { %v1756_v56 = vsel %vm1694_vm11, %v8765_v59, %v1034_v22 }
 0x257   : > { %v2973_v38 = vpop.permute.xlu0 %2972 }
 0x258   : > { %v7241_v42 = vpop.permute.xlu1 %2974  ;;  %v2996_v45 = vsel %vm584_vm0, %v6941_v9, %v2973_v38 }
 0x259   : > { %v2997_v16 = vsel %vm584_vm0, %v2973_v38, %v7241_v42 }
 0x25a   : > { %3227 = vmatprep.subr.bf16.mxu0 %v2997_v16 }
 0x25b   : > { %v4033_v61 = vpop.permute.xlu0 %4032  ;;  %3228 = vmatpush1.bf16.msra.mxu0 %v2996_v45  ;;  %v1219_v45 = vsel %vm668_vm14, %v1195_v1, %v7190_v6 }
 0x25c   : > { %v4035_v33 = vunpack.i.h.bf16 %v4033_v61  ;;  %v4034_v4 = vunpack.i.l.bf16 %v4033_v61  ;;  %v7247_v53 = vpop.permute.xlu1 %4037 }
 0x25d   : > { %v4039_v2 = vunpack.i.l.bf16 %v7247_v53 }
 0x25e   : > { %v7250_v29 = vsel %vm584_vm0, %v4029_v49, %v4035_v33  ;;  %v600_v25 = vsel %vm584_vm0, %v4030_v57, %v4034_v4 }
 0x25f   : > { %v1294_v9 = vpop.permute.xlu0 %1293  ;;  %v1709_v7 = vsel %vm4807_vm15, %v7257_v52, %v7250_v29  ;;  %v851_v20 = vsel %vm668_vm14, %v4025_v39, %v4039_v2  ;;  %v8767_v39 = vld [vmem:[#allocation108_spill] sm:$0xff]  ;;  %v1035_v29 = vsel %vm668_vm14, %v7228_v44, %v7239_v60 }
 0x260   : > { %v1626_v49 = vsel %vm4780_vm10, %v7226_v3, %v851_v20  ;;  %v7267_v57 = vpop.permute.xlu1 %1295  ;;  %v8768_v59 = vsel %vm4807_vm15, %v6810_v0, %v8767_v39  ;;  %v1250_v20 = vrot.slane %v8770_v28, 2  ;;  %v1317_v39 = vsel %vm584_vm0, %v7039_v40, %v1294_v9 }
 0x261   : > { %v1752_v3 = vsel %vm1694_vm11, %v8768_v59, %v1033_v14  ;;  %v8771_v14 = vld [vmem:[#allocation37_spill] sm:$0xff]  ;;  %v1760_v44 = vsel %vm1694_vm11, %v1708_v18, %v1035_v29  ;;  %v1252_v18 = vrot.slane %v8789_v62, 2 }
 0x262   : > { %v1790_v4 = vsel %vm4828_vm2, %v1752_v3, %v8659_v10  ;;  %v1791_v54 = vsel %vm4828_vm2, %v1756_v56, %v8771_v14  ;;  %v1916_v56 = vsel %vm8775_vm5, %v1873_v63, %v1250_v20  ;;  %v8780_v14 = vrot.slane %v8769_v8, 5 }
 0x263   : > { %v665_v11 = vpop.permute.xlu0 %664  ;;  %vm8785_vm5 = vcmask 1041408  }
 0x264   : > { %v683_v22 = vsel %vm668_vm14, %v7082_v48, %v665_v11  ;;  %v667_v16 = vpop.permute.xlu1 %666  ;;  %v1460_v48 = vsel %vm4735_vm4, %v8769_v8, %v600_v25  ;;  %vm8772_vm4 = vcmask 1044480   ;;  %v8773_v25 = vld [vmem:[#allocation82_spill] sm:$0xff] }
 0x265   : > { %v1520_v38 = vsel %vm1442_vm1, %v1459_v19, %v683_v22  ;;  %v684_v35 = vsel %vm668_vm14, %v665_v11, %v667_v16  ;;  %v1836_v1 = vsel %vm8772_vm4, %v1790_v4, %v1152_v47  ;;  %v1251_v11 = vrot.slane %v8773_v25, 2  ;;  %v8776_v16 = vld [vmem:[#allocation26_spill] sm:$0xff] }
 0x266   : > { %v1524_v0 = vsel %vm1442_vm1, %v1460_v48, %v684_v35  ;;  %vm8774_vm1 = vmmov %vm8772_vm4  ;;  %v1874_v10 = vsel %vm5139_vm12, %v1836_v1, %v1219_v45  ;;  %v1419_v47 = vrot.slane %v8776_v16, 1  ;;  %v1957_v35 = vsel %vm5889_vm13, %v1916_v56, %v1317_v39  ;;  %v8783_v39 = vld [vmem:[#allocation49_spill] sm:$0xff] }
 0x267   : > { %v7294_v61 = vpop.permute.xlu0 %1131  ;;  %v1920_v40 = vsel %vm8777_vm3, %v1874_v10, %v1251_v11  ;;  %vm8781_vm4 = vcmask 1042432   ;;  %v4040_v1 = vunpack.i.h.bf16 %v7247_v53  ;;  %vm8788_vm3 = vmmov %vm8785_vm5  ;;  %v1792_v15 = vsel %vm4828_vm2, %v1760_v44, %v8776_v16 }
 0x268   : > { %v1153_v27 = vsel %vm584_vm0, %v7126_v23, %v7294_v61  ;;  %v7311_v22 = vpop.permute.xlu1 %1133  ;;  %v1318_v23 = vsel %vm584_vm0, %v1294_v9, %v7267_v57  ;;  %v1418_v9 = vrot.slane %v8674_v46, 1 }
 0x269   : > { %v7309_v19 = vsel %vm8774_vm1, %v1791_v54, %v1153_v27  ;;  %v1958_v45 = vsel %vm5889_vm13, %v1920_v40, %v1318_v23  ;;  %v7355_v54 = vsel %vm8781_vm4, %v1626_v49, %v8780_v14  ;;  %vm8782_vm1 = vcmask 261120  }
 0x26a   : > { %v8784_v23 = vrot.slane %v8783_v39, 7  ;;  %v7374_v53 = vsel %vm668_vm14, %v4039_v2, %v4040_v1  ;;  %vm8794_vm4 = vcmask 1046528  }
 0x26b   : > { %v1379_v59 = vpop.permute.xlu0 %1378 }
 0x26c   : > { %v1402_v3 = vsel %vm668_vm14, %v7150_v30, %v1379_v59  ;;  %v7331_v48 = vpop.permute.xlu1 %1380  ;;  %v1543_v49 = vsel %vm4761_vm9, %v1520_v38, %v8784_v23 }
 0x26d   : > { %v2000_v12 = vsel %vm8778_vm6, %v1957_v35, %v1402_v3  ;;  %v1403_v31 = vsel %vm668_vm14, %v1379_v59, %v7331_v48  ;;  %vm8792_vm6 = vcmask 1045504  }
 0x26e   : > { %v2004_v63 = vsel %vm8779_vm8, %v1958_v45, %v1403_v31  ;;  %v2041_v46 = vsel %vm5914_vm7, %v2000_v12, %v1418_v9  ;;  %vm8793_vm8 = vmmov %vm8792_vm6 }
 0x26f   : > { %v7339_v30 = vpop.permute.xlu0 %4042  ;;  %v2042_v28 = vsel %vm5914_vm7, %v2004_v63, %v1419_v47 }
 0x270   : > { %v4044_v4 = vunpack.i.l.bf16 %v7339_v30  ;;  %v1199_v20 = vpop.permute.xlu1 %1198  ;;  %3229 = vmatprep.subr.bf16.mxu0 %v2042_v28 }
 0x271   : > { %3230 = vmatpush1.bf16.msra.mxu0 %v2041_v46 }
 0x272   : > { %v7350_v27 = vsel %vm584_vm0, %v4035_v33, %v4044_v4 }
 0x273   : > { %v7358_v25 = vpop.permute.xlu0 %1200  ;;  %v1710_v11 = vsel %vm4807_vm15, %v7355_v54, %v7350_v27 }
 0x274   : > { %v765_v10 = vpop.permute.xlu1 %764  ;;  %3792 = vmatmul.mubr.msk.bf16.vlgmr.msra.gmra.mxu0 %vm8782_vm1, %v7199_v34  ;;  %vm8795_vm1 = vmmov %vm8794_vm4 }
 0x275   : > { %v782_v33 = vsel %vm584_vm0, %v7215_v26, %v765_v10  ;;  %3333 = vmatprep.mubr.bf16.mxu0 %v8685_v32 }
 0x276   : > { %v7377_v59 = vsel %vm8785_vm5, %v1543_v49, %v782_v33  ;;  %vm8796_vm5 = vcmask 261120  }
 0x277   : > { %v767_v56 = vpop.permute.xlu0 %766  ;;  %v1627_v3 = vsel %vm4780_vm10, %v7377_v59, %v7374_v53  ;;  %v8807_v59 = vrot.slane %v8392_v55, 5 }
 0x278   : > { %v1017_v26 = vpop.permute.xlu1 %1016  ;;  %v783_v45 = vsel %vm584_vm0, %v765_v10, %v767_v56  ;;  %v1221_v10 = vsel %vm668_vm14, %v1199_v20, %v7358_v25 }
 0x279   : > { %v1036_v47 = vsel %vm668_vm14, %v7239_v60, %v1017_v26 }
 0x27a   : > { %v7391_v2 = vsel %vm1694_vm11, %v1709_v7, %v1036_v47  ;;  %v8786_v7 = vld [vmem:[#allocation51_spill] sm:$0xff] }
 0x27b   : > { %v7393_v38 = vpop.permute.xlu0 %1018  ;;  %v8787_v63 = vrot.slane %v8786_v7, 7 }
 0x27c   : > { %v2977_v35 = vpop.permute.xlu1 %2976  ;;  %v1037_v62 = vsel %vm668_vm14, %v1017_v26, %v7393_v38 }
 0x27d   : > { %v2998_v12 = vsel %vm584_vm0, %v7241_v42, %v2977_v35  ;;  %v1544_v28 = vsel %vm4761_vm9, %v1524_v0, %v8787_v63  ;;  %v1154_v0 = vsel %vm584_vm0, %v7294_v61, %v7311_v22  ;;  %vm8790_vm9 = vcmask 1044480   ;;  %v8791_v61 = vld [vmem:[#allocation87_spill] sm:$0xff] }
 0x27e   : > { %v7410_v14 = vsel %vm8788_vm3, %v1544_v28, %v783_v45  ;;  %v1844_v39 = vsel %vm8790_vm9, %v1792_v15, %v1154_v0  ;;  %v1253_v49 = vrot.slane %v8791_v61, 2  ;;  %vm8798_vm3 = vmmov %vm8790_vm9 }
 0x27f   : > { %v2979_v40 = vpop.permute.xlu0 %2978  ;;  %vm8800_vm9 = vmmov %vm8798_vm3 }
 0x280   : > { %v2999_v9 = vsel %vm584_vm0, %v2977_v35, %v2979_v40  ;;  %v7399_v31 = vpop.permute.xlu1 %4047 }
 0x281   : > { %3270 = vmatprep.subr.bf16.mxu1 %v2999_v9  ;;  %v4049_v52 = vunpack.i.l.bf16 %v7399_v31 }
 0x282   : > { %3271 = vmatpush1.bf16.msra.mxu1 %v2998_v12 }
 0x283   : > { %v1298_v46 = vpop.permute.xlu0 %1297  ;;  %v7413_v42 = vsel %vm668_vm14, %v4040_v1, %v4049_v52  ;;  %v1220_v1 = vsel %vm668_vm14, %v7190_v6, %v1199_v20  ;;  %v1876_v6 = vsel %vm5139_vm12, %v1844_v39, %v1221_v10  ;;  %v1420_v52 = vrot.slane %v8720_v21, 1 }
 0x284   : > { %v1300_v60 = vpop.permute.xlu1 %1299  ;;  %v1628_v50 = vsel %vm4780_vm10, %v7410_v14, %v7413_v42  ;;  %v1875_v23 = vsel %vm5139_vm12, %v7309_v19, %v1220_v1  ;;  %v1319_v20 = vsel %vm584_vm0, %v7267_v57, %v1298_v46  ;;  %v1421_v19 = vrot.slane %v8741_v41, 1 }
 0x285   : > { %v1320_v16 = vsel %vm584_vm0, %v1298_v46, %v1300_v60  ;;  %v1924_v35 = vsel %vm8792_vm6, %v1875_v23, %v1252_v18  ;;  %v1928_v12 = vsel %vm8793_vm8, %v1876_v6, %v1253_v49  ;;  %v8797_v6 = vld [vmem:[#allocation47_spill] sm:$0xff]  ;;  %vm8802_vm8 = vmmov %vm8792_vm6  ;;  %vm8811_vm10 = vcmask 1044480  }
 0x286   : > { %v1959_v45 = vsel %vm5889_vm13, %v1924_v35, %v1319_v20  ;;  %v1960_v57 = vsel %vm5889_vm13, %v1928_v12, %v1320_v16  ;;  %v1793_v20 = vsel %vm4828_vm2, %v7391_v2, %v8797_v6  ;;  %v8799_v16 = vld [vmem:[#allocation97_spill] sm:$0xff]  ;;  %v8801_v35 = vld [vmem:[#allocation16_spill] sm:$0xff] }
 0x287   : > { %v1136_v33 = vpop.permute.xlu0 %1135 }
 0x288   : > { %v7441_v56 = vpop.permute.xlu1 %1137  ;;  %v1155_v61 = vsel %vm584_vm0, %v7311_v22, %v1136_v33 }
 0x289   : > { %v1156_v26 = vsel %vm584_vm0, %v1136_v33, %v7441_v56  ;;  %v1254_v33 = vrot.slane %v8799_v16, 2 }
 0x28b   : > { %v1383_v47 = vpop.permute.xlu0 %1382 }
 0x28c   : > { %v1404_v9 = vsel %vm668_vm14, %v7331_v48, %v1383_v47  ;;  %v1385_v29 = vpop.permute.xlu1 %1384 }
 0x28d   : > { %v2008_v7 = vsel %vm8794_vm4, %v1959_v45, %v1404_v9  ;;  %v1405_v63 = vsel %vm668_vm14, %v1383_v47, %v1385_v29  ;;  %v1255_v9 = vrot.slane %v8801_v35, 2  ;;  %vm8803_vm4 = vmmov %vm8795_vm1 }
 0x28e   : > { %v2012_v48 = vsel %vm8795_vm1, %v1960_v57, %v1405_v63  ;;  %v2043_v0 = vsel %vm5914_vm7, %v2008_v7, %v1420_v52  ;;  %v1423_v7 = vrot.slane %v8769_v8, 1 }
 0x28f   : > { %v939_v28 = vpop.permute.xlu0 %938  ;;  %v2044_v46 = vsel %vm5914_vm7, %v2012_v48, %v1421_v19 }
 0x290   : > { %v1203_v44 = vpop.permute.xlu1 %1202  ;;  %3272 = vmatprep.subr.bf16.mxu1 %v2044_v46 }
 0x291   : > { %3273 = vmatpush1.bf16.msra.mxu1 %v2043_v0 }
 0x293   : > { %v7465_v21 = vpop.permute.xlu0 %1204 }
 0x294   : > { %v1021_v1 = vpop.permute.xlu1 %1020  ;;  %3793 = vmatmul.mubr.msk.bf16.vlgmr.msra.gmra.mxu1 %vm8796_vm5, %v7199_v34  ;;  %v1223_v27 = vsel %vm668_vm14, %v1203_v44, %v7465_v21  ;;  %vm8806_vm5 = vcmask 1042432  }
 0x295   : > { %3376 = vmatprep.mubr.bf16.mxu1 %v8685_v32  ;;  %v1768_v32 = vsel %vm1694_vm11, %v1710_v11, %v1037_v62  ;;  %v1848_v11 = vsel %vm8798_vm3, %v1793_v20, %v1155_v61  ;;  %vm8808_vm3 = vmmov %vm8806_vm5 }
 0x296   : > { %v1794_v22 = vsel %vm4828_vm2, %v1768_v32, %v8741_v41 }
 0x297   : > { %v2981_v10 = vpop.permute.xlu0 %2980  ;;  %v1852_v47 = vsel %vm8800_vm9, %v1794_v22, %v1156_v26  ;;  %vm8809_vm9 = vcmask 261120  }
 0x298   : > { %v7470_v15 = vpop.permute.xlu1 %2982  ;;  %v3000_v39 = vsel %vm584_vm0, %v2979_v40, %v2981_v10  ;;  %v1222_v40 = vsel %vm668_vm14, %v7358_v25, %v1203_v44  ;;  %v1878_v19 = vsel %vm5139_vm12, %v1852_v47, %v1223_v27  ;;  %v1422_v44 = vrot.slane %v8378_v17, 1 }
 0x299   : > { %v3001_v18 = vsel %vm584_vm0, %v2981_v10, %v7470_v15  ;;  %v1877_v25 = vsel %vm5139_vm12, %v1848_v11, %v1222_v40  ;;  %v1936_v48 = vsel %vm8802_vm8, %v1878_v19, %v1255_v9  ;;  %v1038_v40 = vsel %vm668_vm14, %v7393_v38, %v1021_v1 }
 0x29a   : > { %3313 = vmatprep.subr.bf16.mxu0 %v3001_v18  ;;  %v1932_v41 = vsel %vm8792_vm6, %v1877_v25, %v1254_v33  ;;  %v1257_v9 = vrot.slane %v8687_v36, 2  ;;  %vm3613_vm8 = vcmask 15360  }
 0x29b   : > { %v1302_v23 = vpop.permute.xlu0 %1301  ;;  %3314 = vmatpush1.bf16.msra.mxu0 %v3000_v39  ;;  %v4050_v39 = vunpack.i.h.bf16 %v7399_v31 }
 0x29c   : > { %v7485_v49 = vpop.permute.xlu1 %1303  ;;  %v1321_v45 = vsel %vm584_vm0, %v1300_v60, %v1302_v23  ;;  %v4045_v60 = vunpack.i.h.bf16 %v7339_v30 }
 0x29d   : > { %v1322_v12 = vsel %vm584_vm0, %v1302_v23, %v7485_v49  ;;  %v1961_v63 = vsel %vm5889_vm13, %v1932_v41, %v1321_v45  ;;  %v8804_v23 = vld [vmem:[#allocation42_spill] sm:$0xff]  ;;  %v1039_v53 = vsel %vm668_vm14, %v1021_v1, %v4050_v39 }
 0x29e   : > { %v1962_v0 = vsel %vm5889_vm13, %v1936_v48, %v1322_v12  ;;  %v8805_v32 = vrot.slane %v8804_v23, 5  ;;  %v955_v26 = vsel %vm584_vm0, %v4045_v60, %v939_v28  ;;  %v954_v20 = vsel %vm584_vm0, %v4044_v4, %v4045_v60  ;;  %v3077_v60 = vpop.f32.mrf.mxu0  ;;  %v8821_v39 = vld [vmem:[#allocation6_spill] sm:$0xff] }
 0x29f   : > { %v1140_v54 = vpop.permute.xlu0 %1139  ;;  %v3441_v23 = vsub.s32 0, %v8821_v39 }
 0x2a0   : > { %v1142_v2 = vpop.permute.xlu1 %1141  ;;  %v1688_v17 = vsel %vm8806_vm5, %v1627_v3, %v8805_v32  ;;  %v1692_v3 = vsel %vm8808_vm3, %v1628_v50, %v8807_v59  ;;  %v1157_v27 = vsel %vm584_vm0, %v7441_v56, %v1140_v54  ;;  %v3079_v24 = vpop.f32.mrf.mxu0  ;;  %v3445_v32 = vsub.s32 1, %v8821_v39 }
 0x2a1   : > { %v1711_v38 = vsel %vm4807_vm15, %v1688_v17, %v954_v20  ;;  %v1712_v30 = vsel %vm4807_vm15, %v1692_v3, %v955_v26  ;;  %v1158_v14 = vsel %vm584_vm0, %v1140_v54, %v1142_v2  ;;  %vm8814_vm15 = vmmov %vm8792_vm6  ;;  %v3449_v3 = vsub.s32 2, %v8821_v39 }
 0x2a2   : > { %v1772_v4 = vsel %vm1694_vm11, %v1711_v38, %v1038_v40  ;;  %v1776_v1 = vsel %vm1694_vm11, %v1712_v30, %v1039_v53  ;;  %vm8813_vm11 = vmmov %vm8811_vm10 }
 0x2a3   : > { %v1387_v52 = vpop.permute.xlu0 %1386  ;;  %v1795_v11 = vsel %vm4828_vm2, %v1772_v4, %v8810_v43  ;;  %v1796_v54 = vsel %vm4828_vm2, %v1776_v1, %v8769_v8  ;;  %vm8815_vm2 = vmmov %vm8792_vm6  ;;  %v3453_v4 = vsub.s32 3, %v8821_v39 }
 0x2a4   : > { %v1406_v57 = vsel %vm668_vm14, %v1385_v29, %v1387_v52  ;;  %v1389_v46 = vpop.permute.xlu1 %1388  ;;  %v1856_v33 = vsel %vm8811_vm10, %v1795_v11, %v1157_v27  ;;  %v1860_v25 = vsel %vm8813_vm11, %v1796_v54, %v1158_v14  ;;  %vm8819_vm6 = vmmov %vm8809_vm9 }
 0x2a5   : > { %v2016_v10 = vsel %vm8803_vm4, %v1961_v63, %v1406_v57  ;;  %v1407_v62 = vsel %vm668_vm14, %v1387_v52, %v1389_v46  ;;  %v1425_v52 = vrot.slane %v8392_v55, 1 }
 0x2a6   : > { %v2020_v18 = vsel %vm8795_vm1, %v1962_v0, %v1407_v62  ;;  %v2045_v31 = vsel %vm5914_vm7, %v2016_v10, %v1422_v44  ;;  %v8820_v0 = vlaneseq  ;;  %v3081_v62 = vpop.f32.mrf.mxu0 }
 0x2a7   : > { %v1207_v29 = vpop.permute.xlu0 %1206  ;;  %v2046_v61 = vsel %vm5914_vm7, %v2020_v18, %v1423_v7  ;;  %v1424_v7 = vrot.slane %v8816_v51, 1 }
 0x2a8   : > { %v1209_v6 = vpop.permute.xlu1 %1208  ;;  %3315 = vmatprep.subr.bf16.mxu0 %v2046_v61  ;;  %v1224_v42 = vsel %vm668_vm14, %v7465_v21, %v1207_v29  ;;  %v8812_v21 = vld [vmem:[#allocation128_spill] sm:$0xff]  ;;  %v3423_v10 = vand.u32 127, %v8820_v0  ;;  %v3083_v26 = vpop.f32.mrf.mxu0 }
 0x2a9   : > { %3316 = vmatpush1.bf16.msra.mxu0 %v2045_v31  ;;  %v1225_v22 = vsel %vm668_vm14, %v1207_v29, %v1209_v6  ;;  %v1256_v47 = vrot.slane %v8812_v21, 2  ;;  %v1879_v35 = vsel %vm5139_vm12, %v1856_v33, %v1224_v42 }
 0x2ab   : > { %v2985_v28 = vpop.permute.xlu0 %2984  ;;  %v1940_v45 = vsel %vm8814_vm15, %v1879_v35, %v1256_v47 }
 0x2ac   : > { %v2987_v58 = vpop.permute.xlu1 %2986  ;;  %3794 = vmatmul.mubr.msk.bf16.vlgmr.msra.gmra.mxu0 %vm8809_vm9, %v7199_v34  ;;  %v3002_v56 = vsel %vm584_vm0, %v7470_v15, %v2985_v28  ;;  %v1880_v15 = vsel %vm5139_vm12, %v1860_v25, %v1225_v22  ;;  %vm8817_vm12 = vmmov %vm8795_vm1 }
 0x2ad   : > { %v3003_v50 = vsel %vm584_vm0, %v2985_v28, %v2987_v58  ;;  %v1944_v36 = vsel %vm8815_vm2, %v1880_v15, %v1257_v9  ;;  %v3457_v15 = vsub.s32 4, %v8821_v39 }
 0x2ae   : > { %3356 = vmatprep.subr.bf16.mxu1 %v3003_v50 }
 0x2af   : > { %v1306_v16 = vpop.permute.xlu0 %1305  ;;  %3357 = vmatpush1.bf16.msra.mxu1 %v3002_v56 }
 0x2b0   : > { %v1308_v2 = vpop.permute.xlu1 %1307  ;;  %v1323_v19 = vsel %vm584_vm0, %v7485_v49, %v1306_v16 }
 0x2b1   : > { %v1324_v37 = vsel %vm584_vm0, %v1306_v16, %v1308_v2  ;;  %v1963_v41 = vsel %vm5889_vm13, %v1940_v45, %v1323_v19  ;;  %vm8818_vm0 = vmmov %vm8795_vm1  ;;  %vm3664_vm1 = vcmask 0  }
 0x2b2   : > { %v1964_v49 = vsel %vm5889_vm13, %v1944_v36, %v1324_v37  ;;  %vm3430_vm13 = vcmp.lt.s32.totalorder %v3423_v10, 16 }
 0x2b3   : > { %v1391_v8 = vpop.permute.xlu0 %1390  ;;  %v7610_v13 = vsel %vm3430_vm13, 1.0, %v4113_v5 }
 0x2b4   : > { %v1408_v12 = vsel %vm668_vm14, %v1389_v46, %v1391_v8  ;;  %v1393_v57 = vpop.permute.xlu1 %1392  ;;  %v7617_v6 = vrot.slane %v7610_v13, %v3441_v23  ;;  %v7620_v31 = vrot.slane %v7610_v13, %v3445_v32  ;;  %v7631_v50 = vrot.slane %v7610_v13, %v3449_v3 }
 0x2b5   : > { %v2024_v63 = vsel %vm8817_vm12, %v1963_v41, %v1408_v12  ;;  %v1409_v48 = vsel %vm668_vm14, %v1391_v8, %v1393_v57  ;;  %v7637_v54 = vrot.slane %v7610_v13, %v3453_v4  ;;  %v3461_v8 = vsub.s32 5, %v8821_v39 }
 0x2b6   : > { %v2028_v44 = vsel %vm8818_vm0, %v1964_v49, %v1409_v48  ;;  %v2047_v46 = vsel %vm5914_vm7, %v2024_v63, %v1424_v7  ;;  %v7647_v51 = vrot.slane %v7610_v13, %v3457_v15  ;;  %v3465_v23 = vsub.s32 6, %v8821_v39 }
 0x2b7   : > { %v2048_v55 = vsel %vm5914_vm7, %v2028_v44, %v1425_v52  ;;  %v3120_v18 = vpop.f32.mrf.mxu1  ;;  %vm8822_vm7 = vcmask 7168  }
 0x2b8   : > { %3358 = vmatprep.subr.bf16.mxu1 %v2048_v55  ;;  %v7663_v3 = vrot.slane %v7610_v13, %v3465_v23  ;;  %vm8823_vm14 = vmmov %vm8822_vm7 }
 0x2b9   : > { %3359 = vmatpush1.bf16.msra.mxu1 %v2047_v46  ;;  %v3122_v40 = vpop.f32.mrf.mxu1 }
 0x2bb   : > { %v3124_v28 = vpop.f32.mrf.mxu1 }
 0x2bc   : > { %3795 = vmatmul.mubr.msk.bf16.vlgmr.msra.gmra.mxu1 %vm8819_vm6, %v7199_v34  ;;  %v7605_v29 = vpop.permute.xlu0 %3026 }
 0x2bd   : > { %v3078_v17 = vadd.f32 %v3077_v60, %v7605_v29  ;;  %v3080_v34 = vadd.f32 %v3079_v24, %v7605_v29  ;;  %v3121_v38 = vadd.f32 %v3120_v18, %v7605_v29  ;;  %v3123_v43 = vadd.f32 %v3122_v40, %v7605_v29  ;;  %v3126_v22 = vpop.f32.mrf.mxu1 }
 0x2be   : > { %v7653_v60 = vrot.slane %v7610_v13, %v3461_v8 }
 0x2bf   : > { %v7614_v61 = vpop.permute.xlu1 %3031  ;;  %v3387_v5 = vmax.f32 %v3078_v17, 0.0  ;;  %v3388_v59 = vmax.f32 %v3080_v34, 0.0  ;;  %v3389_v11 = vmax.f32 %v3121_v38, 0.0  ;;  %v3390_v25 = vmax.f32 %v3123_v43, 0.0 }
 0x2c0   : > { %v3082_v20 = vadd.f32 %v3081_v62, %v7614_v61  ;;  %v3084_v53 = vadd.f32 %v3083_v26, %v7614_v61  ;;  %v3125_v42 = vadd.f32 %v3124_v28, %v7614_v61  ;;  %v3127_v9 = vadd.f32 %v3126_v22, %v7614_v61 }
 0x2c1   : > { %v3519_v58 = vmul.f32 %v7617_v6, %v3387_v5  ;;  %v3520_v14 = vmul.f32 %v7620_v31, %v3388_v59  ;;  %v3521_v35 = vmul.f32 %v7631_v50, %v3389_v11  ;;  %v3522_v52 = vmul.f32 %v7637_v54, %v3390_v25 }
 0x2c2   : > { %v3403_v1 = vmax.f32 %v3082_v20, 0.0  ;;  %v3404_v27 = vmax.f32 %v3084_v53, 0.0  ;;  %v3405_v47 = vmax.f32 %v3125_v42, 0.0  ;;  %v3406_v36 = vmax.f32 %v3127_v9, 0.0 }
 0x2c3   : > { %v3553_v21 = vadd.f32 %v3520_v14, %v3519_v58  ;;  %v3469_v34 = vsub.s32 7, %v8821_v39 }
 0x2c4   : > { %v3535_v16 = vmul.f32 %v7617_v6, %v3403_v1  ;;  %v3536_v33 = vmul.f32 %v7620_v31, %v3404_v27  ;;  %v3537_v12 = vmul.f32 %v7631_v50, %v3405_v47  ;;  %v3538_v46 = vmul.f32 %v7637_v54, %v3406_v36 }
 0x2c5   : > { %v3554_v41 = vadd.f32 %v3553_v21, %v3521_v35  ;;  %v7669_v58 = vrot.slane %v7610_v13, %v3469_v34 }
 0x2c6   : > { %v3570_v37 = vadd.f32 %v3536_v33, %v3535_v16 }
 0x2c7   : > { %v3555_v55 = vadd.f32 %v3554_v41, %v3522_v52 }
 0x2c8   : > { %v3571_v44 = vadd.f32 %v3570_v37, %v3537_v12 }
 0x2ca   : > { %v3572_v17 = vadd.f32 %v3571_v44, %v3538_v46 }
 0x2e5   : > { %v3163_v30 = vpop.f32.mrf.mxu0 }
 0x2e6   : > { %v3164_v2 = vadd.f32 %v3163_v30, %v7605_v29 }
 0x2e7   : > { %v3165_v56 = vpop.f32.mrf.mxu0 }
 0x2e8   : > { %v3391_v57 = vmax.f32 %v3164_v2, 0.0  ;;  %v3166_v7 = vadd.f32 %v3165_v56, %v7605_v29 }
 0x2e9   : > { %v3167_v19 = vpop.f32.mrf.mxu0 }
 0x2ea   : > { %v3168_v49 = vadd.f32 %v3167_v19, %v7614_v61  ;;  %v3523_v24 = vmul.f32 %v7647_v51, %v3391_v57  ;;  %v3392_v0 = vmax.f32 %v3166_v7, 0.0 }
 0x2eb   : > { %v3169_v63 = vpop.f32.mrf.mxu0 }
 0x2ec   : > { %v3407_v10 = vmax.f32 %v3168_v49, 0.0  ;;  %v3170_v62 = vadd.f32 %v3169_v63, %v7614_v61  ;;  %v3556_v40 = vadd.f32 %v3555_v55, %v3523_v24  ;;  %v3524_v20 = vmul.f32 %v7653_v60, %v3392_v0 }
 0x2ee   : > { %v3539_v53 = vmul.f32 %v7647_v51, %v3407_v10  ;;  %v3408_v5 = vmax.f32 %v3170_v62, 0.0  ;;  %v3557_v1 = vadd.f32 %v3556_v40, %v3524_v20 }
 0x2f0   : > { %v3573_v27 = vadd.f32 %v3572_v17, %v3539_v53  ;;  %v3540_v39 = vmul.f32 %v7653_v60, %v3408_v5 }
 0x2f2   : > { %v3574_v16 = vadd.f32 %v3573_v27, %v3540_v39 }
 0x30f   : > { %v3206_v45 = vpop.f32.mrf.mxu1 }
 0x310   : > { %v3207_v18 = vadd.f32 %v3206_v45, %v7605_v29 }
 0x311   : > { %v3208_v48 = vpop.f32.mrf.mxu1 }
 0x312   : > { %v3393_v59 = vmax.f32 %v3207_v18, 0.0  ;;  %v3209_v38 = vadd.f32 %v3208_v48, %v7605_v29 }
 0x313   : > { %v3210_v32 = vpop.f32.mrf.mxu1 }
 0x314   : > { %v3211_v28 = vadd.f32 %v3210_v32, %v7614_v61  ;;  %v3525_v14 = vmul.f32 %v7663_v3, %v3393_v59  ;;  %v3394_v42 = vmax.f32 %v3209_v38, 0.0 }
 0x315   : > { %v3212_v30 = vpop.f32.mrf.mxu1 }
 0x316   : > { %v3409_v43 = vmax.f32 %v3211_v28, 0.0  ;;  %v3213_v11 = vadd.f32 %v3212_v30, %v7614_v61  ;;  %v3558_v21 = vadd.f32 %v3557_v1, %v3525_v14  ;;  %v3526_v47 = vmul.f32 %v7669_v58, %v3394_v42 }
 0x318   : > { %v3541_v25 = vmul.f32 %v7663_v3, %v3409_v43  ;;  %v3410_v35 = vmax.f32 %v3213_v11, 0.0  ;;  %v3559_v37 = vadd.f32 %v3558_v21, %v3526_v47 }
 0x31a   : > { %v3575_v8 = vadd.f32 %v3574_v16, %v3541_v25  ;;  %v3542_v45 = vmul.f32 %v7669_v58, %v3410_v35 }
 0x31c   : > { %v3576_v49 = vadd.f32 %v3575_v8, %v3542_v45 }
 0x334   : > { %v3249_v26 = vpop.f32.mrf.mxu0 }
 0x335   : > { %v3250_v22 = vadd.f32 %v3249_v26, %v7605_v29 }
 0x336   : > { %v3251_v4 = vpop.f32.mrf.mxu0 }
 0x337   : > { %v3395_v9 = vmax.f32 %v3250_v22, 0.0  ;;  %v3252_v13 = vadd.f32 %v3251_v4, %v7605_v29 }
 0x338   : > { %v3253_v56 = vpop.f32.mrf.mxu0 }
 0x339   : > { %v3254_v2 = vadd.f32 %v3253_v56, %v7614_v61  ;;  %v3527_v12 = vmul.f32 %v7617_v6, %v3395_v9  ;;  %v3396_v52 = vmax.f32 %v3252_v13, 0.0 }
 0x33a   : > { %v3255_v15 = vpop.f32.mrf.mxu0 }
 0x33b   : > { %v3411_v41 = vmax.f32 %v3254_v2, 0.0  ;;  %v3256_v36 = vadd.f32 %v3255_v15, %v7614_v61  ;;  %v3560_v48 = vadd.f32 %v3559_v37, %v3527_v12  ;;  %v3528_v44 = vmul.f32 %v7620_v31, %v3396_v52 }
 0x33d   : > { %v3543_v55 = vmul.f32 %v7617_v6, %v3411_v41  ;;  %v3412_v46 = vmax.f32 %v3256_v36, 0.0  ;;  %v3561_v32 = vadd.f32 %v3560_v48, %v3528_v44 }
 0x33f   : > { %v3577_v17 = vadd.f32 %v3576_v49, %v3543_v55  ;;  %v3544_v34 = vmul.f32 %v7620_v31, %v3412_v46  ;;  %v3551_v55 = vld [vmem:[#allocation2] sm:$0xff] }
 0x341   : > { %v3578_v28 = vadd.f32 %v3577_v17, %v3544_v34  ;;  %v3600_v17 = vld [vmem:[%s7749_s5 + $0x8] sm:$0xff] }
 0x354   : > { %v3292_v33 = vpop.f32.mrf.mxu1 }
 0x355   : > { %v3293_v57 = vadd.f32 %v3292_v33, %v7605_v29 }
 0x356   : > { %v3294_v19 = vpop.f32.mrf.mxu1 }
 0x357   : > { %v3397_v24 = vmax.f32 %v3293_v57, 0.0  ;;  %v3295_v0 = vadd.f32 %v3294_v19, %v7605_v29 }
 0x358   : > { %v3296_v7 = vpop.f32.mrf.mxu1 }
 0x359   : > { %v3297_v10 = vadd.f32 %v3296_v7, %v7614_v61  ;;  %v3529_v40 = vmul.f32 %v7631_v50, %v3397_v24  ;;  %v3398_v20 = vmax.f32 %v3295_v0, 0.0  ;;  %v3552_v0 = vld [vmem:[#allocation2 + $0x8] sm:$0xff] }
 0x35a   : > { %v3298_v18 = vpop.f32.mrf.mxu1 }
 0x35b   : > { %v3413_v53 = vmax.f32 %v3297_v10, 0.0  ;;  %v3299_v6 = vadd.f32 %v3298_v18, %v7614_v61  ;;  %v3562_v30 = vadd.f32 %v3561_v32, %v3529_v40  ;;  %v3530_v4 = vmul.f32 %v7637_v54, %v3398_v20 }
 0x35d   : > { %v3545_v1 = vmul.f32 %v7631_v50, %v3413_v53  ;;  %v3414_v27 = vmax.f32 %v3299_v6, 0.0  ;;  %v3563_v11 = vadd.f32 %v3562_v30, %v3530_v4  ;;  %v3623_v4 = vld [vmem:[%s7750_s6] sm:$0x1] }
 0x35f   : > { %v3579_v22 = vadd.f32 %v3578_v28, %v3545_v1  ;;  %v3546_v56 = vmul.f32 %v7637_v54, %v3414_v27 }
 0x361   : > { %v3580_v35 = vadd.f32 %v3579_v22, %v3546_v56 }
 0x36c   : > { %v3335_v63 = vpop.f32.mrf.mxu0 }
 0x36d   : > { %v3336_v23 = vadd.f32 %v3335_v63, %v7605_v29 }
 0x36e   : > { %v3337_v62 = vpop.f32.mrf.mxu0 }
 0x36f   : > { %v3399_v5 = vmax.f32 %v3336_v23, 0.0  ;;  %v3338_v59 = vadd.f32 %v3337_v62, %v7605_v29 }
 0x370   : > { %v3339_v26 = vpop.f32.mrf.mxu0 }
 0x371   : > { %v3340_v38 = vadd.f32 %v3339_v26, %v7614_v61  ;;  %v3531_v39 = vmul.f32 %v7647_v51, %v3399_v5  ;;  %v3400_v14 = vmax.f32 %v3338_v59, 0.0 }
 0x372   : > { %v3341_v31 = vpop.f32.mrf.mxu0 }
 0x373   : > { %v3415_v42 = vmax.f32 %v3340_v38, 0.0  ;;  %v3342_v43 = vadd.f32 %v3341_v31, %v7614_v61  ;;  %v3564_v16 = vadd.f32 %v3563_v11, %v3531_v39  ;;  %v3532_v33 = vmul.f32 %v7653_v60, %v3400_v14 }
 0x375   : > { %v3547_v21 = vmul.f32 %v7647_v51, %v3415_v42  ;;  %v3416_v25 = vmax.f32 %v3342_v43, 0.0  ;;  %v3565_v15 = vadd.f32 %v3564_v16, %v3532_v33  ;;  %v3648_v16 = vstv %s3647_s24 }
 0x376   : > { %vm3649_vm4 = vcmp.eq.s32.totalorder %v3648_v16, 1 }
 0x377   : > { %v3581_v19 = vadd.f32 %v3580_v35, %v3547_v21  ;;  %v3548_v8 = vmul.f32 %v7653_v60, %v3416_v25 }
 0x379   : > { %v3582_v7 = vadd.f32 %v3581_v19, %v3548_v8 }
 0x37c   : > { %v3378_v47 = vpop.f32.mrf.mxu1 }
 0x37d   : > { %v3379_v50 = vadd.f32 %v3378_v47, %v7605_v29 }
 0x37e   : > { %v3380_v9 = vpop.f32.mrf.mxu1 }
 0x37f   : > { %v3401_v13 = vmax.f32 %v3379_v50, 0.0  ;;  %v3381_v2 = vadd.f32 %v3380_v9, %v7605_v29 }
 0x380   : > { %v3382_v37 = vpop.f32.mrf.mxu1 }
 0x381   : > { %v3533_v54 = vmul.f32 %v7663_v3, %v3401_v13  ;;  %v3402_v45 = vmax.f32 %v3381_v2, 0.0  ;;  %v3383_v12 = vadd.f32 %v3382_v37, %v7614_v61 }
 0x382   : > { %v3384_v51 = vpop.f32.mrf.mxu1 }
 0x383   : > { %v3566_v52 = vadd.f32 %v3565_v15, %v3533_v54  ;;  %v3534_v41 = vmul.f32 %v7669_v58, %v3402_v45  ;;  %v3417_v36 = vmax.f32 %v3383_v12, 0.0  ;;  %v3385_v57 = vadd.f32 %v3384_v51, %v7614_v61 }
 0x385   : > { %v3549_v29 = vmul.f32 %v7663_v3, %v3417_v36  ;;  %v3418_v49 = vmax.f32 %v3385_v57, 0.0  ;;  %v3567_v63 = vadd.f32 %v3566_v52, %v3534_v41 }
 0x387   : > { %v3583_v48 = vadd.f32 %v3582_v7, %v3549_v29  ;;  %v3550_v60 = vmul.f32 %v7669_v58, %v3418_v49  ;;  %3568 = vadd.xlane.f32.xlu1 %v3567_v63  ;;  %v3599_v58 = vld [vmem:[%s7749_s5] sm:$0xff] }
 0x389   : > { %v3584_v44 = vadd.f32 %v3583_v48, %v3550_v60 }
 0x38b   : > { %3585 = vadd.xlane.f32.xlu0 %v3584_v44 }
 0x410   : > { %v3569_v46 = vpop.xlane.xlu1 %3568 }
 0x411   : > { %v3587_v24 = vadd.f32 %v3569_v46, %v3551_v55 }
 0x413   : > { %3590 = vst.msk [vmem:[#allocation2] sm:$0xff] %vm8822_vm7, %v3587_v24 }
 0x414   : > { %v3586_v10 = vpop.xlane.xlu0 %3585 }
 0x415   : > { %v3588_v62 = vadd.f32 %v3586_v10, %v3552_v0 }
 0x417   : > { %3591 = vst.msk [vmem:[#allocation2 + $0x8] sm:$0xff] %vm8823_vm14, %v3588_v62 }
 0x41a   : > { %v3595_v61 = vld [vmem:[#allocation2] sm:$0xff] }
 0x41b   : > { %v3597_v3 = vmul.f32 0.00390625, %v3595_v61 }
 0x41d   : > { %3603 = vperm.xlu0 %4051, %v3597_v3  }
 0x41e   : > { %v3596_v18 = vld [vmem:[#allocation2 + $0x8] sm:$0xff] }
 0x41f   : > { %v3598_v23 = vmul.f32 0.00390625, %v3596_v18 }
 0x421   : > { %3608 = vperm.xlu1 %4052, %v3598_v23  }
 0x498   : > { %v3604_v32 = vpop.permute.xlu0 %3603 }
 0x499   : > { %v3611_v34 = vmul.f32 %v3604_v32, %v3599_v58 }
 0x49b   : > { %v3614_v20 = vsel %vm3613_vm8, %v3611_v34, 0.0 }
 0x49c   : > { %v3609_v26 = vpop.permute.xlu1 %3608 }
 0x49d   : > { %v3612_v40 = vmul.f32 %v3609_v26, %v3600_v17 }
 0x49f   : > { %v3615_v53 = vsel %vm3613_vm8, %v3612_v40, 0.0 }
 0x4a0   : > { %v3616_v6 = vadd.f32 %v3615_v53, %v3614_v20 }
 0x4a2   : > { %v3617_v5 = vrot.slane %v3616_v6, 4 }
 0x4a4   : > { %v3618_v59 = vadd.f32 %v3617_v5, %v3616_v6 }
 0x4a6   : > { %v3619_v38 = vrot.slane %v3618_v59, 2 }
 0x4a8   : > { %v3620_v28 = vadd.f32 %v3619_v38, %v3618_v59 }
 0x4aa   : > { %v3621_v30 = vrot.slane %v3620_v28, 1 }
 0x4ac   : > { %v3622_v1 = vadd.f32 %v3621_v30, %v3620_v28 }
 0x4ae   : > { %v3624_v27 = vadd.f32 %v3623_v4, %v3622_v1 }
 0x4b0   : > { %3626 = vrot.lane.b32.xlu1 %v3624_v27, %s4109_s18 }
 0x522   : > { %v3627_v31 = vpop.permute.xlu1 %3626 }
 0x523   : > { %v3629_v39 = vmax.f32 %v3624_v27, %v3627_v31 }
 0x525   : > { %3634 = vrot.lane.b32.xlu0 %v3629_v39, %s4110_s19  ;;  %v3630_v22 = vsub.f32 %v3624_v27, %v3629_v39 }
 0x527   : > { %v3631_v56 = vmul.f32 1.442695, %v3630_v22 }
 0x597   : > { %v3635_v14 = vpop.permute.xlu0 %3634 }
 0x598   : > { %v3637_v42 = vsub.f32 %v3624_v27, %v3635_v14 }
 0x59a   : > { %v3638_v43 = vmul.f32 1.442695, %v3637_v42 }
 0x59c   : > { %4058 = vpow2.f32 %v3638_v43 }
 0x59d   : > { %4060 = vpow2.f32 %v3631_v56 }
 0x5a9   : > { %v4059_v11 = vpop.eup %4058 }
 0x5aa   : > { %3641 = vrot.lane.b32.xlu1 %v4059_v11, %s4109_s18  ;;  %v4061_v33 = vpop.eup %4060 }
 0x5ae   : > { %3650 = vrot.lane.b32.xlu1 %v3624_v27, %s4110_s19 }
 0x61c   : > { %v3642_v21 = vpop.permute.xlu1 %3641 }
 0x61d   : > { %v3644_v47 = vadd.f32 %v4061_v33, %v3642_v21 }
 0x61f   : > { %3655 = vrot.lane.b32.xlu0 %v3644_v47, %s4110_s19  ;;  %4062 = vlog2.f32 %v3644_v47 }
 0x620   : > { %v3651_v25 = vpop.permute.xlu1 %3650 }
 0x621   : > { %v3653_v50 = vsel %vm3649_vm4, %v3624_v27, %v3651_v25 }
 0x623   : > { %3670 = vrot.lane.b32.xlu0 %v3653_v50, %s4109_s18 }
 0x62c   : > { %v4063_v35 = vpop.eup %4062 }
 0x62d   : > { %v3667_v9 = vmul.f32 0.6931472, %v4063_v35 }
 0x62f   : > { %v3668_v2 = vadd.f32 %v3667_v9, %v3629_v39 }
 0x691   : > { %v3656_v13 = vpop.permute.xlu0 %3655 }
 0x692   : > { %4064 = vrcp.f32 %v3656_v13 }
 0x695   : > { %v3671_v15 = vpop.permute.xlu0 %3670 }
 0x696   : > { %v3673_v19 = vsub.f32 %v3668_v2, %v3671_v15 }
 0x698   : > { %3674 = vst.msk [vmem:[%s388_s26] sm:$0x1] %vm3664_vm1, %v3673_v19 }
 0x69f   : > { %v4065_v37 = vpop.eup %4064 }
 0x6a0   : > { %v3659_v8 = vmul.f32 %v4065_v37, %v4059_v11 }
 0x6a2   : > { %3661 = vrot.lane.b32.xlu1 %v3659_v8, %s4109_s18 }
 0x714   : > { %v3662_v54 = vpop.permute.xlu1 %3661 }
 0x715   : > { %3665 = vst.msk [vmem:[%s385_s28] sm:$0x1] %vm3664_vm1, %v3662_v54 }
 0x716 PF: > { %s25_s12 = sadd.s32 1, %s4105_s12   ;;  %s8824_s10 = smov %s4101_s11 }
 0x717   : > { %p22_p11 = scmp.ge.s32.totalorder %s25_s12, 4   ;;  %s8825_s11 = smov %s8827_s0 }
 0x719   :  { %24 = sbr.rel (!%p22_p11) target bundleno = 17 (0x11), region = 97 }

</bundles_post_ra>
